<compile_context>
chip_gen: v6e
topology: v6e:2x2x1
jax: 0.10.0
libtpu: 0.0.40
codegen_flags: <defaults>
</compile_context>

<pallas_src>
import functools

import jax
import jax.numpy as jnp
import numpy as np
from jax.experimental import pallas as pl
from jax.experimental.pallas import tpu as pltpu


# --------------------------------------------------------------------------
# Static configuration.
# --------------------------------------------------------------------------
N_STYLE, N_GENRE, N_EMOTION = 4, 5, 6        # data[o].x.shape[0]
N_NODES = N_STYLE + N_GENRE + N_EMOTION      # 15
ENC_DIM = 128                                # encoder output feature dim
NODE_FEAT = 32                               # raw node feature dim (x_dict)
X_FEAT = 128                                 # feature dim of direct input x
BATCH = 2

HIDDEN = N_NODES * ENC_DIM + X_FEAT          # 2048 (hidden_channels=None branch)
HIDDEN2 = HIDDEN // 2                        # 1024 (head_num_layers=2)
OUT_STYLE = N_STYLE - 1                      # 3
OUT_GENRE = N_GENRE                          # 5
OUT_EMOTION = N_EMOTION                      # 6
OUT_TOTAL = OUT_STYLE + OUT_GENRE + OUT_EMOTION   # 14
OUT_PAD = 128                                # lane-padded fused head width

K_STEPS = 2                                  # HIDDEN2 column chunks (DMA overlap)
TN = HIDDEN2 // K_STEPS                      # 512


def _full_spec(shape):
    """Full-array BlockSpec, constant across the 1-D grid."""
    n = len(shape)
    return pl.BlockSpec(shape, lambda j, _n=n: (0,) * _n)


# --------------------------------------------------------------------------
# Single fused kernel: encoders + batch-invariant cv row + Linear/ReLU chunk
# + fused-head partial logits, accumulated across the HIDDEN2 chunks.
# --------------------------------------------------------------------------
def _fused_forward_kernel(
    x_ref, xs_ref, xg_ref, xe_ref,
    esw_ref, esb_ref, egw_ref, egb_ref, eew_ref, eeb_ref,
    w1q_ref, w1s_ref, b1_ref,
    hq_ref, hs_ref, hb_ref,
    o_ref, acc_ref,
):
    f32, bf16 = jnp.float32, jnp.bfloat16
    j = pl.program_id(0)

    @pl.when(j == 0)
    def _():
        acc_ref[...] = jnp.zeros_like(acc_ref)

    # ---- synthetic encoders: z_t = x_t @ W_t + b_t (tiny, f32, recomputed) ----
    z_s = jnp.dot(xs_ref[...], esw_ref[...], preferred_element_type=f32) + esb_ref[...]
    z_g = jnp.dot(xg_ref[...], egw_ref[...], preferred_element_type=f32) + egb_ref[...]
    z_e = jnp.dot(xe_ref[...], eew_ref[...], preferred_element_type=f32) + eeb_ref[...]

    # ---- MLP layer 1, this column chunk (int8 weights, bf16 MXU, f32 acc) ----
    # x contribution: (B_pad, 128) @ (128, TN)
    w1x = w1q_ref[0:X_FEAT, :].astype(f32).astype(bf16)
    hx = jnp.dot(x_ref[...].astype(bf16), w1x, preferred_element_type=f32)

    # cv contribution is batch-invariant: contract the 15 encoder rows against
    # their own 128-row slab of W1 once, producing a single (1, TN) row
    # (equivalent to cat([x, cv*ones(B,.)],1) @ W1 — no broadcast, no scratch).
    cv = jnp.zeros((1, TN), f32)
    row = X_FEAT
    for z in (z_s, z_g, z_e):
        for i in range(z.shape[0]):                      # static unroll (15 rows)
            w_i = w1q_ref[row:row + ENC_DIM, :].astype(f32).astype(bf16)
            cv = cv + jnp.dot(z[i:i + 1, :].astype(bf16), w_i,
                              preferred_element_type=f32)
            row += ENC_DIM

    # per-output-column dequant scale applied to the result, then bias + ReLU.
    h = jnp.maximum((hx + cv) * w1s_ref[...] + b1_ref[...], 0.0)   # (B_pad, TN)

    # ---- fused heads: accumulate this chunk's contribution to the logits ----
    wh = hq_ref[...].astype(f32).astype(bf16)                      # (TN, 128)
    acc_ref[...] += jnp.dot(h.astype(bf16), wh, preferred_element_type=f32)

    @pl.when(j == pl.num_programs(0) - 1)
    def _():
        o_ref[...] = (acc_ref[...] * hs_ref[...] + hb_ref[...]).astype(o_ref.dtype)


def pallas_forward(params, x, x_dict, edge_index_dict):
    # TODO(synk): edge_index_dict is accepted but unused (encoders modeled as linears).
    del edge_index_dict
    B = x.shape[0]
    b_pad = max(8, ((B + 7) // 8) * 8)          # clean (8,128) tiles / stores
    x_p = jnp.pad(x, ((0, b_pad - B), (0, 0)))

    out_pad = pl.pallas_call(
        _fused_forward_kernel,
        out_shape=jax.ShapeDtypeStruct((b_pad, OUT_PAD), jnp.float32),
        grid=(K_STEPS,),
        in_specs=[
            _full_spec((b_pad, X_FEAT)),
            _full_spec((N_STYLE, NODE_FEAT)),
            _full_spec((N_GENRE, NODE_FEAT)),
            _full_spec((N_EMOTION, NODE_FEAT)),
            _full_spec((NODE_FEAT, ENC_DIM)),
            _full_spec((1, ENC_DIM)),
            _full_spec((NODE_FEAT, ENC_DIM)),
            _full_spec((1, ENC_DIM)),
            _full_spec((NODE_FEAT, ENC_DIM)),
            _full_spec((1, ENC_DIM)),
            pl.BlockSpec((HIDDEN, TN), lambda j: (0, j)),   # int8 W1 column chunk (1 MiB)
            pl.BlockSpec((1, TN), lambda j: (0, j)),        # W1 per-column scale chunk
            pl.BlockSpec((1, TN), lambda j: (0, j)),        # b1 chunk
            pl.BlockSpec((TN, OUT_PAD), lambda j: (j, 0)),  # int8 fused-heads row chunk
            _full_spec((1, OUT_PAD)),                       # heads per-column scale
            _full_spec((1, OUT_PAD)),                       # heads bias
        ],
        out_specs=_full_spec((b_pad, OUT_PAD)),
        scratch_shapes=[pltpu.VMEM((b_pad, OUT_PAD), jnp.float32)],   # logit accumulator
        compiler_params=pltpu.CompilerParams(
            dimension_semantics=("arbitrary",),   # logits accumulate across chunks
            # actual footprint ~3-4 MiB (int8 double-buffers + temporaries);
            # 32 MiB limit keeps generous headroom on every generation.
            vmem_limit_bytes=32 * 1024 * 1024,
        ),
    )(
        x_p,
        x_dict["style"], x_dict["genre"], x_dict["emotion"],
        params["enc_style_w"], params["enc_style_b"],
        params["enc_genre_w"], params["enc_genre_b"],
        params["enc_emotion_w"], params["enc_emotion_b"],
        params["w1_q"], params["w1_scale"], params["mlp_b1"],
        params["heads_q"], params["heads_scale"], params["heads_b"],
    )
    out = out_pad[:B]
    s0, s1 = OUT_STYLE, OUT_STYLE + OUT_GENRE
    return [out[:, :s0], out[:, s0:s1], out[:, s1:OUT_TOTAL]]


# --------------------------------------------------------------------------
# Parameter construction. PyTorch Linear weights stored pre-transposed as
# [in_features, out_features]; the two big matrices are int8-quantized with
# per-output-column scales (the dominant HBM stream).
# --------------------------------------------------------------------------
def _quantize_cols(w):
    """Symmetric per-output-column int8 quantization. w: (K, N) float32."""
    w = np.asarray(w, np.float32)
    amax = np.max(np.abs(w), axis=0, keepdims=True)             # (1, N)
    scale = np.where(amax > 0.0, amax / 127.0, 1.0).astype(np.float32)
    q = np.clip(np.rint(w / scale), -127, 127).astype(np.int8)
    return jnp.asarray(q), jnp.asarray(scale)


def make_params(key):
    ks = jax.random.split(key, 14)

    def lin(kw, kb, fan_in, fan_out):
        bound = 1.0 / np.sqrt(fan_in)
        w = jax.random.uniform(kw, (fan_in, fan_out), jnp.float32, -bound, bound)
        b = jax.random.uniform(kb, (1, fan_out), jnp.float32, -bound, bound)
        return w, b

    p = {}
    p["enc_style_w"], p["enc_style_b"] = lin(ks[0], ks[1], NODE_FEAT, ENC_DIM)
    p["enc_genre_w"], p["enc_genre_b"] = lin(ks[2], ks[3], NODE_FEAT, ENC_DIM)
    p["enc_emotion_w"], p["enc_emotion_b"] = lin(ks[4], ks[5], NODE_FEAT, ENC_DIM)

    w1, b1 = lin(ks[6], ks[7], HIDDEN, HIDDEN2)
    p["w1_q"], p["w1_scale"] = _quantize_cols(w1)     # int8 + (1,1024) f32 scale
    p["mlp_b1"] = b1                                  # f32 bias

    # Three heads fused along the output axis, lane-padded to 128, quantized.
    ws_w, ws_b = lin(ks[8], ks[9], HIDDEN2, OUT_STYLE)
    wg_w, wg_b = lin(ks[10], ks[11], HIDDEN2, OUT_GENRE)
    we_w, we_b = lin(ks[12], ks[13], HIDDEN2, OUT_EMOTION)
    heads_w = np.concatenate(
        [np.asarray(ws_w), np.asarray(wg_w), np.asarray(we_w)], axis=1)   # (1024, 14)
    heads_b = np.concatenate(
        [np.asarray(ws_b), np.asarray(wg_b), np.asarray(we_b)], axis=1)   # (1, 14)
    heads_w = np.pad(heads_w, ((0, 0), (0, OUT_PAD - OUT_TOTAL)))
    heads_b = np.pad(heads_b, ((0, 0), (0, OUT_PAD - OUT_TOTAL)))
    p["heads_q"], p["heads_scale"] = _quantize_cols(heads_w)
    p["heads_b"] = jnp.asarray(heads_b.astype(np.float32))
    return p


# --------------------------------------------------------------------------
# Pure-numpy reference (uses the dequantized stored weights; only the kernel's
# bf16 activation rounding shows up in the comparison).
# --------------------------------------------------------------------------
def forward_ref(params, x, x_dict):
    def deq(q, s):
        return np.asarray(q, np.float32) * np.asarray(s, np.float32)

    p = {k: np.asarray(v, dtype=np.float32)
         for k, v in params.items() if not k.endswith("_q")}
    w1 = deq(params["w1_q"], params["w1_scale"])
    heads = deq(params["heads_q"], params["heads_scale"])
    x = np.asarray(x, np.float32)

    def lin(a, w, b):
        return a @ w + b

    z_s = lin(np.asarray(x_dict["style"]), p["enc_style_w"], p["enc_style_b"])
    z_g = lin(np.asarray(x_dict["genre"]), p["enc_genre_w"], p["enc_genre_b"])
    z_e = lin(np.asarray(x_dict["emotion"]), p["enc_emotion_w"], p["enc_emotion_b"])
    cv = np.concatenate([z_s.reshape(-1), z_g.reshape(-1), z_e.reshape(-1)])
    cv = np.broadcast_to(cv[None, :], (x.shape[0], cv.shape[0]))
    shared = np.concatenate([x, cv], axis=1)
    h = np.maximum(lin(shared, w1, p["mlp_b1"]), 0.0)
    out = lin(h, heads, p["heads_b"])[:, :OUT_TOTAL]
    s0, s1 = OUT_STYLE, OUT_STYLE + OUT_GENRE
    return [out[:, :s0], out[:, s0:s1], out[:, s1:]]


if __name__ == "__main__":
    key = jax.random.PRNGKey(0)
    k_p, k_x, k_s, k_g, k_e = jax.random.split(key, 5)

    params = make_params(k_p)
    x = jax.random.normal(k_x, (BATCH, X_FEAT), jnp.float32)
    x_dict = {
        "style": jax.random.normal(k_s, (N_STYLE, NODE_FEAT), jnp.float32),
        "genre": jax.random.normal(k_g, (N_GENRE, NODE_FEAT), jnp.float32),
        "emotion": jax.random.normal(k_e, (N_EMOTION, NODE_FEAT), jnp.float32),
    }
    edge_index_dict = {}  # unused by the synthetic encoders

    fwd = jax.jit(functools.partial(pallas_forward, params))
    outs = fwd(x, x_dict, edge_index_dict)
    outs = [jax.block_until_ready(o) for o in outs]

    refs = forward_ref(params, x, x_dict)
    for o, r in zip(outs, refs):
        assert o.shape == r.shape, (o.shape, r.shape)
        np.testing.assert_allclose(np.asarray(o), r, rtol=2e-2, atol=2e-2)

    print("KERNEL_OK")
</pallas_src>

<mosaic_0001>
module attributes {stable_mosaic.version = 11 : i64} {
  func.func @_fused_forward_kernel(%arg0: i32, %arg1: memref<8x128xf32, #tpu.memory_space<vmem>>, %arg2: memref<4x32xf32, #tpu.memory_space<vmem>>, %arg3: memref<5x32xf32, #tpu.memory_space<vmem>>, %arg4: memref<6x32xf32, #tpu.memory_space<vmem>>, %arg5: memref<32x128xf32, #tpu.memory_space<vmem>>, %arg6: memref<1x128xf32, #tpu.memory_space<vmem>>, %arg7: memref<32x128xf32, #tpu.memory_space<vmem>>, %arg8: memref<1x128xf32, #tpu.memory_space<vmem>>, %arg9: memref<32x128xf32, #tpu.memory_space<vmem>>, %arg10: memref<1x128xf32, #tpu.memory_space<vmem>>, %arg11: memref<2048x512xi8, #tpu.memory_space<vmem>>, %arg12: memref<1x512xf32, #tpu.memory_space<vmem>>, %arg13: memref<1x512xf32, #tpu.memory_space<vmem>>, %arg14: memref<512x128xi8, #tpu.memory_space<vmem>>, %arg15: memref<1x128xf32, #tpu.memory_space<vmem>>, %arg16: memref<1x128xf32, #tpu.memory_space<vmem>>, %arg17: memref<8x128xf32, #tpu.memory_space<vmem>>, %arg18: memref<8x128xf32, #tpu.memory_space<vmem>>) attributes {dimension_semantics = [#tpu.dimension_semantics<arbitrary>], iteration_bounds = array<i64: 2>, scalar_prefetch = 0 : i64, scratch_operands = 1 : i64, tpu.core_type = #tpu.core_type<tc>, window_params = [{pipeline_mode = #tpu.pipeline_mode<synchronous>, transform_indices = @transform_0, window_bounds = array<i64: 8, 128>}, {pipeline_mode = #tpu.pipeline_mode<synchronous>, transform_indices = @transform_1, window_bounds = array<i64: 4, 32>}, {pipeline_mode = #tpu.pipeline_mode<synchronous>, transform_indices = @transform_2, window_bounds = array<i64: 5, 32>}, {pipeline_mode = #tpu.pipeline_mode<synchronous>, transform_indices = @transform_3, window_bounds = array<i64: 6, 32>}, {pipeline_mode = #tpu.pipeline_mode<synchronous>, transform_indices = @transform_4, window_bounds = array<i64: 32, 128>}, {pipeline_mode = #tpu.pipeline_mode<synchronous>, transform_indices = @transform_5, window_bounds = array<i64: 1, 128>}, {pipeline_mode = #tpu.pipeline_mode<synchronous>, transform_indices = @transform_6, window_bounds = array<i64: 32, 128>}, {pipeline_mode = #tpu.pipeline_mode<synchronous>, transform_indices = @transform_7, window_bounds = array<i64: 1, 128>}, {pipeline_mode = #tpu.pipeline_mode<synchronous>, transform_indices = @transform_8, window_bounds = array<i64: 32, 128>}, {pipeline_mode = #tpu.pipeline_mode<synchronous>, transform_indices = @transform_9, window_bounds = array<i64: 1, 128>}, {transform_indices = @transform_10, window_bounds = array<i64: 2048, 512>}, {transform_indices = @transform_11, window_bounds = array<i64: 1, 512>}, {transform_indices = @transform_12, window_bounds = array<i64: 1, 512>}, {transform_indices = @transform_13, window_bounds = array<i64: 512, 128>}, {pipeline_mode = #tpu.pipeline_mode<synchronous>, transform_indices = @transform_14, window_bounds = array<i64: 1, 128>}, {pipeline_mode = #tpu.pipeline_mode<synchronous>, transform_indices = @transform_15, window_bounds = array<i64: 1, 128>}, {pipeline_mode = #tpu.pipeline_mode<synchronous>, transform_indices = @transform_16, window_bounds = array<i64: 8, 128>}]} {
    %c0_i32 = arith.constant 0 : i32
    %0 = arith.cmpi eq, %arg0, %c0_i32 : i32
    %1 = arith.extui %0 : i1 to i32
    %c0_i32_0 = arith.constant 0 : i32
    %2 = arith.cmpi ne, %1, %c0_i32_0 : i32
    scf.if %2 {
      %cst_69 = arith.constant 0.000000e+00 : f32
      %154 = vector.broadcast %cst_69 : f32 to vector<8x128xf32>
      %c0_70 = arith.constant 0 : index
      %c0_71 = arith.constant 0 : index
      %155 = vector.load %arg18[%c0_70, %c0_71] : memref<8x128xf32, #tpu.memory_space<vmem>>, vector<8x128xf32>
      tpu.vector_store %arg18[%c0_70, %c0_71], %154 {strides = array<i32>} : memref<8x128xf32, #tpu.memory_space<vmem>>, vector<8x128xf32>,
    } else {
    }
    %c0 = arith.constant 0 : index
    %c0_1 = arith.constant 0 : index
    %3 = vector.load %arg2[%c0, %c0_1] : memref<4x32xf32, #tpu.memory_space<vmem>>, vector<4x32xf32>
    %c0_2 = arith.constant 0 : index
    %c0_3 = arith.constant 0 : index
    %4 = vector.load %arg5[%c0_2, %c0_3] : memref<32x128xf32, #tpu.memory_space<vmem>>, vector<32x128xf32>
    %cst = arith.constant dense<0.000000e+00> : vector<4x128xf32>
    %5 = tpu.matmul %3, %4, %cst {dimension_numbers = #tpu.dot_dimension_numbers<[1], [0], [0], [1], [0, 0, 1, 1], [], []>} : vector<4x32xf32>, vector<32x128xf32>, vector<4x128xf32> -> vector<4x128xf32>
    %c0_4 = arith.constant 0 : index
    %c0_5 = arith.constant 0 : index
    %6 = vector.load %arg6[%c0_4, %c0_5] : memref<1x128xf32, #tpu.memory_space<vmem>>, vector<1x128xf32>
    %7 = vector.broadcast %6 : vector<1x128xf32> to vector<4x128xf32>
    %8 = arith.addf %5, %7 : vector<4x128xf32>
    %c0_6 = arith.constant 0 : index
    %c0_7 = arith.constant 0 : index
    %9 = vector.load %arg3[%c0_6, %c0_7] : memref<5x32xf32, #tpu.memory_space<vmem>>, vector<5x32xf32>
    %c0_8 = arith.constant 0 : index
    %c0_9 = arith.constant 0 : index
    %10 = vector.load %arg7[%c0_8, %c0_9] : memref<32x128xf32, #tpu.memory_space<vmem>>, vector<32x128xf32>
    %cst_10 = arith.constant dense<0.000000e+00> : vector<5x128xf32>
    %11 = tpu.matmul %9, %10, %cst_10 {dimension_numbers = #tpu.dot_dimension_numbers<[1], [0], [0], [1], [0, 0, 1, 1], [], []>} : vector<5x32xf32>, vector<32x128xf32>, vector<5x128xf32> -> vector<5x128xf32>
    %c0_11 = arith.constant 0 : index
    %c0_12 = arith.constant 0 : index
    %12 = vector.load %arg8[%c0_11, %c0_12] : memref<1x128xf32, #tpu.memory_space<vmem>>, vector<1x128xf32>
    %13 = vector.broadcast %12 : vector<1x128xf32> to vector<5x128xf32>
    %14 = arith.addf %11, %13 : vector<5x128xf32>
    %c0_13 = arith.constant 0 : index
    %c0_14 = arith.constant 0 : index
    %15 = vector.load %arg4[%c0_13, %c0_14] : memref<6x32xf32, #tpu.memory_space<vmem>>, vector<6x32xf32>
    %c0_15 = arith.constant 0 : index
    %c0_16 = arith.constant 0 : index
    %16 = vector.load %arg9[%c0_15, %c0_16] : memref<32x128xf32, #tpu.memory_space<vmem>>, vector<32x128xf32>
    %cst_17 = arith.constant dense<0.000000e+00> : vector<6x128xf32>
    %17 = tpu.matmul %15, %16, %cst_17 {dimension_numbers = #tpu.dot_dimension_numbers<[1], [0], [0], [1], [0, 0, 1, 1], [], []>} : vector<6x32xf32>, vector<32x128xf32>, vector<6x128xf32> -> vector<6x128xf32>
    %c0_18 = arith.constant 0 : index
    %c0_19 = arith.constant 0 : index
    %18 = vector.load %arg10[%c0_18, %c0_19] : memref<1x128xf32, #tpu.memory_space<vmem>>, vector<1x128xf32>
    %19 = vector.broadcast %18 : vector<1x128xf32> to vector<6x128xf32>
    %20 = arith.addf %17, %19 : vector<6x128xf32>
    %c0_20 = arith.constant 0 : index
    %c0_21 = arith.constant 0 : index
    %21 = vector.load %arg11[%c0_20, %c0_21] : memref<2048x512xi8, #tpu.memory_space<vmem>>, vector<128x512xi8>
    %22 = arith.sitofp %21 : vector<128x512xi8> to vector<128x512xf32>
    %23 = arith.truncf %22 : vector<128x512xf32> to vector<128x512xbf16>
    %c0_22 = arith.constant 0 : index
    %c0_23 = arith.constant 0 : index
    %24 = vector.load %arg1[%c0_22, %c0_23] : memref<8x128xf32, #tpu.memory_space<vmem>>, vector<8x128xf32>
    %25 = arith.truncf %24 : vector<8x128xf32> to vector<8x128xbf16>
    %cst_24 = arith.constant dense<0.000000e+00> : vector<8x512xf32>
    %26 = tpu.matmul %25, %23, %cst_24 {dimension_numbers = #tpu.dot_dimension_numbers<[1], [0], [0], [1], [0, 0, 1, 1], [], []>} : vector<8x128xbf16>, vector<128x512xbf16>, vector<8x512xf32> -> vector<8x512xf32>
    %cst_25 = arith.constant 0.000000e+00 : f32
    %27 = vector.broadcast %cst_25 : f32 to vector<1x512xf32>
    %c128 = arith.constant 128 : index
    %c0_26 = arith.constant 0 : index
    %28 = vector.load %arg11[%c128, %c0_26] : memref<2048x512xi8, #tpu.memory_space<vmem>>, vector<128x512xi8>
    %29 = arith.sitofp %28 : vector<128x512xi8> to vector<128x512xf32>
    %30 = arith.truncf %29 : vector<128x512xf32> to vector<128x512xbf16>
    %31 = vector.extract_strided_slice %8 {offsets = [0, 0], sizes = [1, 128], strides = [1, 1]} : vector<4x128xf32> to vector<1x128xf32>
    %32 = arith.truncf %31 : vector<1x128xf32> to vector<1x128xbf16>
    %cst_27 = arith.constant dense<0.000000e+00> : vector<1x512xf32>
    %33 = tpu.matmul %32, %30, %cst_27 {dimension_numbers = #tpu.dot_dimension_numbers<[1], [0], [0], [1], [0, 0, 1, 1], [], []>} : vector<1x128xbf16>, vector<128x512xbf16>, vector<1x512xf32> -> vector<1x512xf32>
    %34 = arith.addf %27, %33 : vector<1x512xf32>
    %c256 = arith.constant 256 : index
    %c0_28 = arith.constant 0 : index
    %35 = vector.load %arg11[%c256, %c0_28] : memref<2048x512xi8, #tpu.memory_space<vmem>>, vector<128x512xi8>
    %36 = arith.sitofp %35 : vector<128x512xi8> to vector<128x512xf32>
    %37 = arith.truncf %36 : vector<128x512xf32> to vector<128x512xbf16>
    %38 = vector.extract_strided_slice %8 {offsets = [1, 0], sizes = [1, 128], strides = [1, 1]} : vector<4x128xf32> to vector<1x128xf32>
    %39 = arith.truncf %38 : vector<1x128xf32> to vector<1x128xbf16>
    %cst_29 = arith.constant dense<0.000000e+00> : vector<1x512xf32>
    %40 = tpu.matmul %39, %37, %cst_29 {dimension_numbers = #tpu.dot_dimension_numbers<[1], [0], [0], [1], [0, 0, 1, 1], [], []>} : vector<1x128xbf16>, vector<128x512xbf16>, vector<1x512xf32> -> vector<1x512xf32>
    %41 = arith.addf %34, %40 : vector<1x512xf32>
    %c384 = arith.constant 384 : index
    %c0_30 = arith.constant 0 : index
    %42 = vector.load %arg11[%c384, %c0_30] : memref<2048x512xi8, #tpu.memory_space<vmem>>, vector<128x512xi8>
    %43 = arith.sitofp %42 : vector<128x512xi8> to vector<128x512xf32>
    %44 = arith.truncf %43 : vector<128x512xf32> to vector<128x512xbf16>
    %45 = vector.extract_strided_slice %8 {offsets = [2, 0], sizes = [1, 128], strides = [1, 1]} : vector<4x128xf32> to vector<1x128xf32>
    %46 = arith.truncf %45 : vector<1x128xf32> to vector<1x128xbf16>
    %cst_31 = arith.constant dense<0.000000e+00> : vector<1x512xf32>
    %47 = tpu.matmul %46, %44, %cst_31 {dimension_numbers = #tpu.dot_dimension_numbers<[1], [0], [0], [1], [0, 0, 1, 1], [], []>} : vector<1x128xbf16>, vector<128x512xbf16>, vector<1x512xf32> -> vector<1x512xf32>
    %48 = arith.addf %41, %47 : vector<1x512xf32>
    %c512 = arith.constant 512 : index
    %c0_32 = arith.constant 0 : index
    %49 = vector.load %arg11[%c512, %c0_32] : memref<2048x512xi8, #tpu.memory_space<vmem>>, vector<128x512xi8>
    %50 = arith.sitofp %49 : vector<128x512xi8> to vector<128x512xf32>
    %51 = arith.truncf %50 : vector<128x512xf32> to vector<128x512xbf16>
    %52 = vector.extract_strided_slice %8 {offsets = [3, 0], sizes = [1, 128], strides = [1, 1]} : vector<4x128xf32> to vector<1x128xf32>
    %53 = arith.truncf %52 : vector<1x128xf32> to vector<1x128xbf16>
    %cst_33 = arith.constant dense<0.000000e+00> : vector<1x512xf32>
    %54 = tpu.matmul %53, %51, %cst_33 {dimension_numbers = #tpu.dot_dimension_numbers<[1], [0], [0], [1], [0, 0, 1, 1], [], []>} : vector<1x128xbf16>, vector<128x512xbf16>, vector<1x512xf32> -> vector<1x512xf32>
    %55 = arith.addf %48, %54 : vector<1x512xf32>
    %c640 = arith.constant 640 : index
    %c0_34 = arith.constant 0 : index
    %56 = vector.load %arg11[%c640, %c0_34] : memref<2048x512xi8, #tpu.memory_space<vmem>>, vector<128x512xi8>
    %57 = arith.sitofp %56 : vector<128x512xi8> to vector<128x512xf32>
    %58 = arith.truncf %57 : vector<128x512xf32> to vector<128x512xbf16>
    %59 = vector.extract_strided_slice %14 {offsets = [0, 0], sizes = [1, 128], strides = [1, 1]} : vector<5x128xf32> to vector<1x128xf32>
    %60 = arith.truncf %59 : vector<1x128xf32> to vector<1x128xbf16>
    %cst_35 = arith.constant dense<0.000000e+00> : vector<1x512xf32>
    %61 = tpu.matmul %60, %58, %cst_35 {dimension_numbers = #tpu.dot_dimension_numbers<[1], [0], [0], [1], [0, 0, 1, 1], [], []>} : vector<1x128xbf16>, vector<128x512xbf16>, vector<1x512xf32> -> vector<1x512xf32>
    %62 = arith.addf %55, %61 : vector<1x512xf32>
    %c768 = arith.constant 768 : index
    %c0_36 = arith.constant 0 : index
    %63 = vector.load %arg11[%c768, %c0_36] : memref<2048x512xi8, #tpu.memory_space<vmem>>, vector<128x512xi8>
    %64 = arith.sitofp %63 : vector<128x512xi8> to vector<128x512xf32>
    %65 = arith.truncf %64 : vector<128x512xf32> to vector<128x512xbf16>
    %66 = vector.extract_strided_slice %14 {offsets = [1, 0], sizes = [1, 128], strides = [1, 1]} : vector<5x128xf32> to vector<1x128xf32>
    %67 = arith.truncf %66 : vector<1x128xf32> to vector<1x128xbf16>
    %cst_37 = arith.constant dense<0.000000e+00> : vector<1x512xf32>
    %68 = tpu.matmul %67, %65, %cst_37 {dimension_numbers = #tpu.dot_dimension_numbers<[1], [0], [0], [1], [0, 0, 1, 1], [], []>} : vector<1x128xbf16>, vector<128x512xbf16>, vector<1x512xf32> -> vector<1x512xf32>
    %69 = arith.addf %62, %68 : vector<1x512xf32>
    %c896 = arith.constant 896 : index
    %c0_38 = arith.constant 0 : index
    %70 = vector.load %arg11[%c896, %c0_38] : memref<2048x512xi8, #tpu.memory_space<vmem>>, vector<128x512xi8>
    %71 = arith.sitofp %70 : vector<128x512xi8> to vector<128x512xf32>
    %72 = arith.truncf %71 : vector<128x512xf32> to vector<128x512xbf16>
    %73 = vector.extract_strided_slice %14 {offsets = [2, 0], sizes = [1, 128], strides = [1, 1]} : vector<5x128xf32> to vector<1x128xf32>
    %74 = arith.truncf %73 : vector<1x128xf32> to vector<1x128xbf16>
    %cst_39 = arith.constant dense<0.000000e+00> : vector<1x512xf32>
    %75 = tpu.matmul %74, %72, %cst_39 {dimension_numbers = #tpu.dot_dimension_numbers<[1], [0], [0], [1], [0, 0, 1, 1], [], []>} : vector<1x128xbf16>, vector<128x512xbf16>, vector<1x512xf32> -> vector<1x512xf32>
    %76 = arith.addf %69, %75 : vector<1x512xf32>
    %c1024 = arith.constant 1024 : index
    %c0_40 = arith.constant 0 : index
    %77 = vector.load %arg11[%c1024, %c0_40] : memref<2048x512xi8, #tpu.memory_space<vmem>>, vector<128x512xi8>
    %78 = arith.sitofp %77 : vector<128x512xi8> to vector<128x512xf32>
    %79 = arith.truncf %78 : vector<128x512xf32> to vector<128x512xbf16>
    %80 = vector.extract_strided_slice %14 {offsets = [3, 0], sizes = [1, 128], strides = [1, 1]} : vector<5x128xf32> to vector<1x128xf32>
    %81 = arith.truncf %80 : vector<1x128xf32> to vector<1x128xbf16>
    %cst_41 = arith.constant dense<0.000000e+00> : vector<1x512xf32>
    %82 = tpu.matmul %81, %79, %cst_41 {dimension_numbers = #tpu.dot_dimension_numbers<[1], [0], [0], [1], [0, 0, 1, 1], [], []>} : vector<1x128xbf16>, vector<128x512xbf16>, vector<1x512xf32> -> vector<1x512xf32>
    %83 = arith.addf %76, %82 : vector<1x512xf32>
    %c1152 = arith.constant 1152 : index
    %c0_42 = arith.constant 0 : index
    %84 = vector.load %arg11[%c1152, %c0_42] : memref<2048x512xi8, #tpu.memory_space<vmem>>, vector<128x512xi8>
    %85 = arith.sitofp %84 : vector<128x512xi8> to vector<128x512xf32>
    %86 = arith.truncf %85 : vector<128x512xf32> to vector<128x512xbf16>
    %87 = vector.extract_strided_slice %14 {offsets = [4, 0], sizes = [1, 128], strides = [1, 1]} : vector<5x128xf32> to vector<1x128xf32>
    %88 = arith.truncf %87 : vector<1x128xf32> to vector<1x128xbf16>
    %cst_43 = arith.constant dense<0.000000e+00> : vector<1x512xf32>
    %89 = tpu.matmul %88, %86, %cst_43 {dimension_numbers = #tpu.dot_dimension_numbers<[1], [0], [0], [1], [0, 0, 1, 1], [], []>} : vector<1x128xbf16>, vector<128x512xbf16>, vector<1x512xf32> -> vector<1x512xf32>
    %90 = arith.addf %83, %89 : vector<1x512xf32>
    %c1280 = arith.constant 1280 : index
    %c0_44 = arith.constant 0 : index
    %91 = vector.load %arg11[%c1280, %c0_44] : memref<2048x512xi8, #tpu.memory_space<vmem>>, vector<128x512xi8>
    %92 = arith.sitofp %91 : vector<128x512xi8> to vector<128x512xf32>
    %93 = arith.truncf %92 : vector<128x512xf32> to vector<128x512xbf16>
    %94 = vector.extract_strided_slice %20 {offsets = [0, 0], sizes = [1, 128], strides = [1, 1]} : vector<6x128xf32> to vector<1x128xf32>
    %95 = arith.truncf %94 : vector<1x128xf32> to vector<1x128xbf16>
    %cst_45 = arith.constant dense<0.000000e+00> : vector<1x512xf32>
    %96 = tpu.matmul %95, %93, %cst_45 {dimension_numbers = #tpu.dot_dimension_numbers<[1], [0], [0], [1], [0, 0, 1, 1], [], []>} : vector<1x128xbf16>, vector<128x512xbf16>, vector<1x512xf32> -> vector<1x512xf32>
    %97 = arith.addf %90, %96 : vector<1x512xf32>
    %c1408 = arith.constant 1408 : index
    %c0_46 = arith.constant 0 : index
    %98 = vector.load %arg11[%c1408, %c0_46] : memref<2048x512xi8, #tpu.memory_space<vmem>>, vector<128x512xi8>
    %99 = arith.sitofp %98 : vector<128x512xi8> to vector<128x512xf32>
    %100 = arith.truncf %99 : vector<128x512xf32> to vector<128x512xbf16>
    %101 = vector.extract_strided_slice %20 {offsets = [1, 0], sizes = [1, 128], strides = [1, 1]} : vector<6x128xf32> to vector<1x128xf32>
    %102 = arith.truncf %101 : vector<1x128xf32> to vector<1x128xbf16>
    %cst_47 = arith.constant dense<0.000000e+00> : vector<1x512xf32>
    %103 = tpu.matmul %102, %100, %cst_47 {dimension_numbers = #tpu.dot_dimension_numbers<[1], [0], [0], [1], [0, 0, 1, 1], [], []>} : vector<1x128xbf16>, vector<128x512xbf16>, vector<1x512xf32> -> vector<1x512xf32>
    %104 = arith.addf %97, %103 : vector<1x512xf32>
    %c1536 = arith.constant 1536 : index
    %c0_48 = arith.constant 0 : index
    %105 = vector.load %arg11[%c1536, %c0_48] : memref<2048x512xi8, #tpu.memory_space<vmem>>, vector<128x512xi8>
    %106 = arith.sitofp %105 : vector<128x512xi8> to vector<128x512xf32>
    %107 = arith.truncf %106 : vector<128x512xf32> to vector<128x512xbf16>
    %108 = vector.extract_strided_slice %20 {offsets = [2, 0], sizes = [1, 128], strides = [1, 1]} : vector<6x128xf32> to vector<1x128xf32>
    %109 = arith.truncf %108 : vector<1x128xf32> to vector<1x128xbf16>
    %cst_49 = arith.constant dense<0.000000e+00> : vector<1x512xf32>
    %110 = tpu.matmul %109, %107, %cst_49 {dimension_numbers = #tpu.dot_dimension_numbers<[1], [0], [0], [1], [0, 0, 1, 1], [], []>} : vector<1x128xbf16>, vector<128x512xbf16>, vector<1x512xf32> -> vector<1x512xf32>
    %111 = arith.addf %104, %110 : vector<1x512xf32>
    %c1664 = arith.constant 1664 : index
    %c0_50 = arith.constant 0 : index
    %112 = vector.load %arg11[%c1664, %c0_50] : memref<2048x512xi8, #tpu.memory_space<vmem>>, vector<128x512xi8>
    %113 = arith.sitofp %112 : vector<128x512xi8> to vector<128x512xf32>
    %114 = arith.truncf %113 : vector<128x512xf32> to vector<128x512xbf16>
    %115 = vector.extract_strided_slice %20 {offsets = [3, 0], sizes = [1, 128], strides = [1, 1]} : vector<6x128xf32> to vector<1x128xf32>
    %116 = arith.truncf %115 : vector<1x128xf32> to vector<1x128xbf16>
    %cst_51 = arith.constant dense<0.000000e+00> : vector<1x512xf32>
    %117 = tpu.matmul %116, %114, %cst_51 {dimension_numbers = #tpu.dot_dimension_numbers<[1], [0], [0], [1], [0, 0, 1, 1], [], []>} : vector<1x128xbf16>, vector<128x512xbf16>, vector<1x512xf32> -> vector<1x512xf32>
    %118 = arith.addf %111, %117 : vector<1x512xf32>
    %c1792 = arith.constant 1792 : index
    %c0_52 = arith.constant 0 : index
    %119 = vector.load %arg11[%c1792, %c0_52] : memref<2048x512xi8, #tpu.memory_space<vmem>>, vector<128x512xi8>
    %120 = arith.sitofp %119 : vector<128x512xi8> to vector<128x512xf32>
    %121 = arith.truncf %120 : vector<128x512xf32> to vector<128x512xbf16>
    %122 = vector.extract_strided_slice %20 {offsets = [4, 0], sizes = [1, 128], strides = [1, 1]} : vector<6x128xf32> to vector<1x128xf32>
    %123 = arith.truncf %122 : vector<1x128xf32> to vector<1x128xbf16>
    %cst_53 = arith.constant dense<0.000000e+00> : vector<1x512xf32>
    %124 = tpu.matmul %123, %121, %cst_53 {dimension_numbers = #tpu.dot_dimension_numbers<[1], [0], [0], [1], [0, 0, 1, 1], [], []>} : vector<1x128xbf16>, vector<128x512xbf16>, vector<1x512xf32> -> vector<1x512xf32>
    %125 = arith.addf %118, %124 : vector<1x512xf32>
    %c1920 = arith.constant 1920 : index
    %c0_54 = arith.constant 0 : index
    %126 = vector.load %arg11[%c1920, %c0_54] : memref<2048x512xi8, #tpu.memory_space<vmem>>, vector<128x512xi8>
    %127 = arith.sitofp %126 : vector<128x512xi8> to vector<128x512xf32>
    %128 = arith.truncf %127 : vector<128x512xf32> to vector<128x512xbf16>
    %129 = vector.extract_strided_slice %20 {offsets = [5, 0], sizes = [1, 128], strides = [1, 1]} : vector<6x128xf32> to vector<1x128xf32>
    %130 = arith.truncf %129 : vector<1x128xf32> to vector<1x128xbf16>
    %cst_55 = arith.constant dense<0.000000e+00> : vector<1x512xf32>
    %131 = tpu.matmul %130, %128, %cst_55 {dimension_numbers = #tpu.dot_dimension_numbers<[1], [0], [0], [1], [0, 0, 1, 1], [], []>} : vector<1x128xbf16>, vector<128x512xbf16>, vector<1x512xf32> -> vector<1x512xf32>
    %132 = arith.addf %125, %131 : vector<1x512xf32>
    %133 = vector.broadcast %132 : vector<1x512xf32> to vector<8x512xf32>
    %134 = arith.addf %26, %133 : vector<8x512xf32>
    %c0_56 = arith.constant 0 : index
    %c0_57 = arith.constant 0 : index
    %135 = vector.load %arg12[%c0_56, %c0_57] : memref<1x512xf32, #tpu.memory_space<vmem>>, vector<1x512xf32>
    %136 = vector.broadcast %135 : vector<1x512xf32> to vector<8x512xf32>
    %137 = arith.mulf %134, %136 : vector<8x512xf32>
    %c0_58 = arith.constant 0 : index
    %c0_59 = arith.constant 0 : index
    %138 = vector.load %arg13[%c0_58, %c0_59] : memref<1x512xf32, #tpu.memory_space<vmem>>, vector<1x512xf32>
    %139 = vector.broadcast %138 : vector<1x512xf32> to vector<8x512xf32>
    %140 = arith.addf %137, %139 : vector<8x512xf32>
    %cst_60 = arith.constant 0.000000e+00 : f32
    %141 = vector.broadcast %cst_60 : f32 to vector<8x512xf32>
    %142 = arith.maximumf %140, %141 : vector<8x512xf32>
    %c0_61 = arith.constant 0 : index
    %c0_62 = arith.constant 0 : index
    %143 = vector.load %arg14[%c0_61, %c0_62] : memref<512x128xi8, #tpu.memory_space<vmem>>, vector<512x128xi8>
    %144 = arith.sitofp %143 : vector<512x128xi8> to vector<512x128xf32>
    %145 = arith.truncf %144 : vector<512x128xf32> to vector<512x128xbf16>
    %c0_63 = arith.constant 0 : index
    %c0_64 = arith.constant 0 : index
    %146 = vector.load %arg18[%c0_63, %c0_64] : memref<8x128xf32, #tpu.memory_space<vmem>>, vector<8x128xf32>
    %147 = arith.truncf %142 : vector<8x512xf32> to vector<8x512xbf16>
    %cst_65 = arith.constant dense<0.000000e+00> : vector<8x128xf32>
    %148 = tpu.matmul %147, %145, %cst_65 {dimension_numbers = #tpu.dot_dimension_numbers<[1], [0], [0], [1], [0, 0, 1, 1], [], []>} : vector<8x512xbf16>, vector<512x128xbf16>, vector<8x128xf32> -> vector<8x128xf32>
    %149 = arith.addf %146, %148 : vector<8x128xf32>
    %c0_66 = arith.constant 0 : index
    %c0_67 = arith.constant 0 : index
    %150 = vector.load %arg18[%c0_66, %c0_67] : memref<8x128xf32, #tpu.memory_space<vmem>>, vector<8x128xf32>
    tpu.vector_store %arg18[%c0_66, %c0_67], %149 {strides = array<i32>} : memref<8x128xf32, #tpu.memory_space<vmem>>, vector<8x128xf32>,
    %c1_i32 = arith.constant 1 : i32
    %151 = arith.cmpi eq, %arg0, %c1_i32 : i32
    %152 = arith.extui %151 : i1 to i32
    %c0_i32_68 = arith.constant 0 : i32
    %153 = arith.cmpi ne, %152, %c0_i32_68 : i32
    scf.if %153 {
      %c0_69 = arith.constant 0 : index
      %c0_70 = arith.constant 0 : index
      %154 = vector.load %arg18[%c0_69, %c0_70] : memref<8x128xf32, #tpu.memory_space<vmem>>, vector<8x128xf32>
      %c0_71 = arith.constant 0 : index
      %c0_72 = arith.constant 0 : index
      %155 = vector.load %arg15[%c0_71, %c0_72] : memref<1x128xf32, #tpu.memory_space<vmem>>, vector<1x128xf32>
      %156 = vector.broadcast %155 : vector<1x128xf32> to vector<8x128xf32>
      %157 = arith.mulf %154, %156 : vector<8x128xf32>
      %c0_73 = arith.constant 0 : index
      %c0_74 = arith.constant 0 : index
      %158 = vector.load %arg16[%c0_73, %c0_74] : memref<1x128xf32, #tpu.memory_space<vmem>>, vector<1x128xf32>
      %159 = vector.broadcast %158 : vector<1x128xf32> to vector<8x128xf32>
      %160 = arith.addf %157, %159 : vector<8x128xf32>
      %c0_75 = arith.constant 0 : index
      %c0_76 = arith.constant 0 : index
      %161 = vector.load %arg17[%c0_75, %c0_76] : memref<8x128xf32, #tpu.memory_space<vmem>>, vector<8x128xf32>
      tpu.vector_store %arg17[%c0_75, %c0_76], %160 {strides = array<i32>} : memref<8x128xf32, #tpu.memory_space<vmem>>, vector<8x128xf32>,
    } else {
    }
    return
  }
  func.func @transform_0(%arg0: i32) -> (i32, i32) {
    %c0_i32 = arith.constant 0 : i32
    %c0_i32_0 = arith.constant 0 : i32
    %c0_i32_1 = arith.constant 0 : i32
    return %c0_i32, %c0_i32_0 : i32, i32
  }
  func.func @transform_1(%arg0: i32) -> (i32, i32) {
    %c0_i32 = arith.constant 0 : i32
    %c0_i32_0 = arith.constant 0 : i32
    %c0_i32_1 = arith.constant 0 : i32
    return %c0_i32, %c0_i32_0 : i32, i32
  }
  func.func @transform_2(%arg0: i32) -> (i32, i32) {
    %c0_i32 = arith.constant 0 : i32
    %c0_i32_0 = arith.constant 0 : i32
    %c0_i32_1 = arith.constant 0 : i32
    return %c0_i32, %c0_i32_0 : i32, i32
  }
  func.func @transform_3(%arg0: i32) -> (i32, i32) {
    %c0_i32 = arith.constant 0 : i32
    %c0_i32_0 = arith.constant 0 : i32
    %c0_i32_1 = arith.constant 0 : i32
    return %c0_i32, %c0_i32_0 : i32, i32
  }
  func.func @transform_4(%arg0: i32) -> (i32, i32) {
    %c0_i32 = arith.constant 0 : i32
    %c0_i32_0 = arith.constant 0 : i32
    %c0_i32_1 = arith.constant 0 : i32
    return %c0_i32, %c0_i32_0 : i32, i32
  }
  func.func @transform_5(%arg0: i32) -> (i32, i32) {
    %c0_i32 = arith.constant 0 : i32
    %c0_i32_0 = arith.constant 0 : i32
    %c0_i32_1 = arith.constant 0 : i32
    return %c0_i32, %c0_i32_0 : i32, i32
  }
  func.func @transform_6(%arg0: i32) -> (i32, i32) {
    %c0_i32 = arith.constant 0 : i32
    %c0_i32_0 = arith.constant 0 : i32
    %c0_i32_1 = arith.constant 0 : i32
    return %c0_i32, %c0_i32_0 : i32, i32
  }
  func.func @transform_7(%arg0: i32) -> (i32, i32) {
    %c0_i32 = arith.constant 0 : i32
    %c0_i32_0 = arith.constant 0 : i32
    %c0_i32_1 = arith.constant 0 : i32
    return %c0_i32, %c0_i32_0 : i32, i32
  }
  func.func @transform_8(%arg0: i32) -> (i32, i32) {
    %c0_i32 = arith.constant 0 : i32
    %c0_i32_0 = arith.constant 0 : i32
    %c0_i32_1 = arith.constant 0 : i32
    return %c0_i32, %c0_i32_0 : i32, i32
  }
  func.func @transform_9(%arg0: i32) -> (i32, i32) {
    %c0_i32 = arith.constant 0 : i32
    %c0_i32_0 = arith.constant 0 : i32
    %c0_i32_1 = arith.constant 0 : i32
    return %c0_i32, %c0_i32_0 : i32, i32
  }
  func.func @transform_10(%arg0: i32) -> (i32, i32) {
    %c0_i32 = arith.constant 0 : i32
    %c0_i32_0 = arith.constant 0 : i32
    return %c0_i32, %arg0 : i32, i32
  }
  func.func @transform_11(%arg0: i32) -> (i32, i32) {
    %c0_i32 = arith.constant 0 : i32
    %c0_i32_0 = arith.constant 0 : i32
    return %c0_i32, %arg0 : i32, i32
  }
  func.func @transform_12(%arg0: i32) -> (i32, i32) {
    %c0_i32 = arith.constant 0 : i32
    %c0_i32_0 = arith.constant 0 : i32
    return %c0_i32, %arg0 : i32, i32
  }
  func.func @transform_13(%arg0: i32) -> (i32, i32) {
    %c0_i32 = arith.constant 0 : i32
    %c0_i32_0 = arith.constant 0 : i32
    return %arg0, %c0_i32 : i32, i32
  }
  func.func @transform_14(%arg0: i32) -> (i32, i32) {
    %c0_i32 = arith.constant 0 : i32
    %c0_i32_0 = arith.constant 0 : i32
    %c0_i32_1 = arith.constant 0 : i32
    return %c0_i32, %c0_i32_0 : i32, i32
  }
  func.func @transform_15(%arg0: i32) -> (i32, i32) {
    %c0_i32 = arith.constant 0 : i32
    %c0_i32_0 = arith.constant 0 : i32
    %c0_i32_1 = arith.constant 0 : i32
    return %c0_i32, %c0_i32_0 : i32, i32
  }
  func.func @transform_16(%arg0: i32) -> (i32, i32) {
    %c0_i32 = arith.constant 0 : i32
    %c0_i32_0 = arith.constant 0 : i32
    %c0_i32_1 = arith.constant 0 : i32
    return %c0_i32, %c0_i32_0 : i32, i32
  }
}

</mosaic_0001>

<bundles_post_ra>
// kernel: pallas_forward.1
= control target key start
LH: loop header
LB: loop body
LE: loop exit
PB: predicated region body
PF: predicated region fallthrough
CT: control target
= control target key end

     0   :  { %s5391_s0 = inlined_call_operand.vmem [shape: f32[8,128], index: 0, kind: input, shape index: {}]   ;;  %s5392_s1 = inlined_call_operand.hbm [shape: f32[4,32], index: 1, kind: input, shape index: {}]   ;;  %s5393_s2 = inlined_call_operand.hbm [shape: f32[5,32], index: 2, kind: input, shape index: {}]   ;;  %s5394_s3 = inlined_call_operand.hbm [shape: f32[6,32], index: 3, kind: input, shape index: {}]   ;;  %s5395_s4 = inlined_call_operand.hbm [shape: f32[32,128], index: 4, kind: input, shape index: {}]   ;;  %s5396_s5 = inlined_call_operand.hbm [shape: f32[1,128], index: 5, kind: input, shape index: {}]   ;;  %s5397_s6 = inlined_call_operand.hbm [shape: f32[32,128], index: 6, kind: input, shape index: {}]   ;;  %s5398_s7 = inlined_call_operand.hbm [shape: f32[1,128], index: 7, kind: input, shape index: {}]   ;;  %s5399_s8 = inlined_call_operand.hbm [shape: f32[32,128], index: 8, kind: input, shape index: {}]   ;;  %s5400_s9 = inlined_call_operand.hbm [shape: f32[1,128], index: 9, kind: input, shape index: {}]   ;;  %s5401_s10 = inlined_call_operand.hbm [shape: s8[2048,1024], index: 10, kind: input, shape index: {}]   ;;  %s5402_s11 = inlined_call_operand.hbm [shape: f32[1,1024], index: 11, kind: input, shape index: {}]   ;;  %s5403_s12 = inlined_call_operand.hbm [shape: f32[1,1024], index: 12, kind: input, shape index: {}]   ;;  %s5404_s13 = inlined_call_operand.hbm [shape: s8[1024,128], index: 13, kind: input, shape index: {}]   ;;  %s5405_s14 = inlined_call_operand.hbm [shape: f32[1,128], index: 14, kind: input, shape index: {}]   ;;  %s5406_s15 = inlined_call_operand.hbm [shape: f32[1,128], index: 15, kind: input, shape index: {}]   ;;  %s5407_s16 = inlined_call_operand.vmem [shape: f32[8,128], index: 16, kind: output, shape index: {}]  }
   0x1   :  { %5429 = sst [smem:[#allocation41_spill]] %s5391_s0 }
   0x2   :  { %5430 = sst [smem:[#allocation42_spill]] %s5393_s2 }
   0x3   :  { %5431 = sst [smem:[#allocation43_spill]] %s5395_s4 }
   0x4   :  { %5432 = sst [smem:[#allocation44_spill]] %s5397_s6 }
   0x5   :  { %5433 = sst [smem:[#allocation45_spill]] %s5399_s8 }
   0x6   :  { %5434 = sst [smem:[#allocation46_spill]] %s5401_s10 }
   0x7   :  { %5435 = sst [smem:[#allocation47_spill]] %s5404_s13 }
   0x8   :  { %5436 = sst [smem:[#allocation48_spill]] %s5405_s14 }
   0x9   :  { %5437 = sst [smem:[#allocation49_spill]] %s5407_s16 }
   0xa   :  { %21 = vsyncpa [#allocation4], 0 }
   0xb   :  { %22 = vsyncpa [#allocation6], 0 }
   0xc   :  { %23 = vsyncpa [#allocation9], 0 }
   0xd   :  { %24 = vsyncpa [#allocation12], 0 }
   0xe   :  { %25 = vsyncpa [#allocation15], 0 }
   0xf   :  { %26 = vsyncpa [#allocation18], 0 }
  0x10   :  { %28 = vsyncpa [#allocation18 + $0x1], 0 }
  0x11   :  { %29 = vsyncpa [#allocation21], 0 }
  0x12   :  { %31 = vsyncpa [#allocation21 + $0x1], 0 }
  0x13   :  { %32 = vsyncpa [#allocation24], 0  ;;  %s4550_s21 = smov 0   ;;  %s4552_s22 = smov 0  }
  0x14   :  { %s4554_s23 = smov 0   ;;  %s4556_s24 = smov 0  }
  0x15 LB: > { %5438 = sst [smem:[#allocation34_spill]] %s4431_s22  ;;  %s4441_s25 = smov [#allocation5]   ;;  %s4439_s24 = sphi %s4556_s24, %s5489_s24   ;;  %s4435_s23 = sphi %s4554_s23, %s5492_s23   ;;  %s4431_s22 = sphi %s4552_s22, %s5491_s22   ;;  %s4427_s21 = sphi %s4550_s21, %s5490_s21  }
  0x16   : > { %5439 = sst [smem:[#allocation35_spill]] %s4435_s23  ;;  %s447_s26 = sshll.u32 %s4441_s25, 4  ;;  %s448_s26 = int_to_ptr.vmem [resolvable:$true] %s447_s26 }
  0x17   : > { %s4571_s27 = sadd.s32 4294967295, %s4439_s24   ;;  %p3656_p0 = scmp.ge.s32.totalorder %s4439_s24, 1 }
  0x18   : > { %5440 = sst [smem:[#allocation36_spill]] %s4571_s27  ;;  %p5411_p1 = scmp.eq.s32.totalorder %s4571_s27, 0 }
  0x19   : > { %p420_p2 = scmp.lt.s32.totalorder %s4439_s24, 3  ;;  %s4442_s29 = smov [#allocation8]  }
  0x1a   : > { %s468_s30 = sshll.u32 %s4442_s29, 4  ;;  %s4443_s17 = smov [#allocation11]   ;;  %s4583_s30 = int_to_ptr.vmem [resolvable:$true] %s468_s30 }
  0x1b   : > { %p4577_p4 = pnand %p3656_p0, %p420_p2  ;;  %s492_s18 = sshll.u32 %s4443_s17, 4  ;;  %s4591_s18 = int_to_ptr.vmem [resolvable:$true] %s492_s18 }
  0x1c   : > { %s3990_s20 = scalar_lea.vmem %s448_s26, 128  ;;  %p3998_p11 = scmp.lt.s32.totalorder %s448_s26, %s448_s26 }
  0x1d   : > { %s5441_s28 = scalar_select %p4577_p4, 1, 0 }
  0x1e   : > { %p3857_p5 = pneg %p4577_p4  ;;  %p3991_p8 = scmp.ne.s32.totalorder %s448_s26, %s3990_s20 }
  0x1f   : > { %5442 = sst [smem:[#allocation37_spill]] %s5441_s28  ;;  %p3999_p12 = scmp.lt.s32.totalorder %s3990_s20, %s3990_s20 }
  0x20   : > { %p4587_p6 = pnand %p3857_p5, %p5411_p1 }
  0x21   : > { %p4000_p13 = por %p3999_p12, %p3998_p11 }
  0x22   : > { %s5443_s0 = scalar_select %p4587_p6, 1, 0 }
  0x23   : > { %p4595_p7 = pneg %p4587_p6 }
  0x25   : > { %s5444_s19 = scalar_select %p4595_p7, 1, 0 }
  0x26   : > { %p3993_p9 = pnand %p3991_p8, %p4595_p7 }
  0x28   : > { %p3994_p10 = pneg %p3993_p9 }
  0x2a   : > { %p4001_p0 = pnand %p4000_p13, %p3994_p10 }
  0x2c   : > { %4004 = shalt.err (!%p4001_p0)
}
  0x2d   : > { %s5445_s2 = sld [smem:[#allocation42_spill]]  ;;  %s4016_s17 = scalar_lea.vmem %s4583_s30, 512 }
  0x2e   : > { %p4017_p2 = scmp.ne.s32.totalorder %s4583_s30, %s4016_s17  ;;  %p4024_p9 = scmp.lt.s32.totalorder %s4583_s30, %s4583_s30 }
  0x2f   : > { %p4025_p11 = scmp.lt.s32.totalorder %s4016_s17, %s4016_s17 }
  0x30   : > { %p4019_p5 = pnand %p4017_p2, %p4595_p7 }
  0x31   : > { %p4026_p10 = por %p4025_p11, %p4024_p9 }
  0x32   : > { %p4020_p8 = pneg %p4019_p5 }
  0x33   : > { %3863 = dma.hbm_to_vmem [thread:$0]  (!%p4587_p6), %s5445_s2, 128, %s448_s26, [#allocation6]  }
  0x34   : > { %p4027_p12 = pnand %p4026_p10, %p4020_p8 }
  0x36   : > { %4030 = shalt.err (!%p4027_p12)
}
  0x37   : > { %s5408_s20 = smov 128   ;;  %s5409_s25 = smov 8  }
  0x38   : > { %s5446_s4 = sld [smem:[#allocation43_spill]]  ;;  %s4042_s17 = scalar_lea.vmem %s4591_s18, 512 }
  0x39   : > { %p4043_p13 = scmp.ne.s32.totalorder %s4591_s18, %s4042_s17  ;;  %p4050_p5 = scmp.lt.s32.totalorder %s4591_s18, %s4591_s18 }
  0x3a   : > { %p4051_p8 = scmp.lt.s32.totalorder %s4042_s17, %s4042_s17 }
  0x3b   : > { %p4045_p0 = pnand %p4043_p13, %p4595_p7 }
  0x3c   : > { %p4052_p9 = por %p4051_p8, %p4050_p5 }
  0x3d   : > { %p4046_p2 = pneg %p4045_p0 }
  0x3e   : > { %3869 = dma.hbm_to_vmem [thread:$0]  (!%p4587_p6), %s5446_s4, 512, %s4583_s30, [#allocation9], %s5408_s20, %s5408_s20, %s5409_s25  }
  0x3f   : > { %p4053_p11 = pnand %p4052_p9, %p4046_p2 }
  0x41   : > { %4056 = shalt.err (!%p4053_p11)
}
  0x42   : > { %s5447_s6 = sld [smem:[#allocation44_spill]]  ;;  %s4446_s30 = smov [#allocation14]  }
  0x43   : > { %s516_s29 = sshll.u32 %s4446_s30, 4  ;;  %s4447_s4 = smov [#allocation23]   ;;  %s517_s29 = int_to_ptr.vmem [resolvable:$true] %s516_s29 }
  0x44   : > { %s541_s16 = sshll.u32 %s4447_s4, 4  ;;  %s4068_s17 = scalar_lea.vmem %s517_s29, 512  ;;  %s542_s16 = int_to_ptr.vmem [resolvable:$true] %s541_s16 }
  0x45   : > { %p4069_p10 = scmp.ne.s32.totalorder %s517_s29, %s4068_s17  ;;  %p4076_p0 = scmp.lt.s32.totalorder %s517_s29, %s517_s29 }
  0x46   : > { %p4077_p2 = scmp.lt.s32.totalorder %s4068_s17, %s4068_s17 }
  0x47   : > { %p4071_p12 = pnand %p4069_p10, %p4595_p7 }
  0x48   : > { %3875 = dma.hbm_to_vmem [thread:$0]  (!%p4587_p6), %s5447_s6, 512, %s4591_s18, [#allocation12], %s5408_s20, %s5408_s20, %s5409_s25  }
  0x49   : > { %p4072_p13 = pneg %p4071_p12  ;;  %p4078_p5 = por %p4077_p2, %p4076_p0 }
  0x4b   : > { %p4079_p8 = pnand %p4078_p5, %p4072_p13 }
  0x4d   : > { %4082 = shalt.err (!%p4079_p8)
}
  0x4e   : > { %s5448_s8 = sld [smem:[#allocation45_spill]]  ;;  %s4094_s4 = scalar_lea.vmem %s542_s16, 16 }
  0x4f   : > { %p4095_p9 = scmp.ne.s32.totalorder %s542_s16, %s4094_s4  ;;  %s4101_s26 = scalar_lea.vmem %s542_s16, 32 }
  0x50   : > { %p4102_p12 = scmp.lt.s32.totalorder %s542_s16, %s542_s16  ;;  %p4103_p13 = scmp.lt.s32.totalorder %s4101_s26, %s4094_s4 }
  0x51   : > { %p4097_p11 = pnand %p4095_p9, %p4595_p7 }
  0x52   : > { %p4104_p0 = por %p4103_p13, %p4102_p12 }
  0x53   : > { %p4098_p10 = pneg %p4097_p11 }
  0x54   : > { %3881 = dma.hbm_to_vmem [thread:$0]  (!%p4587_p6), %s5448_s8, 512, %s517_s29, [#allocation15], %s5408_s20, %s5408_s20, %s5409_s25  }
  0x55   : > { %p4105_p2 = pnand %p4104_p0, %p4098_p10 }
  0x57   : > { %4108 = shalt.err (!%p4105_p2)
}
  0x58   : > { %s5449_s14 = sld [smem:[#allocation48_spill]]  ;;  %s4654_s29 = sadd.s32 1, %s4439_s24  }
  0x59   : > { %5450 = sst [smem:[#allocation38_spill]] %s4654_s29  ;;  %s252_s2 = ssub.s32 %s4439_s24, %s4654_s29 }
  0x5a   : > { %s255_s18 = sadd.s32 1, %s4435_s23  ;;  %p253_p5 = scmp.eq.s32.totalorder %s252_s2, 0 }
  0x5b   : > { %p262_p8 = scmp.ne.s32.totalorder %s4435_s23, %s4431_s22  ;;  %p263_p9 = scmp.eq.s32.totalorder %s4439_s24, 0 }
  0x5c   : > { %p268_p11 = scmp.ne.s32.totalorder %s4431_s22, %s4427_s21  ;;  %p3915_p13 = scmp.lt.s32.totalorder %s4439_s24, 2 }
  0x5d   : > { %s4665_s4 = scalar_select %p253_p5, %s4435_s23, %s255_s18  }
  0x5e   : > { %3887 = dma.hbm_to_vmem [thread:$0]  (!%p4587_p6), %s5449_s14, 16, %s542_s16, [#allocation24]  }
  0x5f   : > { %5451 = sst [smem:[#allocation39_spill]] %s4665_s4  ;;  %p264_p10 = por %p263_p9, %p262_p8 }
  0x60   : > { %p4669_p12 = por %p5411_p1, %p268_p11  ;;  %s4676_s30 = sand.u32 1, %s4435_s23  }
  0x61   : > { %s3669_s17 = sshll.u32 %s4676_s30, 11  ;;  %s3709_s2 = sshll.u32 %s4439_s24, 9 }
  0x62   : > { %s5452_s26 = scalar_select %p4669_p12, 1, 0 }
  0x63   : > { %s5454_s10 = sld [smem:[#allocation46_spill]]  ;;  %s567_s18 = scalar_lea.vmem [#allocation17], %s3669_s17 }
  0x64   : > { %5453 = sst [smem:[#allocation40_spill]] %s5452_s26  ;;  %s574_s6 = sshll.u32 %s567_s18, 4  ;;  %s4689_s6 = int_to_ptr.vmem [resolvable:$true] %s574_s6 }
  0x65   : > { %p4685_p0 = pnand %p3915_p13, %p264_p10  ;;  %s5456_s14 = sand.u32 1, %s4439_s24  }
  0x66   : > { %s4694_s4 = scalar_lea.sflag [#allocation18], %s5456_s14 }
  0x67   : > { %p4700_p5 = pneg %p4685_p0 }
  0x69   : > { %s4683_s21 = scalar_lea.hbm %s5454_s10, %s3709_s2  ;;  %s4114_s2 = scalar_lea.hbm %s5454_s10, 65536 }
  0x6a   : > { %s4109_s23 = scalar_lea.hbm %s4683_s21, 32768  ;;  %p4115_p11 = scmp.lt.s32.totalorder %s4683_s21, %s5454_s10 }
  0x6b   : > { %p4110_p2 = scmp.ne.s32.totalorder %s4683_s21, %s4109_s23  ;;  %p4116_p10 = scmp.lt.s32.totalorder %s4114_s2, %s4109_s23 }
  0x6c   : > { %s5457_s20 = scalar_select %p4700_p5, 1, 0 }
  0x6d   : > { %p4112_p8 = pnand %p4700_p5, %p4110_p2  ;;  %p4117_p13 = por %p4116_p10, %p4115_p11 }
  0x6f   : > { %p4113_p9 = pneg %p4112_p8 }
  0x71   : > { %p4118_p3 = pnand %p4117_p13, %p4113_p9 }
  0x73   : > { %4121 = shalt.err (!%p4118_p3)
}
  0x74   : > { %s4122_s14 = scalar_lea.vmem %s4689_s6, 32768  ;;  %s4448_s29 = smov [#allocation17]  }
  0x75   : > { %p4123_p1 = scmp.ne.s32.totalorder %s4689_s6, %s4122_s14  ;;  %s4127_s25 = sshll.u32 %s4448_s29, 4  ;;  %s4128_s25 = int_to_ptr.vmem [resolvable:$false] %s4127_s25 }
  0x76   : > { %s4129_s17 = scalar_lea.vmem %s4128_s25, 65536  ;;  %p4130_p12 = scmp.lt.s32.totalorder %s4689_s6, %s4128_s25 }
  0x77   : > { %p4125_p2 = pnand %p4123_p1, %p4700_p5  ;;  %p4131_p4 = scmp.lt.s32.totalorder %s4129_s17, %s4122_s14 }
  0x79   : > { %p4126_p8 = pneg %p4125_p2  ;;  %p4132_p6 = por %p4131_p4, %p4130_p12 }
  0x7b   : > { %p4133_p7 = pnand %p4132_p6, %p4126_p8 }
  0x7d   : > { %4136 = shalt.err (!%p4133_p7)
}
  0x7e   : > { %s4449_s23 = smov 1024   ;;  %s4450_s16 = smov 512  }
  0x7f   : > { %s4451_s2 = smov 32   ;;  %s3710_s29 = sshll.u32 %s4439_s24, 6 }
  0x80   : > { %3894 = dma.hbm_to_vmem [thread:$0]  (!%p4685_p0), %s4683_s21, 32768, %s4689_s6, %s4694_s4, %s4449_s23, %s4450_s16, %s4451_s2  }
  0x81   : > { %s4727_s14 = scalar_lea.hbm %s5402_s11, %s3710_s29  ;;  %s4732_s26 = scalar_lea.hbm %s5403_s12, %s3710_s29 }
  0x82   : > { %s5458_s22 = sshll.u32 %s4676_s30, 2  ;;  %s4452_s13 = smov [#allocation3]  }
  0x83   : > { %s607_s27 = scalar_lea.vmem [#allocation20], %s5458_s22  ;;  %s436_s6 = sshll.u32 %s4452_s13, 4  ;;  %s437_s6 = int_to_ptr.vmem [resolvable:$true] %s436_s6 }
  0x84   : > { %s615_s28 = sshll.u32 %s607_s27, 4  ;;  %s5459_s21 = sand.u32 1, %s4439_s24   ;;  %s616_s28 = int_to_ptr.vmem [resolvable:$true] %s615_s28 }
  0x85   : > { %s4738_s23 = scalar_lea.sflag [#allocation21], %s5459_s21  ;;  %s4137_s16 = scalar_lea.hbm %s4732_s26, 64 }
  0x86   : > { %p4138_p1 = scmp.ne.s32.totalorder %s4732_s26, %s4137_s16  ;;  %s4142_s29 = scalar_lea.hbm %s5403_s12, 128 }
  0x87   : > { %p4143_p6 = scmp.lt.s32.totalorder %s4732_s26, %s5403_s12  ;;  %p4144_p7 = scmp.lt.s32.totalorder %s4142_s29, %s4137_s16 }
  0x88   : > { %p4140_p3 = pnand %p4138_p1, %p4700_p5 }
  0x89   : > { %p4145_p12 = por %p4144_p7, %p4143_p6 }
  0x8a   : > { %p4141_p4 = pneg %p4140_p3 }
  0x8c   : > { %p4146_p9 = pnand %p4145_p12, %p4141_p4 }
  0x8e   : > { %4149 = shalt.err (!%p4146_p9)
}
  0x8f   : > { %s4150_s13 = scalar_lea.vmem %s616_s28, 64  ;;  %s4453_s22 = smov [#allocation20]  }
  0x90   : > { %p4151_p11 = scmp.ne.s32.totalorder %s616_s28, %s4150_s13  ;;  %s4155_s27 = sshll.u32 %s4453_s22, 4  ;;  %s4156_s27 = int_to_ptr.vmem [resolvable:$false] %s4155_s27 }
  0x91   : > { %s4157_s17 = scalar_lea.vmem %s4156_s27, 128  ;;  %p4158_p2 = scmp.lt.s32.totalorder %s616_s28, %s4156_s27 }
  0x92   : > { %p4153_p10 = pnand %p4151_p11, %p4700_p5  ;;  %p4159_p8 = scmp.lt.s32.totalorder %s4157_s17, %s4150_s13 }
  0x94   : > { %p4154_p13 = pneg %p4153_p10  ;;  %p4160_p1 = por %p4159_p8, %p4158_p2 }
  0x96   : > { %p4161_p3 = pnand %p4160_p1, %p4154_p13 }
  0x98   : > { %4164 = shalt.err (!%p4161_p3)
}
  0x99   : > { %3900 = dma.hbm_to_vmem [thread:$0]  (!%p4685_p0), %s4732_s26, 64, %s616_s28, %s4738_s23  }
  0x9a   : > { %s4176_s21 = scalar_lea.vmem %s437_s6, 64  ;;  %p5460_p6 = scmp.ne.s32.totalorder %s5444_s19, 0 }
  0x9b   : > { %p4177_p4 = scmp.ne.s32.totalorder %s437_s6, %s4176_s21  ;;  %p4184_p9 = scmp.lt.s32.totalorder %s437_s6, %s437_s6 }
  0x9c   : > { %p4185_p11 = scmp.lt.s32.totalorder %s4176_s21, %s4176_s21 }
  0x9d   : > { %p4179_p7 = pnand %p4177_p4, %p5460_p6 }
  0x9e   : > { %p4186_p10 = por %p4185_p11, %p4184_p9 }
  0x9f   : > { %p4180_p12 = pneg %p4179_p7 }
  0xa1   : > { %p4187_p5 = pnand %p4186_p10, %p4180_p12 }
  0xa3   : > { %4190 = shalt.err (!%p4187_p5)
}
  0xa4   : > { %p5461_p13 = scmp.ne.s32.totalorder %s5443_s0, 0  ;;  %s4454_s2 = smov [#allocation7]  }
  0xa5   : > { %s458_s28 = sshll.u32 %s4454_s2, 4  ;;  %s4455_s26 = smov [#allocation10]   ;;  %s459_s28 = int_to_ptr.vmem [resolvable:$true] %s458_s28 }
  0xa6   : > { %3860 = dma.hbm_to_vmem [thread:$0]  (!%p5461_p13), %s5392_s1, 64, %s437_s6, [#allocation4]  }
  0xa7   : > { %s482_s29 = sshll.u32 %s4455_s26, 4  ;;  %s4202_s18 = scalar_lea.vmem %s459_s28, 128  ;;  %s483_s29 = int_to_ptr.vmem [resolvable:$true] %s482_s29 }
  0xa8   : > { %p4203_p2 = scmp.ne.s32.totalorder %s459_s28, %s4202_s18  ;;  %p4210_p3 = scmp.lt.s32.totalorder %s459_s28, %s459_s28 }
  0xa9   : > { %p4211_p4 = scmp.lt.s32.totalorder %s4202_s18, %s4202_s18 }
  0xaa   : > { %p4205_p8 = pnand %p4203_p2, %p5460_p6 }
  0xab   : > { %p4212_p5 = por %p4211_p4, %p4210_p3 }
  0xac   : > { %p4206_p1 = pneg %p4205_p8 }
  0xae   : > { %p4213_p7 = pnand %p4212_p5, %p4206_p1 }
  0xb0   : > { %4216 = shalt.err (!%p4213_p7)
}
  0xb1   : > { %3866 = dma.hbm_to_vmem [thread:$0]  (!%p5461_p13), %s5394_s3, 128, %s459_s28, [#allocation6]  }
  0xb2   : > { %s4228_s6 = scalar_lea.vmem %s483_s29, 16  ;;  %s4235_s22 = scalar_lea.vmem %s483_s29, 32 }
  0xb3   : > { %p4229_p12 = scmp.ne.s32.totalorder %s483_s29, %s4228_s6  ;;  %p4236_p10 = scmp.lt.s32.totalorder %s483_s29, %s483_s29 }
  0xb4   : > { %p4237_p2 = scmp.lt.s32.totalorder %s4235_s22, %s4228_s6 }
  0xb5   : > { %p4231_p9 = pnand %p4229_p12, %p5460_p6 }
  0xb6   : > { %p4238_p8 = por %p4237_p2, %p4236_p10 }
  0xb7   : > { %p4232_p11 = pneg %p4231_p9 }
  0xb9   : > { %p4239_p3 = pnand %p4238_p8, %p4232_p11 }
  0xbb   : > { %4242 = shalt.err (!%p4239_p3)
}
  0xbc   : > { %3872 = dma.hbm_to_vmem [thread:$0]  (!%p5461_p13), %s5396_s5, 16, %s483_s29, [#allocation9]  }
  0xbd   : > { %s4456_s21 = smov [#allocation13]   ;;  %s4457_s10 = smov [#allocation16]  }
  0xbe   : > { %s506_s16 = sshll.u32 %s4456_s21, 4  ;;  %s530_s2 = sshll.u32 %s4457_s10, 4  ;;  %s507_s16 = int_to_ptr.vmem [resolvable:$true] %s506_s16  ;;  %s531_s2 = int_to_ptr.vmem [resolvable:$true] %s530_s2 }
  0xbf   : > { %s4254_s28 = scalar_lea.vmem %s507_s16, 16  ;;  %s4261_s26 = scalar_lea.vmem %s507_s16, 32 }
  0xc0   : > { %p4255_p1 = scmp.ne.s32.totalorder %s507_s16, %s4254_s28  ;;  %p4262_p7 = scmp.lt.s32.totalorder %s507_s16, %s507_s16 }
  0xc1   : > { %p4263_p12 = scmp.lt.s32.totalorder %s4261_s26, %s4254_s28 }
  0xc2   : > { %p4257_p4 = pnand %p4255_p1, %p5460_p6 }
  0xc3   : > { %p4264_p9 = por %p4263_p12, %p4262_p7 }
  0xc4   : > { %p4258_p5 = pneg %p4257_p4 }
  0xc6   : > { %p4265_p11 = pnand %p4264_p9, %p4258_p5 }
  0xc8   : > { %4268 = shalt.err (!%p4265_p11)
}
  0xc9   : > { %3878 = dma.hbm_to_vmem [thread:$0]  (!%p5461_p13), %s5398_s7, 16, %s507_s16, [#allocation12]  }
  0xca   : > { %s4280_s25 = scalar_lea.vmem %s531_s2, 16  ;;  %s4287_s13 = scalar_lea.vmem %s531_s2, 32 }
  0xcb   : > { %p4281_p10 = scmp.ne.s32.totalorder %s531_s2, %s4280_s25  ;;  %p4288_p3 = scmp.lt.s32.totalorder %s531_s2, %s531_s2 }
  0xcc   : > { %p4289_p1 = scmp.lt.s32.totalorder %s4287_s13, %s4280_s25 }
  0xcd   : > { %p4283_p2 = pnand %p4281_p10, %p5460_p6 }
  0xce   : > { %p4290_p4 = por %p4289_p1, %p4288_p3 }
  0xcf   : > { %p4284_p8 = pneg %p4283_p2 }
  0xd1   : > { %p4291_p7 = pnand %p4290_p4, %p4284_p8 }
  0xd3   : > { %4294 = shalt.err (!%p4291_p7)
}
  0xd4   : > { %3884 = dma.hbm_to_vmem [thread:$0]  (!%p5461_p13), %s5400_s9, 16, %s531_s2, [#allocation15]  }
  0xd5   : > { %s4458_s27 = smov [#allocation25]   ;;  %s5462_s21 = sshll.u32 %s4676_s30, 2 }
  0xd6   : > { %s552_s17 = sshll.u32 %s4458_s27, 4  ;;  %s588_s16 = scalar_lea.vmem [#allocation19], %s5462_s21  ;;  %s553_s17 = int_to_ptr.vmem [resolvable:$true] %s552_s17 }
  0xd7   : > { %s596_s10 = sshll.u32 %s588_s16, 4  ;;  %s4306_s28 = scalar_lea.vmem %s553_s17, 16  ;;  %s4794_s10 = int_to_ptr.vmem [resolvable:$true] %s596_s10 }
  0xd8   : > { %p4307_p5 = scmp.ne.s32.totalorder %s553_s17, %s4306_s28  ;;  %s4313_s26 = scalar_lea.vmem %s553_s17, 32 }
  0xd9   : > { %p4314_p11 = scmp.lt.s32.totalorder %s553_s17, %s553_s17  ;;  %p4315_p10 = scmp.lt.s32.totalorder %s4313_s26, %s4306_s28 }
  0xda   : > { %p4309_p12 = pnand %p4307_p5, %p5460_p6 }
  0xdb   : > { %p4316_p2 = por %p4315_p10, %p4314_p11 }
  0xdc   : > { %p4310_p9 = pneg %p4309_p12 }
  0xde   : > { %p4317_p8 = pnand %p4316_p2, %p4310_p9 }
  0xe0   : > { %4320 = shalt.err (!%p4317_p8)
}
  0xe1   : > { %3890 = dma.hbm_to_vmem [thread:$0]  (!%p5461_p13), %s5406_s15, 16, %s553_s17, [#allocation24]  }
  0xe2   : > { %s4321_s29 = scalar_lea.hbm %s4727_s14, 64  ;;  %p5463_p6 = scmp.ne.s32.totalorder %s5457_s20, 0 }
  0xe3   : > { %p4322_p3 = scmp.ne.s32.totalorder %s4727_s14, %s4321_s29  ;;  %s4326_s13 = scalar_lea.hbm %s5402_s11, 128 }
  0xe4   : > { %p4327_p7 = scmp.lt.s32.totalorder %s4727_s14, %s5402_s11  ;;  %p4328_p5 = scmp.lt.s32.totalorder %s4326_s13, %s4321_s29 }
  0xe5   : > { %p4324_p1 = pnand %p4322_p3, %p5463_p6 }
  0xe6   : > { %p4329_p12 = por %p4328_p5, %p4327_p7 }
  0xe7   : > { %p4325_p4 = pneg %p4324_p1 }
  0xe9   : > { %p4330_p9 = pnand %p4329_p12, %p4325_p4 }
  0xeb   : > { %4333 = shalt.err (!%p4330_p9)
}
  0xec   : > { %s4334_s0 = scalar_lea.vmem %s4794_s10, 64  ;;  %s4459_s27 = smov [#allocation19]  }
  0xed   : > { %p4335_p13 = scmp.ne.s32.totalorder %s4794_s10, %s4334_s0  ;;  %s4339_s17 = sshll.u32 %s4459_s27, 4  ;;  %s4340_s17 = int_to_ptr.vmem [resolvable:$false] %s4339_s17 }
  0xee   : > { %s4341_s21 = scalar_lea.vmem %s4340_s17, 128  ;;  %p4342_p2 = scmp.lt.s32.totalorder %s4794_s10, %s4340_s17 }
  0xef   : > { %p4337_p11 = pnand %p4335_p13, %p5463_p6  ;;  %p4343_p8 = scmp.lt.s32.totalorder %s4341_s21, %s4334_s0 }
  0xf1   : > { %p4338_p10 = pneg %p4337_p11  ;;  %p4344_p3 = por %p4343_p8, %p4342_p2 }
  0xf3   : > { %p4345_p1 = pnand %p4344_p3, %p4338_p10 }
  0xf5   : > { %4348 = shalt.err (!%p4345_p1)
}
  0xf6   : > { %3897 = dma.hbm_to_vmem [thread:$0]  (!%p4685_p0), %s4727_s14, 64, %s4794_s10, %s4694_s4  }
  0xf7   : > { %s3678_s16 = sshll.u32 %s4676_s30, 7  ;;  %s3712_s28 = sshll.u32 %s4439_s24, 11 }
  0xf8   : > { %s5464_s18 = sld [smem:[#allocation47_spill]]  ;;  %s626_s19 = scalar_lea.vmem [#allocation22], %s3678_s16 }
  0xf9   : > { %s633_s25 = sshll.u32 %s626_s19, 4  ;;  %s634_s25 = int_to_ptr.vmem [resolvable:$true] %s633_s25 }
  0xfe   : > { %s4829_s29 = scalar_lea.hbm %s5464_s18, %s3712_s28  ;;  %s4354_s24 = scalar_lea.hbm %s5464_s18, 4096 }
  0xff   : > { %s4349_s13 = scalar_lea.hbm %s4829_s29, 2048  ;;  %p4355_p12 = scmp.lt.s32.totalorder %s4829_s29, %s5464_s18 }
 0x100   : > { %p4350_p4 = scmp.ne.s32.totalorder %s4829_s29, %s4349_s13  ;;  %p4356_p9 = scmp.lt.s32.totalorder %s4354_s24, %s4349_s13 }
 0x102   : > { %p4352_p7 = pnand %p4350_p4, %p5463_p6  ;;  %p4357_p13 = por %p4356_p9, %p4355_p12 }
 0x104   : > { %p4353_p5 = pneg %p4352_p7 }
 0x106   : > { %p4358_p11 = pnand %p4357_p13, %p4353_p5 }
 0x108   : > { %4361 = shalt.err (!%p4358_p11)
}
 0x109   : > { %s4362_s10 = scalar_lea.vmem %s634_s25, 2048  ;;  %s4460_s22 = smov [#allocation22]  }
 0x10a   : > { %p4363_p10 = scmp.ne.s32.totalorder %s634_s25, %s4362_s10  ;;  %s4367_s0 = sshll.u32 %s4460_s22, 4  ;;  %s4368_s0 = int_to_ptr.vmem [resolvable:$false] %s4367_s0 }
 0x10b   : > { %s4369_s27 = scalar_lea.vmem %s4368_s0, 4096  ;;  %p4370_p3 = scmp.lt.s32.totalorder %s634_s25, %s4368_s0 }
 0x10c   : > { %p4365_p2 = pnand %p4363_p10, %p5463_p6  ;;  %p4371_p1 = scmp.lt.s32.totalorder %s4369_s27, %s4362_s10 }
 0x10e   : > { %p4366_p8 = pneg %p4365_p2  ;;  %p4372_p4 = por %p4371_p1, %p4370_p3 }
 0x110   : > { %p4373_p7 = pnand %p4372_p4, %p4366_p8 }
 0x112   : > { %4376 = shalt.err (!%p4373_p7)
}
 0x113   : > { %s5465_s17 = smov 8   ;;  %s5466_s21 = smov 128  }
 0x114   : > { %3903 = dma.hbm_to_vmem [thread:$0]  (!%p4685_p0), %s4829_s29, 2048, %s634_s25, %s4738_s23, %s5466_s21, %s5466_s21, %s5465_s17  }
 0x115   : > { %s5467_s20 = sld [smem:[#allocation37_spill]] }
 0x11b   : > { %p5468_p6 = scmp.ne.s32.totalorder %s5467_s20, 0 }
 0x11c   : > { %s5469_s16 = sld [smem:[#allocation36_spill]] (!%p5468_p6) }
 0x11d   : > { %645 = sbr.rel (%p5468_p6) target bundleno = 1439 (0x59f), region = 84 }
 0x122   : > { %p5470_p5 = scmp.eq.s32.totalorder %s5469_s16, 0 }
 0x124   : > { %4394 = dma.done.wait (%p5470_p5), [#allocation4], 64   ;;  %p5471_p12 = pmov %p5470_p5 }
 0x125   : > { %p5472_p9 = pmov %p5470_p5 }
 0x126   : > { %4396 = vsyncadd (%p5471_p12), [#allocation4], 4294967232 }
 0x127   : > { %4398 = dma.done.wait (%p5472_p9), [#allocation6], 256   ;;  %p5473_p13 = pmov %p5470_p5 }
 0x128   : > { %p5474_p11 = pmov %p5470_p5 }
 0x129   : > { %4400 = vsyncadd (%p5473_p13), [#allocation6], 4294967040 }
 0x12a   : > { %4402 = dma.done.wait (%p5474_p11), [#allocation9], 528   ;;  %p5475_p0 = pmov %p5470_p5 }
 0x12c   : > { %4404 = vsyncadd (%p5475_p0), [#allocation9], 4294966768  ;;  %p5476_p10 = pmov %p5475_p0 }
 0x12d   : > { %p5477_p2 = pmov %p5475_p0 }
 0x12e   : > { %4406 = dma.done.wait (%p5476_p10), [#allocation12], 528  }
 0x12f   : > { %4408 = vsyncadd (%p5477_p2), [#allocation12], 4294966768  ;;  %p5478_p8 = pmov %p5475_p0 }
 0x130   : > { %p5479_p3 = pmov %p5475_p0 }
 0x131   : > { %4410 = dma.done.wait (%p5478_p8), [#allocation15], 528  }
 0x132   : > { %4412 = vsyncadd (%p5479_p3), [#allocation15], 4294966768  ;;  %s5480_s8 = sld [smem:[#allocation34_spill]]  ;;  %s683_s28 = sand.u32 1, %s5469_s16  }
 0x133   : > { %s5481_s23 = sld [smem:[#allocation40_spill]]  ;;  %s684_s29 = scalar_lea.sflag [#allocation18], %s683_s28 }
 0x138   : > { %s685_s26 = sand.u32 1, %s5480_s8  }
 0x139   : > { %s3691_s2 = sshll.u32 %s685_s26, 11  ;;  %p5482_p1 = scmp.ne.s32.totalorder %s5481_s23, 0 }
 0x13a   : > { %s4875_s19 = scalar_lea.vmem [#allocation17], %s3691_s2 }
 0x13b   : > { %4414 = dma.done.wait (%p5482_p1), %s684_s29, 32832  }
 0x13c   : > { %4416 = vsyncadd (%p5482_p1), %s684_s29, 4294934464  ;;  %s3692_s25 = sshll.u32 %s685_s26, 2  ;;  %s702_s6 = scalar_lea.sflag [#allocation21], %s683_s28 }
 0x13d   : > { %s4881_s13 = scalar_lea.vmem [#allocation19], %s3692_s25  ;;  %s4883_s4 = scalar_lea.vmem [#allocation20], %s3692_s25 }
 0x13e   : > { %4418 = dma.done.wait (%p5482_p1), %s702_s6, 2112  }
 0x13f   : > { %4420 = vsyncadd (%p5482_p1), %s702_s6, 4294965184  ;;  %s3694_s24 = sshll.u32 %s685_s26, 7  ;;  %p5483_p4 = pmov %p5475_p0 }
 0x140   : > { %s4889_s30 = scalar_lea.vmem [#allocation22], %s3694_s24 }
 0x141   : > { %4422 = dma.done.wait (%p5483_p4), [#allocation24], 32   ;;  %p5484_p7 = pmov %p5475_p0 }
 0x142   : > { %p5485_p6 = scmp.ne.s32.totalorder %s5469_s16, 0 }
 0x143   : > { %4424 = vsyncadd (%p5484_p7), [#allocation24], 4294967264 }
 0x144   : > { %789 = sbr.rel (%p5485_p6) target bundleno = 331 (0x14b), region = 148 }
 0x149   : > { %v4461_v0 = vmov 0.0  }
 0x14a   : > { %790 = vst [vmem:[#allocation2] sm:$0xff] %v4461_v0 }
 0x14b PF: > { %v795_v1 = vld [vmem:[#allocation8 + $0x18] sm:$0xff]  ;;  %v4462_v2 = vmov 0.0   ;;  %v794_v3 = vld [vmem:[#allocation8 + $0x10] sm:$0xff]  ;;  %vm4463_vm0 = vmmov 0   ;;  %v793_v6 = vld [vmem:[#allocation8 + $0x8] sm:$0xff]  ;;  %vm803_vm1 = vcmask 261120  }
 0x14c   : > { %3772 = vmatprep.subr.mxu0 %v4462_v2  ;;  %3780 = vmatprep.mubr.msk.f32.mxu0 %vm4463_vm0, %v4462_v2  ;;  %v881_v4 = vld [vmem:[#allocation11 + $0x18] sm:$0xff]  ;;  %v880_v5 = vld [vmem:[#allocation11 + $0x10] sm:$0xff]  ;;  %v879_v7 = vld [vmem:[#allocation11 + $0x8] sm:$0xff]  ;;  %s5486_s22 = sld [smem:[#allocation41_spill]] }
 0x14d   : > { %3773 = vmatpush3.msra.mxu0 %v795_v1  ;;  %3783 = vmatprep.subr.mxu1 %v4462_v2  ;;  %v792_v8 = vld [vmem:[#allocation8] sm:$0xff]  ;;  %v791_v9 = vld [vmem:[#allocation3] sm:$0xf]  ;;  %v877_v13 = vld [vmem:[#allocation5] sm:$0x1f]  ;;  %s5487_s0 = sld [smem:[#allocation36_spill]] }
 0x14e   : > { %3774 = vmatprep.subr.mxu0 %v4462_v2  ;;  %3784 = vmatpush3.msra.mxu1 %v881_v4  ;;  %v878_v10 = vld [vmem:[#allocation11] sm:$0xff]  ;;  %v1159_v11 = vld [vmem:[%s4875_s19 + $0x168] sm:$0xff]  ;;  %v1160_v21 = vld [vmem:[%s4875_s19 + $0x170] sm:$0xff] }
 0x14f   : > { %3775 = vmatpush3.msra.mxu0 %v794_v3  ;;  %3785 = vmatprep.subr.mxu1 %v4462_v2  ;;  %v1158_v12 = vld [vmem:[%s4875_s19 + $0x160] sm:$0xff]  ;;  %v966_v14 = vld [vmem:[#allocation14 + $0x18] sm:$0xff]  ;;  %v1191_v15 = vunpack.c.h.s8.bf16 %v1159_v11  ;;  %v965_v16 = vld [vmem:[#allocation14 + $0x10] sm:$0xff]  ;;  %v1187_v19 = vunpack.c.l.s8.bf16 %v1159_v11  ;;  %v1192_v26 = vunpack.c.h.s8.bf16 %v1160_v21  ;;  %v1188_v32 = vunpack.c.l.s8.bf16 %v1160_v21 }
 0x150   : > { %3776 = vmatprep.subr.mxu0 %v4462_v2  ;;  %3786 = vmatpush3.msra.mxu1 %v880_v5  ;;  %v1190_v17 = vunpack.c.h.s8.bf16 %v1158_v12  ;;  %v1161_v18 = vld [vmem:[%s4875_s19 + $0x178] sm:$0xff]  ;;  %v964_v20 = vld [vmem:[#allocation14 + $0x8] sm:$0xff]  ;;  %v962_v25 = vld [vmem:[#allocation7] sm:$0x3f]  ;;  %v1186_v27 = vunpack.c.l.s8.bf16 %v1158_v12  ;;  %v4464_v3 = vmov 0  }
 0x151   : > { %3777 = vmatpush3.msra.mxu0 %v793_v6  ;;  %3787 = vmatprep.subr.mxu1 %v4462_v2  ;;  %v1155_v22 = vld [vmem:[%s4875_s19 + $0x148] sm:$0xff]  ;;  %v963_v23 = vld [vmem:[#allocation14] sm:$0xff]  ;;  %v1193_v24 = vunpack.c.h.s8.bf16 %v1161_v18  ;;  %v1189_v28 = vunpack.c.l.s8.bf16 %v1161_v18  ;;  %v1156_v35 = vld [vmem:[%s4875_s19 + $0x150] sm:$0xff] }
 0x152   : > { %3778 = vmatprep.subr.mxu0 %v4462_v2  ;;  %3788 = vmatpush3.msra.mxu1 %v879_v7  ;;  %v1183_v29 = vunpack.c.h.s8.bf16 %v1155_v22  ;;  %v1154_v30 = vld [vmem:[%s4875_s19 + $0x140] sm:$0xff]  ;;  %v1157_v31 = vld [vmem:[%s4875_s19 + $0x158] sm:$0xff]  ;;  %v1179_v36 = vunpack.c.l.s8.bf16 %v1155_v22  ;;  %v1151_v37 = vld [vmem:[%s4875_s19 + $0x128] sm:$0xff]  ;;  %v1184_v38 = vunpack.c.h.s8.bf16 %v1156_v35  ;;  %v1180_v44 = vunpack.c.l.s8.bf16 %v1156_v35 }
 0x153   : > { %3779 = vmatpush3.msra.mxu0 %v792_v8  ;;  %3789 = vmatprep.subr.mxu1 %v4462_v2  ;;  %v1182_v33 = vunpack.c.h.s8.bf16 %v1154_v30  ;;  %v1185_v34 = vunpack.c.h.s8.bf16 %v1157_v31  ;;  %v1178_v39 = vunpack.c.l.s8.bf16 %v1154_v30  ;;  %v1181_v40 = vunpack.c.l.s8.bf16 %v1157_v31  ;;  %v1150_v42 = vld [vmem:[%s4875_s19 + $0x120] sm:$0xff]  ;;  %v1153_v43 = vld [vmem:[%s4875_s19 + $0x138] sm:$0xff]  ;;  %v1152_v47 = vld [vmem:[%s4875_s19 + $0x130] sm:$0xff]  ;;  %p3704_p5 = scmp.ne.s32.totalorder %s5487_s0, 1 }
 0x154   : > { %3781 = vmatmul.mubr.msk.f32.vlgmr.msra.gmra.mxu0 %vm803_vm1, %v791_v9  ;;  %3790 = vmatpush3.msra.mxu1 %v878_v10  ;;  %v1175_v41 = vunpack.c.h.s8.bf16 %v1151_v37  ;;  %v1174_v45 = vunpack.c.h.s8.bf16 %v1150_v42  ;;  %v1177_v46 = vunpack.c.h.s8.bf16 %v1153_v43  ;;  %v1171_v48 = vunpack.c.l.s8.bf16 %v1151_v37  ;;  %v1147_v49 = vld [vmem:[%s4875_s19 + $0x108] sm:$0xff]  ;;  %v1146_v54 = vld [vmem:[%s4875_s19 + $0x100] sm:$0xff]  ;;  %v1149_v55 = vld [vmem:[%s4875_s19 + $0x118] sm:$0xff]  ;;  %s5488_s21 = sld [smem:[#allocation49_spill]] (!%p3704_p5) }
 0x155   : > { %3791 = vmatprep.mubr.msk.f32.mxu1 %vm4463_vm0, %v4462_v2  ;;  %3794 = vmatprep.subr.mxu0 %v4462_v2  ;;  %v1176_v50 = vunpack.c.h.s8.bf16 %v1152_v47  ;;  %v1170_v51 = vunpack.c.l.s8.bf16 %v1150_v42  ;;  %v1173_v52 = vunpack.c.l.s8.bf16 %v1153_v43  ;;  %v1167_v53 = vunpack.c.h.s8.bf16 %v1147_v49  ;;  %v1148_v59 = vld [vmem:[%s4875_s19 + $0x110] sm:$0xff]  ;;  %v1110_v1 = vld [vmem:[%s4875_s19 + $0xe8] sm:$0xff]  ;;  %v3698_v6 = vld [vmem:[#allocation10] ss:$0 sm:$0xff] }
 0x156   : > { %3792 = vmatmul.mubr.msk.f32.vlgmr.msra.gmra.mxu1 %vm803_vm1, %v877_v13  ;;  %3795 = vmatpush3.msra.mxu0 %v966_v14  ;;  %v1172_v56 = vunpack.c.l.s8.bf16 %v1152_v47  ;;  %v1166_v57 = vunpack.c.h.s8.bf16 %v1146_v54  ;;  %v1169_v58 = vunpack.c.h.s8.bf16 %v1149_v55  ;;  %v1168_v60 = vunpack.c.h.s8.bf16 %v1148_v59  ;;  %v1109_v9 = vld [vmem:[%s4875_s19 + $0xe0] sm:$0xff]  ;;  %v1111_v10 = vld [vmem:[%s4875_s19 + $0xf0] sm:$0xff]  ;;  %v1108_v21 = vld [vmem:[%s4875_s19 + $0xd8] sm:$0xff] }
 0x157   : > { %3796 = vmatprep.subr.mxu0 %v4462_v2  ;;  %3802 = vmatprep.mubr.msk.f32.mxu0 %vm4463_vm0, %v4462_v2  ;;  %v1163_v61 = vunpack.c.l.s8.bf16 %v1147_v49  ;;  %v1165_v62 = vunpack.c.l.s8.bf16 %v1149_v55  ;;  %v1162_v63 = vunpack.c.l.s8.bf16 %v1146_v54  ;;  %v1164_v0 = vunpack.c.l.s8.bf16 %v1148_v59 }
 0x158   : > { %3797 = vmatpush3.msra.mxu0 %v965_v16  ;;  %1198 = vmatprep.subr.bf16.mxu1 %v1191_v15  ;;  %v1142_v4 = vunpack.c.h.s8.bf16 %v1110_v1  ;;  %v1141_v14 = vunpack.c.h.s8.bf16 %v1109_v9  ;;  %v1143_v15 = vunpack.c.h.s8.bf16 %v1111_v10  ;;  %v1138_v18 = vunpack.c.l.s8.bf16 %v1110_v1 }
 0x159   : > { %3798 = vmatprep.subr.mxu0 %v4462_v2  ;;  %1199 = vmatpush1.bf16.msra.mxu1 %v1190_v17  ;;  %v1137_v22 = vunpack.c.l.s8.bf16 %v1109_v9  ;;  %v1132_v31 = vunpack.c.l.s8.bf16 %v1108_v21 }
 0x15a   : > { %3799 = vmatpush3.msra.mxu0 %v964_v20  ;;  %1200 = vmatprep.subr.bf16.mxu1 %v1187_v19  ;;  %v1106_v20 = vld [vmem:[%s4875_s19 + $0xc8] sm:$0xff] }
 0x15b   : > { %3800 = vmatprep.subr.mxu0 %v4462_v2  ;;  %v1112_v2 = vld [vmem:[%s4875_s19 + $0xf8] sm:$0xff]  ;;  %1230 = vmatprep.mubr.bf16.mxu1 %v4464_v3  ;;  %v1130_v30 = vunpack.c.l.s8.bf16 %v1106_v20 }
 0x15c   : > { %3801 = vmatpush3.msra.mxu0 %v963_v23  ;;  %v1144_v5 = vunpack.c.h.s8.bf16 %v1112_v2  ;;  %v1140_v19 = vunpack.c.l.s8.bf16 %v1112_v2  ;;  %v1139_v23 = vunpack.c.l.s8.bf16 %v1111_v10 }
 0x15d   : > { %3803 = vmatmul.mubr.msk.f32.vlgmr.msra.gmra.mxu0 %vm803_vm1, %v962_v25  ;;  %1239 = vmatprep.subr.bf16.mxu0 %v1193_v24  ;;  %v1134_v24 = vunpack.c.h.s8.bf16 %v1106_v20  ;;  %v1136_v25 = vunpack.c.h.s8.bf16 %v1108_v21 }
 0x15e   : > { %1240 = vmatpush1.bf16.msra.mxu0 %v1192_v26  ;;  %1201 = vmatpush1.bf16.msra.mxu1 %v1186_v27  ;;  %v1105_v26 = vld [vmem:[%s4875_s19 + $0xc0] sm:$0xff]  ;;  %v1107_v27 = vld [vmem:[%s4875_s19 + $0xd0] sm:$0xff] }
 0x15f   : > { %1241 = vmatprep.subr.bf16.mxu0 %v1189_v28  ;;  %1202 = vmatprep.subr.bf16.mxu1 %v1183_v29  ;;  %v1133_v28 = vunpack.c.h.s8.bf16 %v1105_v26  ;;  %v1135_v29 = vunpack.c.h.s8.bf16 %v1107_v27  ;;  %v1131_v35 = vunpack.c.l.s8.bf16 %v1107_v27 }
 0x160   : > { %1271 = vmatprep.mubr.bf16.mxu0 %v4464_v3 }
 0x162   : > { %1242 = vmatpush1.bf16.msra.mxu0 %v1188_v32  ;;  %1203 = vmatpush1.bf16.msra.mxu1 %v1182_v33  ;;  %v1102_v32 = vld [vmem:[%s4875_s19 + $0xa8] sm:$0xff]  ;;  %v1104_v33 = vld [vmem:[%s4875_s19 + $0xb8] sm:$0xff] }
 0x163   : > { %1243 = vmatprep.subr.bf16.mxu0 %v1185_v34  ;;  %1204 = vmatprep.subr.bf16.mxu1 %v1179_v36  ;;  %v1129_v34 = vunpack.c.l.s8.bf16 %v1105_v26  ;;  %v1126_v36 = vunpack.c.h.s8.bf16 %v1102_v32  ;;  %v1128_v37 = vunpack.c.h.s8.bf16 %v1104_v33  ;;  %v1122_v42 = vunpack.c.l.s8.bf16 %v1102_v32 }
 0x164   : > { %v1124_v43 = vunpack.c.l.s8.bf16 %v1104_v33 }
 0x166   : > { %1244 = vmatpush1.bf16.msra.mxu0 %v1184_v38  ;;  %1205 = vmatpush1.bf16.msra.mxu1 %v1178_v39  ;;  %v1101_v38 = vld [vmem:[%s4875_s19 + $0xa0] sm:$0xff]  ;;  %v1103_v39 = vld [vmem:[%s4875_s19 + $0xb0] sm:$0xff] }
 0x167   : > { %1245 = vmatprep.subr.bf16.mxu0 %v1181_v40  ;;  %1206 = vmatprep.subr.bf16.mxu1 %v1175_v41  ;;  %v1125_v40 = vunpack.c.h.s8.bf16 %v1101_v38  ;;  %v1127_v41 = vunpack.c.h.s8.bf16 %v1103_v39  ;;  %v1123_v47 = vunpack.c.l.s8.bf16 %v1103_v39 }
 0x16a   : > { %1246 = vmatpush1.bf16.msra.mxu0 %v1180_v44  ;;  %1207 = vmatpush1.bf16.msra.mxu1 %v1174_v45  ;;  %v1098_v44 = vld [vmem:[%s4875_s19 + $0x88] sm:$0xff]  ;;  %v1100_v45 = vld [vmem:[%s4875_s19 + $0x98] sm:$0xff] }
 0x16b   : > { %1247 = vmatprep.subr.bf16.mxu0 %v1177_v46  ;;  %1208 = vmatprep.subr.bf16.mxu1 %v1171_v48  ;;  %v1121_v46 = vunpack.c.l.s8.bf16 %v1101_v38  ;;  %v1118_v48 = vunpack.c.h.s8.bf16 %v1098_v44  ;;  %v1120_v49 = vunpack.c.h.s8.bf16 %v1100_v45  ;;  %v1114_v54 = vunpack.c.l.s8.bf16 %v1098_v44 }
 0x16c   : > { %v1116_v55 = vunpack.c.l.s8.bf16 %v1100_v45 }
 0x16e   : > { %1248 = vmatpush1.bf16.msra.mxu0 %v1176_v50  ;;  %1209 = vmatpush1.bf16.msra.mxu1 %v1170_v51  ;;  %v1097_v50 = vld [vmem:[%s4875_s19 + $0x80] sm:$0xff]  ;;  %v1099_v51 = vld [vmem:[%s4875_s19 + $0x90] sm:$0xff] }
 0x16f   : > { %1249 = vmatprep.subr.bf16.mxu0 %v1173_v52  ;;  %1210 = vmatprep.subr.bf16.mxu1 %v1167_v53  ;;  %v1117_v52 = vunpack.c.h.s8.bf16 %v1097_v50  ;;  %v1119_v53 = vunpack.c.h.s8.bf16 %v1099_v51  ;;  %v1115_v59 = vunpack.c.l.s8.bf16 %v1099_v51 }
 0x172   : > { %1250 = vmatpush1.bf16.msra.mxu0 %v1172_v56  ;;  %1211 = vmatpush1.bf16.msra.mxu1 %v1166_v57  ;;  %v1375_v56 = vld [vmem:[%s4875_s19 + $0x1e8] sm:$0xff]  ;;  %v1377_v57 = vld [vmem:[%s4875_s19 + $0x1f8] sm:$0xff] }
 0x173   : > { %1251 = vmatprep.subr.bf16.mxu0 %v1169_v58  ;;  %1212 = vmatprep.subr.bf16.mxu1 %v1163_v61  ;;  %v1113_v58 = vunpack.c.l.s8.bf16 %v1097_v50  ;;  %v1409_v61 = vunpack.c.h.s8.bf16 %v1377_v57 }
 0x176   : > { %1252 = vmatpush1.bf16.msra.mxu0 %v1168_v60  ;;  %1213 = vmatpush1.bf16.msra.mxu1 %v1162_v63  ;;  %v1407_v60 = vunpack.c.h.s8.bf16 %v1375_v56  ;;  %v1376_v63 = vld [vmem:[%s4875_s19 + $0x1f0] sm:$0xff] }
 0x177   : > { %1253 = vmatprep.subr.bf16.mxu0 %v1165_v62  ;;  %1280 = vmatprep.subr.bf16.mxu1 %v1142_v4  ;;  %v1374_v62 = vld [vmem:[%s4875_s19 + $0x1e0] sm:$0xff]  ;;  %v1408_v1 = vunpack.c.h.s8.bf16 %v1376_v63  ;;  %v1403_v4 = vunpack.c.l.s8.bf16 %v1375_v56  ;;  %v1404_v10 = vunpack.c.l.s8.bf16 %v1376_v63 }
 0x178   : > { %v1402_v9 = vunpack.c.l.s8.bf16 %v1374_v62 }
 0x17a   : > { %1254 = vmatpush1.bf16.msra.mxu0 %v1164_v0  ;;  %v1406_v0 = vunpack.c.h.s8.bf16 %v1374_v62 }
 0x17b   : > { %1321 = vmatprep.subr.bf16.mxu0 %v1144_v5  ;;  %v1405_v5 = vunpack.c.l.s8.bf16 %v1377_v57 }
 0x214   : > { %v873_v7 = vpop.f32.mrf.mxu0 }
 0x215   : > { %v874_v8 = vadd.f32 %v3698_v6, %v873_v7  ;;  %v1371_v6 = vld [vmem:[%s4875_s19 + $0x1c8] sm:$0xff]  ;;  %v1373_v7 = vld [vmem:[%s4875_s19 + $0x1d8] sm:$0xff] }
 0x216   : > { %v3782_v11 = vpop.f32.mrf.mxu0  ;;  %v4925_v12 = vpop.f32.mrf.mxu1  ;;  %v1395_v20 = vunpack.c.l.s8.bf16 %v1371_v6  ;;  %v1397_v21 = vunpack.c.l.s8.bf16 %v1373_v7 }
 0x217   : > { %v4927_v13 = vpack.c.bf16 %v874_v8, %v874_v8  ;;  %v1399_v11 = vunpack.c.h.s8.bf16 %v1371_v6 }
 0x218   : > { %v3793_v16 = vpop.f32.mrf.mxu1 }
 0x219   : > { %v4930_v17 = vshrl.u32 %v4927_v13, 16  ;;  %v1372_v16 = vld [vmem:[%s4875_s19 + $0x1d0] sm:$0xff]  ;;  %v1411_v56 = vrot.slane %v4927_v13, 1 }
 0x21b   : > { %1231 = vmatmul.mubr.bf16.vlgmr.msra.gmra.mxu1 %v4930_v17  ;;  %1272 = vmatmul.mubr.bf16.vlgmr.msra.gmra.mxu0 %v4930_v17 }
 0x21c   : > { %1281 = vmatpush1.bf16.msra.mxu1 %v1141_v14  ;;  %1322 = vmatpush1.bf16.msra.mxu0 %v1143_v15  ;;  %v1401_v14 = vunpack.c.h.s8.bf16 %v1373_v7  ;;  %v1370_v15 = vld [vmem:[%s4875_s19 + $0x1c0] sm:$0xff] }
 0x21d   : > { %1282 = vmatprep.subr.bf16.mxu1 %v1138_v18  ;;  %1323 = vmatprep.subr.bf16.mxu0 %v1140_v19  ;;  %v4952_v2 = vpop.f32.mrf.mxu0  ;;  %v1398_v18 = vunpack.c.h.s8.bf16 %v1370_v15  ;;  %v1400_v19 = vunpack.c.h.s8.bf16 %v1372_v16 }
 0x21e   : > { %1312 = vmatprep.mubr.bf16.mxu1 %v4464_v3  ;;  %1353 = vmatprep.mubr.bf16.mxu0 %v4464_v3 }
 0x21f   : > { %v3804_v8 = vpop.f32.mrf.mxu0 }
 0x220   : > { %1283 = vmatpush1.bf16.msra.mxu1 %v1137_v22  ;;  %1324 = vmatpush1.bf16.msra.mxu0 %v1139_v23  ;;  %v1367_v22 = vld [vmem:[%s4875_s19 + $0x1a8] sm:$0xff]  ;;  %v1369_v23 = vld [vmem:[%s4875_s19 + $0x1b8] sm:$0xff] }
 0x221   : > { %1284 = vmatprep.subr.bf16.mxu1 %v1134_v24  ;;  %1325 = vmatprep.subr.bf16.mxu0 %v1136_v25  ;;  %v1394_v24 = vunpack.c.l.s8.bf16 %v1370_v15  ;;  %v1396_v25 = vunpack.c.l.s8.bf16 %v1372_v16  ;;  %v1391_v26 = vunpack.c.h.s8.bf16 %v1367_v22  ;;  %v1393_v27 = vunpack.c.h.s8.bf16 %v1369_v23  ;;  %v1504_v8 = vld [vmem:[%s4875_s19 + $0x228] sm:$0xff]  ;;  %v1503_v16 = vld [vmem:[%s4875_s19 + $0x220] sm:$0xff] }
 0x222   : > { %v1387_v32 = vunpack.c.l.s8.bf16 %v1367_v22  ;;  %v1389_v33 = vunpack.c.l.s8.bf16 %v1369_v23  ;;  %v1500_v23 = vld [vmem:[%s4875_s19 + $0x208] sm:$0xff] }
 0x224   : > { %1285 = vmatpush1.bf16.msra.mxu1 %v1133_v28  ;;  %1326 = vmatpush1.bf16.msra.mxu0 %v1135_v29  ;;  %v1366_v28 = vld [vmem:[%s4875_s19 + $0x1a0] sm:$0xff]  ;;  %v1368_v29 = vld [vmem:[%s4875_s19 + $0x1b0] sm:$0xff] }
 0x225   : > { %1286 = vmatprep.subr.bf16.mxu1 %v1130_v30  ;;  %1327 = vmatprep.subr.bf16.mxu0 %v1132_v31  ;;  %v1390_v30 = vunpack.c.h.s8.bf16 %v1366_v28  ;;  %v1392_v31 = vunpack.c.h.s8.bf16 %v1368_v29 }
 0x228   : > { %1287 = vmatpush1.bf16.msra.mxu1 %v1129_v34  ;;  %1328 = vmatpush1.bf16.msra.mxu0 %v1131_v35  ;;  %v1363_v34 = vld [vmem:[%s4875_s19 + $0x188] sm:$0xff]  ;;  %v1365_v35 = vld [vmem:[%s4875_s19 + $0x198] sm:$0xff] }
 0x229   : > { %1288 = vmatprep.subr.bf16.mxu1 %v1126_v36  ;;  %1329 = vmatprep.subr.bf16.mxu0 %v1128_v37  ;;  %v1386_v36 = vunpack.c.l.s8.bf16 %v1366_v28  ;;  %v1388_v37 = vunpack.c.l.s8.bf16 %v1368_v29  ;;  %v1383_v38 = vunpack.c.h.s8.bf16 %v1363_v34  ;;  %v1385_v39 = vunpack.c.h.s8.bf16 %v1365_v35  ;;  %v1499_v29 = vld [vmem:[%s4875_s19 + $0x200] sm:$0xff] }
 0x22a   : > { %v1379_v44 = vunpack.c.l.s8.bf16 %v1363_v34  ;;  %v1381_v45 = vunpack.c.l.s8.bf16 %v1365_v35  ;;  %v1648_v35 = vld [vmem:[%s4875_s19 + $0x2e8] sm:$0xff] }
 0x22c   : > { %1289 = vmatpush1.bf16.msra.mxu1 %v1125_v40  ;;  %1330 = vmatpush1.bf16.msra.mxu0 %v1127_v41  ;;  %v1362_v40 = vld [vmem:[%s4875_s19 + $0x180] sm:$0xff]  ;;  %v1364_v41 = vld [vmem:[%s4875_s19 + $0x190] sm:$0xff] }
 0x22d   : > { %1290 = vmatprep.subr.bf16.mxu1 %v1122_v42  ;;  %1331 = vmatprep.subr.bf16.mxu0 %v1124_v43  ;;  %v1382_v42 = vunpack.c.h.s8.bf16 %v1362_v40  ;;  %v1384_v43 = vunpack.c.h.s8.bf16 %v1364_v41 }
 0x230   : > { %1291 = vmatpush1.bf16.msra.mxu1 %v1121_v46  ;;  %1332 = vmatpush1.bf16.msra.mxu0 %v1123_v47  ;;  %v1512_v46 = vld [vmem:[%s4875_s19 + $0x268] sm:$0xff]  ;;  %v1514_v47 = vld [vmem:[%s4875_s19 + $0x278] sm:$0xff] }
 0x231   : > { %1292 = vmatprep.subr.bf16.mxu1 %v1118_v48  ;;  %1333 = vmatprep.subr.bf16.mxu0 %v1120_v49  ;;  %v1378_v48 = vunpack.c.l.s8.bf16 %v1362_v40  ;;  %v1380_v49 = vunpack.c.l.s8.bf16 %v1364_v41  ;;  %v1544_v50 = vunpack.c.h.s8.bf16 %v1512_v46  ;;  %v1546_v51 = vunpack.c.h.s8.bf16 %v1514_v47  ;;  %v1647_v41 = vld [vmem:[%s4875_s19 + $0x2e0] sm:$0xff] }
 0x232   : > { %v1540_v57 = vunpack.c.l.s8.bf16 %v1512_v46  ;;  %v1676_v46 = vunpack.c.l.s8.bf16 %v1648_v35 }
 0x234   : > { %1293 = vmatpush1.bf16.msra.mxu1 %v1117_v52  ;;  %1334 = vmatpush1.bf16.msra.mxu0 %v1119_v53  ;;  %v1511_v52 = vld [vmem:[%s4875_s19 + $0x260] sm:$0xff]  ;;  %v1513_v53 = vld [vmem:[%s4875_s19 + $0x270] sm:$0xff] }
 0x235   : > { %1294 = vmatprep.subr.bf16.mxu1 %v1114_v54  ;;  %1335 = vmatprep.subr.bf16.mxu0 %v1116_v55  ;;  %v1543_v54 = vunpack.c.h.s8.bf16 %v1511_v52  ;;  %v1545_v55 = vunpack.c.h.s8.bf16 %v1513_v53  ;;  %v1541_v62 = vunpack.c.l.s8.bf16 %v1513_v53  ;;  %v1643_v53 = vld [vmem:[%s4875_s19 + $0x2c0] sm:$0xff] }
 0x238   : > { %1295 = vmatpush1.bf16.msra.mxu1 %v1113_v58  ;;  %1336 = vmatpush1.bf16.msra.mxu0 %v1115_v59  ;;  %v1542_v58 = vunpack.c.l.s8.bf16 %v1514_v47  ;;  %v1508_v59 = vld [vmem:[%s4875_s19 + $0x248] sm:$0xff] }
 0x239   : > { %1413 = vmatprep.subr.bf16.mxu1 %v1407_v60  ;;  %1454 = vmatprep.subr.bf16.mxu0 %v1409_v61  ;;  %v1510_v60 = vld [vmem:[%s4875_s19 + $0x258] sm:$0xff]  ;;  %v1539_v61 = vunpack.c.l.s8.bf16 %v1511_v52  ;;  %v1536_v63 = vunpack.c.h.s8.bf16 %v1508_v59  ;;  %v1532_v6 = vunpack.c.l.s8.bf16 %v1508_v59  ;;  %v1640_v59 = vld [vmem:[%s4875_s19 + $0x2a8] sm:$0xff] }
 0x23a   : > { %v1534_v7 = vunpack.c.l.s8.bf16 %v1510_v60 }
 0x23b   : > { %1313 = vmatmul.mubr.bf16.vlgmr.msra.gmra.mxu1 %v4927_v13  ;;  %1354 = vmatmul.mubr.bf16.vlgmr.msra.gmra.mxu0 %v4927_v13  ;;  %v1538_v13 = vunpack.c.h.s8.bf16 %v1510_v60  ;;  %v1642_v60 = vld [vmem:[%s4875_s19 + $0x2b8] sm:$0xff] }
 0x23c   : > { %1414 = vmatpush1.bf16.msra.mxu1 %v1406_v0  ;;  %1455 = vmatpush1.bf16.msra.mxu0 %v1408_v1  ;;  %v1507_v0 = vld [vmem:[%s4875_s19 + $0x240] sm:$0xff]  ;;  %v1509_v1 = vld [vmem:[%s4875_s19 + $0x250] sm:$0xff] }
 0x23d   : > { %1415 = vmatprep.subr.bf16.mxu1 %v1403_v4  ;;  %1456 = vmatprep.subr.bf16.mxu0 %v1405_v5  ;;  %v1535_v4 = vunpack.c.h.s8.bf16 %v1507_v0  ;;  %v1537_v5 = vunpack.c.h.s8.bf16 %v1509_v1 }
 0x23e   : > { %1445 = vmatprep.mubr.bf16.mxu1 %v4464_v3  ;;  %1486 = vmatprep.mubr.bf16.mxu0 %v4464_v3 }
 0x240   : > { %1416 = vmatpush1.bf16.msra.mxu1 %v1402_v9  ;;  %1457 = vmatpush1.bf16.msra.mxu0 %v1404_v10  ;;  %v1506_v9 = vld [vmem:[%s4875_s19 + $0x238] sm:$0xff]  ;;  %v1531_v10 = vunpack.c.l.s8.bf16 %v1507_v0  ;;  %v1639_v0 = vld [vmem:[%s4875_s19 + $0x2a0] sm:$0xff] }
 0x241   : > { %1417 = vmatprep.subr.bf16.mxu1 %v1399_v11  ;;  %1458 = vmatprep.subr.bf16.mxu0 %v1401_v14  ;;  %v1533_v11 = vunpack.c.l.s8.bf16 %v1509_v1  ;;  %v1528_v14 = vunpack.c.h.s8.bf16 %v1504_v8  ;;  %v1530_v15 = vunpack.c.h.s8.bf16 %v1506_v9  ;;  %v1526_v22 = vunpack.c.l.s8.bf16 %v1506_v9  ;;  %v1641_v1 = vld [vmem:[%s4875_s19 + $0x2b0] sm:$0xff]  ;;  %v1638_v9 = vld [vmem:[%s4875_s19 + $0x298] sm:$0xff] }
 0x244   : > { %1418 = vmatpush1.bf16.msra.mxu1 %v1398_v18  ;;  %1459 = vmatpush1.bf16.msra.mxu0 %v1400_v19  ;;  %v1505_v18 = vld [vmem:[%s4875_s19 + $0x230] sm:$0xff]  ;;  %v1527_v19 = vunpack.c.h.s8.bf16 %v1503_v16 }
 0x245   : > { %1419 = vmatprep.subr.bf16.mxu1 %v1395_v20  ;;  %1460 = vmatprep.subr.bf16.mxu0 %v1397_v21  ;;  %v1529_v20 = vunpack.c.h.s8.bf16 %v1505_v18  ;;  %v1524_v21 = vunpack.c.l.s8.bf16 %v1504_v8  ;;  %v1636_v8 = vld [vmem:[%s4875_s19 + $0x288] sm:$0xff] }
 0x248   : > { %1420 = vmatpush1.bf16.msra.mxu1 %v1394_v24  ;;  %1461 = vmatpush1.bf16.msra.mxu0 %v1396_v25  ;;  %v1502_v24 = vld [vmem:[%s4875_s19 + $0x218] sm:$0xff]  ;;  %v1523_v25 = vunpack.c.l.s8.bf16 %v1503_v16  ;;  %v1635_v16 = vld [vmem:[%s4875_s19 + $0x280] sm:$0xff] }
 0x249   : > { %1421 = vmatprep.subr.bf16.mxu1 %v1391_v26  ;;  %1462 = vmatprep.subr.bf16.mxu0 %v1393_v27  ;;  %v1525_v26 = vunpack.c.l.s8.bf16 %v1505_v18  ;;  %v1520_v27 = vunpack.c.h.s8.bf16 %v1500_v23  ;;  %v1522_v28 = vunpack.c.h.s8.bf16 %v1502_v24  ;;  %v1518_v34 = vunpack.c.l.s8.bf16 %v1502_v24  ;;  %v1637_v18 = vld [vmem:[%s4875_s19 + $0x290] sm:$0xff]  ;;  %v1783_v24 = vld [vmem:[%s4875_s19 + $0x368] sm:$0xff] }
 0x24c   : > { %1422 = vmatpush1.bf16.msra.mxu1 %v1390_v30  ;;  %1463 = vmatpush1.bf16.msra.mxu0 %v1392_v31  ;;  %v1501_v30 = vld [vmem:[%s4875_s19 + $0x210] sm:$0xff]  ;;  %v1519_v31 = vunpack.c.h.s8.bf16 %v1499_v29 }
 0x24d   : > { %1423 = vmatprep.subr.bf16.mxu1 %v1387_v32  ;;  %1464 = vmatprep.subr.bf16.mxu0 %v1389_v33  ;;  %v1521_v32 = vunpack.c.h.s8.bf16 %v1501_v30  ;;  %v1516_v33 = vunpack.c.l.s8.bf16 %v1500_v23  ;;  %v1654_v23 = vunpack.c.l.s8.bf16 %v1638_v9 }
 0x250   : > { %1424 = vmatpush1.bf16.msra.mxu1 %v1386_v36  ;;  %1465 = vmatpush1.bf16.msra.mxu0 %v1388_v37  ;;  %v1650_v36 = vld [vmem:[%s4875_s19 + $0x2f8] sm:$0xff]  ;;  %v1515_v37 = vunpack.c.l.s8.bf16 %v1499_v29  ;;  %v1815_v29 = vunpack.c.h.s8.bf16 %v1783_v24 }
 0x251   : > { %1425 = vmatprep.subr.bf16.mxu1 %v1383_v38  ;;  %1466 = vmatprep.subr.bf16.mxu0 %v1385_v39  ;;  %v1517_v38 = vunpack.c.l.s8.bf16 %v1501_v30  ;;  %v1680_v39 = vunpack.c.h.s8.bf16 %v1648_v35  ;;  %v1682_v40 = vunpack.c.h.s8.bf16 %v1650_v36  ;;  %v1678_v47 = vunpack.c.l.s8.bf16 %v1650_v36 }
 0x254   : > { %1426 = vmatpush1.bf16.msra.mxu1 %v1382_v42  ;;  %1467 = vmatpush1.bf16.msra.mxu0 %v1384_v43  ;;  %v1649_v42 = vld [vmem:[%s4875_s19 + $0x2f0] sm:$0xff]  ;;  %v1679_v43 = vunpack.c.h.s8.bf16 %v1647_v41 }
 0x255   : > { %1427 = vmatprep.subr.bf16.mxu1 %v1379_v44  ;;  %1468 = vmatprep.subr.bf16.mxu0 %v1381_v45  ;;  %v1681_v44 = vunpack.c.h.s8.bf16 %v1649_v42  ;;  %v1547_v45 = vrot.slane %v4930_v17, 1 }
 0x258   : > { %1428 = vmatpush1.bf16.msra.mxu1 %v1378_v48  ;;  %1469 = vmatpush1.bf16.msra.mxu0 %v1380_v49  ;;  %v1644_v48 = vld [vmem:[%s4875_s19 + $0x2c8] sm:$0xff]  ;;  %v1646_v49 = vld [vmem:[%s4875_s19 + $0x2d8] sm:$0xff] }
 0x259   : > { %1549 = vmatprep.subr.bf16.mxu1 %v1544_v50  ;;  %1590 = vmatprep.subr.bf16.mxu0 %v1546_v51  ;;  %v1675_v50 = vunpack.c.l.s8.bf16 %v1647_v41  ;;  %v1677_v51 = vunpack.c.l.s8.bf16 %v1649_v42  ;;  %v1672_v52 = vunpack.c.h.s8.bf16 %v1644_v48  ;;  %v1674_v17 = vunpack.c.h.s8.bf16 %v1646_v49 }
 0x25b   : > { %1446 = vmatmul.mubr.bf16.vlgmr.msra.gmra.mxu1 %v1411_v56  ;;  %1487 = vmatmul.mubr.bf16.vlgmr.msra.gmra.mxu0 %v1411_v56 }
 0x25c   : > { %1550 = vmatpush1.bf16.msra.mxu1 %v1543_v54  ;;  %1591 = vmatpush1.bf16.msra.mxu0 %v1545_v55  ;;  %v1645_v54 = vld [vmem:[%s4875_s19 + $0x2d0] sm:$0xff]  ;;  %v1671_v55 = vunpack.c.h.s8.bf16 %v1643_v53 }
 0x25d   : > { %1551 = vmatprep.subr.bf16.mxu1 %v1540_v57  ;;  %1592 = vmatprep.subr.bf16.mxu0 %v1542_v58  ;;  %v1673_v56 = vunpack.c.h.s8.bf16 %v1645_v54  ;;  %v1668_v57 = vunpack.c.l.s8.bf16 %v1644_v48  ;;  %v1670_v58 = vunpack.c.l.s8.bf16 %v1646_v49  ;;  %v1775_v49 = vld [vmem:[%s4875_s19 + $0x328] sm:$0xff] }
 0x25e   : > { %1581 = vmatprep.mubr.bf16.mxu1 %v4464_v3  ;;  %1622 = vmatprep.mubr.bf16.mxu0 %v4464_v3 }
 0x260   : > { %1552 = vmatpush1.bf16.msra.mxu1 %v1539_v61  ;;  %1593 = vmatpush1.bf16.msra.mxu0 %v1541_v62  ;;  %v1667_v61 = vunpack.c.l.s8.bf16 %v1643_v53  ;;  %v1669_v62 = vunpack.c.l.s8.bf16 %v1645_v54  ;;  %v1774_v54 = vld [vmem:[%s4875_s19 + $0x320] sm:$0xff] }
 0x261   : > { %1553 = vmatprep.subr.bf16.mxu1 %v1536_v63  ;;  %1594 = vmatprep.subr.bf16.mxu0 %v1538_v13  ;;  %v1664_v63 = vunpack.c.h.s8.bf16 %v1640_v59  ;;  %v1666_v13 = vunpack.c.h.s8.bf16 %v1642_v60 }
 0x264   : > { %1554 = vmatpush1.bf16.msra.mxu1 %v1535_v4  ;;  %1595 = vmatpush1.bf16.msra.mxu0 %v1537_v5  ;;  %v1663_v4 = vunpack.c.h.s8.bf16 %v1639_v0  ;;  %v1665_v5 = vunpack.c.h.s8.bf16 %v1641_v1 }
 0x265   : > { %1555 = vmatprep.subr.bf16.mxu1 %v1532_v6  ;;  %1596 = vmatprep.subr.bf16.mxu0 %v1534_v7  ;;  %v1660_v6 = vunpack.c.l.s8.bf16 %v1640_v59  ;;  %v1662_v7 = vunpack.c.l.s8.bf16 %v1642_v60  ;;  %v1771_v60 = vld [vmem:[%s4875_s19 + $0x308] sm:$0xff] }
 0x268   : > { %1556 = vmatpush1.bf16.msra.mxu1 %v1531_v10  ;;  %1597 = vmatpush1.bf16.msra.mxu0 %v1533_v11  ;;  %v1659_v10 = vunpack.c.l.s8.bf16 %v1639_v0  ;;  %v1661_v11 = vunpack.c.l.s8.bf16 %v1641_v1  ;;  %v1770_v1 = vld [vmem:[%s4875_s19 + $0x300] sm:$0xff] }
 0x269   : > { %1557 = vmatprep.subr.bf16.mxu1 %v1528_v14  ;;  %1598 = vmatprep.subr.bf16.mxu0 %v1530_v15  ;;  %v1656_v14 = vunpack.c.h.s8.bf16 %v1636_v8  ;;  %v1658_v15 = vunpack.c.h.s8.bf16 %v1638_v9  ;;  %v1921_v9 = vld [vmem:[%s4875_s19 + $0x3e8] sm:$0xff] }
 0x26c   : > { %1558 = vmatpush1.bf16.msra.mxu1 %v1527_v19  ;;  %1599 = vmatpush1.bf16.msra.mxu0 %v1529_v20  ;;  %v1655_v19 = vunpack.c.h.s8.bf16 %v1635_v16  ;;  %v1657_v20 = vunpack.c.h.s8.bf16 %v1637_v18 }
 0x26d   : > { %1559 = vmatprep.subr.bf16.mxu1 %v1524_v21  ;;  %1600 = vmatprep.subr.bf16.mxu0 %v1526_v22  ;;  %v3700_v21 = vld [vmem:[#allocation13] ss:$0 sm:$0xff]  ;;  %v1652_v22 = vunpack.c.l.s8.bf16 %v1636_v8 }
 0x270   : > { %1560 = vmatpush1.bf16.msra.mxu1 %v1523_v25  ;;  %1601 = vmatpush1.bf16.msra.mxu0 %v1525_v26  ;;  %v1785_v25 = vld [vmem:[%s4875_s19 + $0x378] sm:$0xff]  ;;  %v959_v26 = vadd.f32 %v3700_v21, %v4925_v12  ;;  %v1811_v12 = vunpack.c.l.s8.bf16 %v1783_v24 }
 0x271   : > { %1561 = vmatprep.subr.bf16.mxu1 %v1520_v27  ;;  %1602 = vmatprep.subr.bf16.mxu0 %v1522_v28  ;;  %v1651_v27 = vunpack.c.l.s8.bf16 %v1635_v16  ;;  %v1653_v28 = vunpack.c.l.s8.bf16 %v1637_v18  ;;  %v1817_v30 = vunpack.c.h.s8.bf16 %v1785_v25  ;;  %v1813_v36 = vunpack.c.l.s8.bf16 %v1785_v25  ;;  %v1920_v18 = vld [vmem:[%s4875_s19 + $0x3e0] sm:$0xff]  ;;  %v1917_v25 = vld [vmem:[%s4875_s19 + $0x3c8] sm:$0xff] }
 0x274   : > { %1562 = vmatpush1.bf16.msra.mxu1 %v1519_v31  ;;  %1603 = vmatpush1.bf16.msra.mxu0 %v1521_v32  ;;  %v1782_v31 = vld [vmem:[%s4875_s19 + $0x360] sm:$0xff]  ;;  %v1784_v32 = vld [vmem:[%s4875_s19 + $0x370] sm:$0xff] }
 0x275   : > { %1563 = vmatprep.subr.bf16.mxu1 %v1516_v33  ;;  %1604 = vmatprep.subr.bf16.mxu0 %v1518_v34  ;;  %v5013_v33 = vpack.c.bf16 %v959_v26, %v959_v26  ;;  %v1814_v34 = vunpack.c.h.s8.bf16 %v1782_v31  ;;  %v1816_v35 = vunpack.c.h.s8.bf16 %v1784_v32  ;;  %v1919_v26 = vld [vmem:[%s4875_s19 + $0x3d8] sm:$0xff] }
 0x278   : > { %1564 = vmatpush1.bf16.msra.mxu1 %v1515_v37  ;;  %1605 = vmatpush1.bf16.msra.mxu0 %v1517_v38  ;;  %v1779_v37 = vld [vmem:[%s4875_s19 + $0x348] sm:$0xff]  ;;  %v1781_v38 = vld [vmem:[%s4875_s19 + $0x358] sm:$0xff] }
 0x279   : > { %1684 = vmatprep.subr.bf16.mxu1 %v1680_v39  ;;  %1725 = vmatprep.subr.bf16.mxu0 %v1682_v40  ;;  %v1810_v39 = vunpack.c.l.s8.bf16 %v1782_v31  ;;  %v1812_v40 = vunpack.c.l.s8.bf16 %v1784_v32  ;;  %v1807_v41 = vunpack.c.h.s8.bf16 %v1779_v37  ;;  %v1809_v42 = vunpack.c.h.s8.bf16 %v1781_v38  ;;  %v1916_v31 = vld [vmem:[%s4875_s19 + $0x3c0] sm:$0xff]  ;;  %v1918_v32 = vld [vmem:[%s4875_s19 + $0x3d0] sm:$0xff] }
 0x27a   : > { %v1805_v48 = vunpack.c.l.s8.bf16 %v1781_v38  ;;  %v1915_v38 = vld [vmem:[%s4875_s19 + $0x3b8] sm:$0xff] }
 0x27b   : > { %1582 = vmatmul.mubr.bf16.vlgmr.msra.gmra.mxu1 %v1547_v45  ;;  %1623 = vmatmul.mubr.bf16.vlgmr.msra.gmra.mxu0 %v1547_v45 }
 0x27c   : > { %1685 = vmatpush1.bf16.msra.mxu1 %v1679_v43  ;;  %1726 = vmatpush1.bf16.msra.mxu0 %v1681_v44  ;;  %v1778_v43 = vld [vmem:[%s4875_s19 + $0x340] sm:$0xff]  ;;  %v1780_v44 = vld [vmem:[%s4875_s19 + $0x350] sm:$0xff] }
 0x27d   : > { %1686 = vmatprep.subr.bf16.mxu1 %v1676_v46  ;;  %1727 = vmatprep.subr.bf16.mxu0 %v1678_v47  ;;  %v1806_v45 = vunpack.c.h.s8.bf16 %v1778_v43  ;;  %v1808_v46 = vunpack.c.h.s8.bf16 %v1780_v44  ;;  %v1803_v47 = vunpack.c.l.s8.bf16 %v1779_v37  ;;  %v1913_v37 = vld [vmem:[%s4875_s19 + $0x3a8] sm:$0xff] }
 0x27e   : > { %1716 = vmatprep.mubr.bf16.mxu1 %v4464_v3  ;;  %1757 = vmatprep.mubr.bf16.mxu0 %v4464_v3 }
 0x280   : > { %1687 = vmatpush1.bf16.msra.mxu1 %v1675_v50  ;;  %1728 = vmatpush1.bf16.msra.mxu0 %v1677_v51  ;;  %v1777_v50 = vld [vmem:[%s4875_s19 + $0x338] sm:$0xff]  ;;  %v1802_v51 = vunpack.c.l.s8.bf16 %v1778_v43  ;;  %v1912_v43 = vld [vmem:[%s4875_s19 + $0x3a0] sm:$0xff] }
 0x281   : > { %1688 = vmatprep.subr.bf16.mxu1 %v1672_v52  ;;  %1729 = vmatprep.subr.bf16.mxu0 %v1674_v17  ;;  %v1804_v52 = vunpack.c.l.s8.bf16 %v1780_v44  ;;  %v1799_v17 = vunpack.c.h.s8.bf16 %v1775_v49  ;;  %v1801_v53 = vunpack.c.h.s8.bf16 %v1777_v50  ;;  %v1797_v59 = vunpack.c.l.s8.bf16 %v1777_v50  ;;  %v1914_v44 = vld [vmem:[%s4875_s19 + $0x3b0] sm:$0xff]  ;;  %v1911_v50 = vld [vmem:[%s4875_s19 + $0x398] sm:$0xff] }
 0x284   : > { %1689 = vmatpush1.bf16.msra.mxu1 %v1671_v55  ;;  %1730 = vmatpush1.bf16.msra.mxu0 %v1673_v56  ;;  %v1776_v55 = vld [vmem:[%s4875_s19 + $0x330] sm:$0xff]  ;;  %v1798_v56 = vunpack.c.h.s8.bf16 %v1774_v54 }
 0x285   : > { %1690 = vmatprep.subr.bf16.mxu1 %v1668_v57  ;;  %1731 = vmatprep.subr.bf16.mxu0 %v1670_v58  ;;  %v1800_v57 = vunpack.c.h.s8.bf16 %v1776_v55  ;;  %v1795_v58 = vunpack.c.l.s8.bf16 %v1775_v49  ;;  %v1909_v49 = vld [vmem:[%s4875_s19 + $0x388] sm:$0xff] }
 0x288   : > { %1691 = vmatpush1.bf16.msra.mxu1 %v1667_v61  ;;  %1732 = vmatpush1.bf16.msra.mxu0 %v1669_v62  ;;  %v1773_v61 = vld [vmem:[%s4875_s19 + $0x318] sm:$0xff]  ;;  %v1794_v62 = vunpack.c.l.s8.bf16 %v1774_v54  ;;  %v1908_v54 = vld [vmem:[%s4875_s19 + $0x380] sm:$0xff] }
 0x289   : > { %1692 = vmatprep.subr.bf16.mxu1 %v1664_v63  ;;  %1733 = vmatprep.subr.bf16.mxu0 %v1666_v13  ;;  %v1796_v63 = vunpack.c.l.s8.bf16 %v1776_v55  ;;  %v1791_v13 = vunpack.c.h.s8.bf16 %v1771_v60  ;;  %v1793_v0 = vunpack.c.h.s8.bf16 %v1773_v61  ;;  %v1789_v8 = vunpack.c.l.s8.bf16 %v1773_v61  ;;  %v1910_v55 = vld [vmem:[%s4875_s19 + $0x390] sm:$0xff]  ;;  %v2060_v61 = vld [vmem:[%s4875_s19 + $0x478] sm:$0xff] }
 0x28c   : > { %1693 = vmatpush1.bf16.msra.mxu1 %v1663_v4  ;;  %1734 = vmatpush1.bf16.msra.mxu0 %v1665_v5  ;;  %v1772_v4 = vld [vmem:[%s4875_s19 + $0x310] sm:$0xff]  ;;  %v1790_v5 = vunpack.c.h.s8.bf16 %v1770_v1 }
 0x28d   : > { %1694 = vmatprep.subr.bf16.mxu1 %v1660_v6  ;;  %1735 = vmatprep.subr.bf16.mxu0 %v1662_v7  ;;  %v1792_v6 = vunpack.c.h.s8.bf16 %v1772_v4  ;;  %v1787_v7 = vunpack.c.l.s8.bf16 %v1771_v60  ;;  %v2058_v60 = vld [vmem:[%s4875_s19 + $0x468] sm:$0xff] }
 0x290   : > { %1695 = vmatpush1.bf16.msra.mxu1 %v1659_v10  ;;  %1736 = vmatpush1.bf16.msra.mxu0 %v1661_v11  ;;  %v1923_v10 = vld [vmem:[%s4875_s19 + $0x3f8] sm:$0xff]  ;;  %v1786_v11 = vunpack.c.l.s8.bf16 %v1770_v1  ;;  %v2057_v1 = vld [vmem:[%s4875_s19 + $0x460] sm:$0xff] }
 0x291   : > { %1696 = vmatprep.subr.bf16.mxu1 %v1656_v14  ;;  %1737 = vmatprep.subr.bf16.mxu0 %v1658_v15  ;;  %v1788_v14 = vunpack.c.l.s8.bf16 %v1772_v4  ;;  %v1953_v15 = vunpack.c.h.s8.bf16 %v1921_v9  ;;  %v1955_v16 = vunpack.c.h.s8.bf16 %v1923_v10  ;;  %v1951_v24 = vunpack.c.l.s8.bf16 %v1923_v10  ;;  %v2059_v4 = vld [vmem:[%s4875_s19 + $0x470] sm:$0xff]  ;;  %v2054_v10 = vld [vmem:[%s4875_s19 + $0x448] sm:$0xff] }
 0x294   : > { %1697 = vmatpush1.bf16.msra.mxu1 %v1655_v19  ;;  %1738 = vmatpush1.bf16.msra.mxu0 %v1657_v20  ;;  %v1922_v19 = vld [vmem:[%s4875_s19 + $0x3f0] sm:$0xff]  ;;  %v1952_v20 = vunpack.c.h.s8.bf16 %v1920_v18 }
 0x295   : > { %1698 = vmatprep.subr.bf16.mxu1 %v1652_v22  ;;  %1739 = vmatprep.subr.bf16.mxu0 %v1654_v23  ;;  %v1954_v21 = vunpack.c.h.s8.bf16 %v1922_v19  ;;  %v5036_v22 = vshrl.u32 %v5013_v33, 16  ;;  %v1949_v23 = vunpack.c.l.s8.bf16 %v1921_v9  ;;  %v2088_v9 = vunpack.c.l.s8.bf16 %v2060_v61 }
 0x298   : > { %1699 = vmatpush1.bf16.msra.mxu1 %v1651_v27  ;;  %1740 = vmatpush1.bf16.msra.mxu0 %v1653_v28  ;;  %v1948_v27 = vunpack.c.l.s8.bf16 %v1920_v18  ;;  %v1950_v28 = vunpack.c.l.s8.bf16 %v1922_v19  ;;  %v2087_v18 = vunpack.c.l.s8.bf16 %v2059_v4 }
 0x299   : > { %1822 = vmatprep.subr.bf16.mxu1 %v1815_v29  ;;  %1863 = vmatprep.subr.bf16.mxu0 %v1817_v30  ;;  %v1945_v29 = vunpack.c.h.s8.bf16 %v1917_v25  ;;  %v1947_v30 = vunpack.c.h.s8.bf16 %v1919_v26 }
 0x29b   : > { %1717 = vmatmul.mubr.bf16.vlgmr.msra.gmra.mxu1 %v5013_v33  ;;  %1758 = vmatmul.mubr.bf16.vlgmr.msra.gmra.mxu0 %v5013_v33 }
 0x29c   : > { %1823 = vmatpush1.bf16.msra.mxu1 %v1814_v34  ;;  %1864 = vmatpush1.bf16.msra.mxu0 %v1816_v35  ;;  %v1944_v34 = vunpack.c.h.s8.bf16 %v1916_v31  ;;  %v1946_v35 = vunpack.c.h.s8.bf16 %v1918_v32 }
 0x29d   : > { %1824 = vmatprep.subr.bf16.mxu1 %v1811_v12  ;;  %1865 = vmatprep.subr.bf16.mxu0 %v1813_v36  ;;  %v1941_v12 = vunpack.c.l.s8.bf16 %v1917_v25  ;;  %v1943_v36 = vunpack.c.l.s8.bf16 %v1919_v26  ;;  %v2055_v25 = vld [vmem:[%s4875_s19 + $0x450] sm:$0xff] }
 0x29e   : > { %1854 = vmatprep.mubr.bf16.mxu1 %v4464_v3  ;;  %1895 = vmatprep.mubr.bf16.mxu0 %v4464_v3 }
 0x2a0   : > { %1825 = vmatpush1.bf16.msra.mxu1 %v1810_v39  ;;  %1866 = vmatpush1.bf16.msra.mxu0 %v1812_v40  ;;  %v1940_v39 = vunpack.c.l.s8.bf16 %v1916_v31  ;;  %v1942_v40 = vunpack.c.l.s8.bf16 %v1918_v32  ;;  %v2078_v32 = vunpack.c.l.s8.bf16 %v2054_v10 }
 0x2a1   : > { %1826 = vmatprep.subr.bf16.mxu1 %v1807_v41  ;;  %1867 = vmatprep.subr.bf16.mxu0 %v1809_v42  ;;  %v1937_v41 = vunpack.c.h.s8.bf16 %v1913_v37  ;;  %v1939_v42 = vunpack.c.h.s8.bf16 %v1915_v38 }
 0x2a4   : > { %1827 = vmatpush1.bf16.msra.mxu1 %v1806_v45  ;;  %1868 = vmatpush1.bf16.msra.mxu0 %v1808_v46  ;;  %v1936_v45 = vunpack.c.h.s8.bf16 %v1912_v43  ;;  %v1938_v46 = vunpack.c.h.s8.bf16 %v1914_v44 }
 0x2a5   : > { %1828 = vmatprep.subr.bf16.mxu1 %v1803_v47  ;;  %1869 = vmatprep.subr.bf16.mxu0 %v1805_v48  ;;  %v1933_v47 = vunpack.c.l.s8.bf16 %v1913_v37  ;;  %v1935_v48 = vunpack.c.l.s8.bf16 %v1915_v38  ;;  %v2079_v37 = vunpack.c.l.s8.bf16 %v2055_v25 }
 0x2a8   : > { %1829 = vmatpush1.bf16.msra.mxu1 %v1802_v51  ;;  %1870 = vmatpush1.bf16.msra.mxu0 %v1804_v52  ;;  %v1932_v51 = vunpack.c.l.s8.bf16 %v1912_v43  ;;  %v1934_v52 = vunpack.c.l.s8.bf16 %v1914_v44 }
 0x2a9   : > { %1830 = vmatprep.subr.bf16.mxu1 %v1799_v17  ;;  %1871 = vmatprep.subr.bf16.mxu0 %v1801_v53  ;;  %v1929_v17 = vunpack.c.h.s8.bf16 %v1909_v49  ;;  %v1931_v53 = vunpack.c.h.s8.bf16 %v1911_v50 }
 0x2ac   : > { %1831 = vmatpush1.bf16.msra.mxu1 %v1798_v56  ;;  %1872 = vmatpush1.bf16.msra.mxu0 %v1800_v57  ;;  %v1928_v56 = vunpack.c.h.s8.bf16 %v1908_v54  ;;  %v1930_v57 = vunpack.c.h.s8.bf16 %v1910_v55 }
 0x2ad   : > { %1832 = vmatprep.subr.bf16.mxu1 %v1795_v58  ;;  %1873 = vmatprep.subr.bf16.mxu0 %v1797_v59  ;;  %v1925_v58 = vunpack.c.l.s8.bf16 %v1909_v49  ;;  %v1927_v59 = vunpack.c.l.s8.bf16 %v1911_v50 }
 0x2b0   : > { %1833 = vmatpush1.bf16.msra.mxu1 %v1794_v62  ;;  %1874 = vmatpush1.bf16.msra.mxu0 %v1796_v63  ;;  %v1924_v62 = vunpack.c.l.s8.bf16 %v1908_v54  ;;  %v1926_v63 = vunpack.c.l.s8.bf16 %v1910_v55 }
 0x2b1   : > { %1834 = vmatprep.subr.bf16.mxu1 %v1791_v13  ;;  %1875 = vmatprep.subr.bf16.mxu0 %v1793_v0  ;;  %v2090_v13 = vunpack.c.h.s8.bf16 %v2058_v60  ;;  %v2092_v0 = vunpack.c.h.s8.bf16 %v2060_v61 }
 0x2b4   : > { %1835 = vmatpush1.bf16.msra.mxu1 %v1790_v5  ;;  %1876 = vmatpush1.bf16.msra.mxu0 %v1792_v6  ;;  %v2089_v5 = vunpack.c.h.s8.bf16 %v2057_v1  ;;  %v2091_v6 = vunpack.c.h.s8.bf16 %v2059_v4  ;;  %v2093_v4 = vrot.slane %v5036_v22, 1 }
 0x2b5   : > { %1836 = vmatprep.subr.bf16.mxu1 %v1787_v7  ;;  %1877 = vmatprep.subr.bf16.mxu0 %v1789_v8  ;;  %v1957_v7 = vrot.slane %v5013_v33, 1  ;;  %v2086_v8 = vunpack.c.l.s8.bf16 %v2058_v60 }
 0x2b8   : > { %1837 = vmatpush1.bf16.msra.mxu1 %v1786_v11  ;;  %1878 = vmatpush1.bf16.msra.mxu0 %v1788_v14  ;;  %v2056_v11 = vld [vmem:[%s4875_s19 + $0x458] sm:$0xff] }
 0x2b9   : > { %1959 = vmatprep.subr.bf16.mxu1 %v1953_v15  ;;  %2000 = vmatprep.subr.bf16.mxu0 %v1955_v16  ;;  %v2085_v16 = vunpack.c.l.s8.bf16 %v2057_v1 }
 0x2bb   : > { %1855 = vmatmul.mubr.bf16.vlgmr.msra.gmra.mxu1 %v5036_v22  ;;  %1896 = vmatmul.mubr.bf16.vlgmr.msra.gmra.mxu0 %v5036_v22 }
 0x2bc   : > { %1960 = vmatpush1.bf16.msra.mxu1 %v1952_v20  ;;  %2001 = vmatpush1.bf16.msra.mxu0 %v1954_v21  ;;  %v2082_v21 = vunpack.c.h.s8.bf16 %v2054_v10 }
 0x2bd   : > { %1961 = vmatprep.subr.bf16.mxu1 %v1949_v23  ;;  %2002 = vmatprep.subr.bf16.mxu0 %v1951_v24  ;;  %v2084_v23 = vunpack.c.h.s8.bf16 %v2056_v11  ;;  %v2053_v24 = vld [vmem:[%s4875_s19 + $0x440] sm:$0xff] }
 0x2be   : > { %1991 = vmatprep.mubr.bf16.mxu1 %v4464_v3  ;;  %2032 = vmatprep.mubr.bf16.mxu0 %v4464_v3 }
 0x2c0   : > { %1962 = vmatpush1.bf16.msra.mxu1 %v1948_v27  ;;  %2003 = vmatpush1.bf16.msra.mxu0 %v1950_v28  ;;  %v2081_v28 = vunpack.c.h.s8.bf16 %v2053_v24 }
 0x2c1   : > { %1963 = vmatprep.subr.bf16.mxu1 %v1945_v29  ;;  %2004 = vmatprep.subr.bf16.mxu0 %v1947_v30  ;;  %v2083_v29 = vunpack.c.h.s8.bf16 %v2055_v25 }
 0x2c4   : > { %1964 = vmatpush1.bf16.msra.mxu1 %v1944_v34  ;;  %2005 = vmatpush1.bf16.msra.mxu0 %v1946_v35  ;;  %v2080_v34 = vunpack.c.l.s8.bf16 %v2056_v11  ;;  %v2050_v35 = vld [vmem:[%s4875_s19 + $0x428] sm:$0xff] }
 0x2c5   : > { %1965 = vmatprep.subr.bf16.mxu1 %v1941_v12  ;;  %2006 = vmatprep.subr.bf16.mxu0 %v1943_v36  ;;  %v2052_v12 = vld [vmem:[%s4875_s19 + $0x438] sm:$0xff]  ;;  %v2077_v36 = vunpack.c.l.s8.bf16 %v2053_v24  ;;  %v2074_v38 = vunpack.c.h.s8.bf16 %v2050_v35  ;;  %v2070_v44 = vunpack.c.l.s8.bf16 %v2050_v35  ;;  %v2186_v35 = vld [vmem:[%s4875_s19 + $0x4a8] sm:$0xff] }
 0x2c8   : > { %1966 = vmatpush1.bf16.msra.mxu1 %v1940_v39  ;;  %2007 = vmatpush1.bf16.msra.mxu0 %v1942_v40  ;;  %v2076_v39 = vunpack.c.h.s8.bf16 %v2052_v12  ;;  %v2049_v40 = vld [vmem:[%s4875_s19 + $0x420] sm:$0xff] }
 0x2c9   : > { %1967 = vmatprep.subr.bf16.mxu1 %v1937_v41  ;;  %2008 = vmatprep.subr.bf16.mxu0 %v1939_v42  ;;  %v2051_v41 = vld [vmem:[%s4875_s19 + $0x430] sm:$0xff]  ;;  %v2073_v42 = vunpack.c.h.s8.bf16 %v2049_v40 }
 0x2ca   : > { %v2075_v43 = vunpack.c.h.s8.bf16 %v2051_v41  ;;  %v2071_v49 = vunpack.c.l.s8.bf16 %v2051_v41  ;;  %v2187_v41 = vld [vmem:[%s4875_s19 + $0x4b0] sm:$0xff] }
 0x2cc   : > { %1968 = vmatpush1.bf16.msra.mxu1 %v1936_v45  ;;  %2009 = vmatpush1.bf16.msra.mxu0 %v1938_v46  ;;  %v2072_v45 = vunpack.c.l.s8.bf16 %v2052_v12  ;;  %v2046_v46 = vld [vmem:[%s4875_s19 + $0x408] sm:$0xff]  ;;  %v2188_v12 = vld [vmem:[%s4875_s19 + $0x4b8] sm:$0xff] }
 0x2cd   : > { %1969 = vmatprep.subr.bf16.mxu1 %v1933_v47  ;;  %2010 = vmatprep.subr.bf16.mxu0 %v1935_v48  ;;  %v2048_v47 = vld [vmem:[%s4875_s19 + $0x418] sm:$0xff]  ;;  %v2069_v48 = vunpack.c.l.s8.bf16 %v2049_v40  ;;  %v2066_v50 = vunpack.c.h.s8.bf16 %v2046_v46  ;;  %v2062_v55 = vunpack.c.l.s8.bf16 %v2046_v46  ;;  %v2185_v40 = vld [vmem:[%s4875_s19 + $0x4a0] sm:$0xff]  ;;  %v2182_v46 = vld [vmem:[%s4875_s19 + $0x488] sm:$0xff] }
 0x2d0   : > { %1970 = vmatpush1.bf16.msra.mxu1 %v1932_v51  ;;  %2011 = vmatpush1.bf16.msra.mxu0 %v1934_v52  ;;  %v2068_v51 = vunpack.c.h.s8.bf16 %v2048_v47  ;;  %v2045_v52 = vld [vmem:[%s4875_s19 + $0x400] sm:$0xff] }
 0x2d1   : > { %1971 = vmatprep.subr.bf16.mxu1 %v1929_v17  ;;  %2012 = vmatprep.subr.bf16.mxu0 %v1931_v53  ;;  %v2047_v17 = vld [vmem:[%s4875_s19 + $0x410] sm:$0xff]  ;;  %v2065_v53 = vunpack.c.h.s8.bf16 %v2045_v52 }
 0x2d2   : > { %v2067_v54 = vunpack.c.h.s8.bf16 %v2047_v17  ;;  %v2063_v60 = vunpack.c.l.s8.bf16 %v2047_v17  ;;  %v2183_v17 = vld [vmem:[%s4875_s19 + $0x490] sm:$0xff] }
 0x2d4   : > { %1972 = vmatpush1.bf16.msra.mxu1 %v1928_v56  ;;  %2013 = vmatpush1.bf16.msra.mxu0 %v1930_v57  ;;  %v2064_v56 = vunpack.c.l.s8.bf16 %v2048_v47  ;;  %v2194_v57 = vld [vmem:[%s4875_s19 + $0x4e8] sm:$0xff]  ;;  %v2184_v47 = vld [vmem:[%s4875_s19 + $0x498] sm:$0xff] }
 0x2d5   : > { %1973 = vmatprep.subr.bf16.mxu1 %v1925_v58  ;;  %2014 = vmatprep.subr.bf16.mxu0 %v1927_v59  ;;  %v2196_v58 = vld [vmem:[%s4875_s19 + $0x4f8] sm:$0xff]  ;;  %v2061_v59 = vunpack.c.l.s8.bf16 %v2045_v52  ;;  %v2226_v61 = vunpack.c.h.s8.bf16 %v2194_v57  ;;  %v2181_v52 = vld [vmem:[%s4875_s19 + $0x480] sm:$0xff] }
 0x2d8   : > { %1974 = vmatpush1.bf16.msra.mxu1 %v1924_v62  ;;  %2015 = vmatpush1.bf16.msra.mxu0 %v1926_v63  ;;  %v2228_v62 = vunpack.c.h.s8.bf16 %v2196_v58  ;;  %v2193_v63 = vld [vmem:[%s4875_s19 + $0x4e0] sm:$0xff] }
 0x2d9   : > { %2095 = vmatprep.subr.bf16.mxu1 %v2090_v13  ;;  %2136 = vmatprep.subr.bf16.mxu0 %v2092_v0  ;;  %v2195_v13 = vld [vmem:[%s4875_s19 + $0x4f0] sm:$0xff]  ;;  %v2225_v0 = vunpack.c.h.s8.bf16 %v2193_v63  ;;  %v2221_v22 = vunpack.c.l.s8.bf16 %v2193_v63  ;;  %v2329_v63 = vld [vmem:[%s4875_s19 + $0x560] sm:$0xff] }
 0x2da   : > { %v2227_v1 = vunpack.c.h.s8.bf16 %v2195_v13 }
 0x2db   : > { %1992 = vmatmul.mubr.bf16.vlgmr.msra.gmra.mxu1 %v1957_v7  ;;  %2033 = vmatmul.mubr.bf16.vlgmr.msra.gmra.mxu0 %v1957_v7  ;;  %v5061_v14 = vpop.f32.mrf.mxu1  ;;  %v5063_v15 = vpop.f32.mrf.mxu0  ;;  %v2190_v7 = vld [vmem:[%s4875_s19 + $0x4c8] sm:$0xff] }
 0x2dc   : > { %2096 = vmatpush1.bf16.msra.mxu1 %v2089_v5  ;;  %2137 = vmatpush1.bf16.msra.mxu0 %v2091_v6  ;;  %v2222_v5 = vunpack.c.l.s8.bf16 %v2194_v57  ;;  %v2224_v6 = vunpack.c.l.s8.bf16 %v2196_v58  ;;  %v2218_v24 = vunpack.c.h.s8.bf16 %v2190_v7  ;;  %v2330_v57 = vld [vmem:[%s4875_s19 + $0x568] sm:$0xff]  ;;  %v2332_v58 = vld [vmem:[%s4875_s19 + $0x578] sm:$0xff] }
 0x2dd   : > { %v5065_v19 = vpop.f32.mrf.mxu1  ;;  %v5067_v20 = vpop.f32.mrf.mxu0  ;;  %2097 = vmatprep.subr.bf16.mxu1 %v2086_v8  ;;  %2138 = vmatprep.subr.bf16.mxu0 %v2088_v9  ;;  %v2192_v8 = vld [vmem:[%s4875_s19 + $0x4d8] sm:$0xff] }
 0x2de   : > { %2127 = vmatprep.mubr.bf16.mxu1 %v4464_v3  ;;  %2168 = vmatprep.mubr.bf16.mxu0 %v4464_v3  ;;  %v2220_v25 = vunpack.c.h.s8.bf16 %v2192_v8 }
 0x2df   : > { %v1236_v26 = vpop.f32.mrf.mxu1  ;;  %v1277_v27 = vpop.f32.mrf.mxu0 }
 0x2e0   : > { %2098 = vmatpush1.bf16.msra.mxu1 %v2085_v16  ;;  %2139 = vmatpush1.bf16.msra.mxu0 %v2087_v18  ;;  %v2223_v18 = vunpack.c.l.s8.bf16 %v2195_v13  ;;  %v2189_v26 = vld [vmem:[%s4875_s19 + $0x4c0] sm:$0xff]  ;;  %v2191_v27 = vld [vmem:[%s4875_s19 + $0x4d0] sm:$0xff] }
 0x2e1   : > { %v1237_v30 = vpop.f32.mrf.mxu1  ;;  %v1278_v31 = vpop.f32.mrf.mxu0  ;;  %2099 = vmatprep.subr.bf16.mxu1 %v2082_v21  ;;  %2140 = vmatprep.subr.bf16.mxu0 %v2084_v23  ;;  %v2331_v13 = vld [vmem:[%s4875_s19 + $0x570] sm:$0xff] }
 0x2e2   : > { %v2217_v30 = vunpack.c.h.s8.bf16 %v2189_v26  ;;  %v2219_v31 = vunpack.c.h.s8.bf16 %v2191_v27 }
 0x2e4   : > { %2100 = vmatpush1.bf16.msra.mxu1 %v2081_v28  ;;  %2141 = vmatpush1.bf16.msra.mxu0 %v2083_v29 }
 0x2e5   : > { %2101 = vmatprep.subr.bf16.mxu1 %v2078_v32  ;;  %2142 = vmatprep.subr.bf16.mxu0 %v2080_v34 }
 0x2e8   : > { %2102 = vmatpush1.bf16.msra.mxu1 %v2077_v36  ;;  %2143 = vmatpush1.bf16.msra.mxu0 %v2079_v37  ;;  %v2213_v36 = vunpack.c.l.s8.bf16 %v2189_v26  ;;  %v2215_v37 = vunpack.c.l.s8.bf16 %v2191_v27  ;;  %v2325_v27 = vld [vmem:[%s4875_s19 + $0x540] sm:$0xff] }
 0x2e9   : > { %2103 = vmatprep.subr.bf16.mxu1 %v2074_v38  ;;  %2144 = vmatprep.subr.bf16.mxu0 %v2076_v39  ;;  %v2210_v38 = vunpack.c.h.s8.bf16 %v2186_v35  ;;  %v2212_v39 = vunpack.c.h.s8.bf16 %v2188_v12 }
 0x2ec   : > { %2104 = vmatpush1.bf16.msra.mxu1 %v2073_v42  ;;  %2145 = vmatpush1.bf16.msra.mxu0 %v2075_v43  ;;  %v2209_v42 = vunpack.c.h.s8.bf16 %v2185_v40  ;;  %v2211_v43 = vunpack.c.h.s8.bf16 %v2187_v41 }
 0x2ed   : > { %2105 = vmatprep.subr.bf16.mxu1 %v2070_v44  ;;  %2146 = vmatprep.subr.bf16.mxu0 %v2072_v45  ;;  %v2206_v44 = vunpack.c.l.s8.bf16 %v2186_v35  ;;  %v2208_v45 = vunpack.c.l.s8.bf16 %v2188_v12  ;;  %v2324_v35 = vld [vmem:[%s4875_s19 + $0x538] sm:$0xff]  ;;  %v2349_v12 = vunpack.c.l.s8.bf16 %v2325_v27 }
 0x2f0   : > { %2106 = vmatpush1.bf16.msra.mxu1 %v2069_v48  ;;  %2147 = vmatpush1.bf16.msra.mxu0 %v2071_v49  ;;  %v2205_v48 = vunpack.c.l.s8.bf16 %v2185_v40  ;;  %v2207_v49 = vunpack.c.l.s8.bf16 %v2187_v41  ;;  %v2323_v40 = vld [vmem:[%s4875_s19 + $0x530] sm:$0xff] }
 0x2f1   : > { %2107 = vmatprep.subr.bf16.mxu1 %v2066_v50  ;;  %2148 = vmatprep.subr.bf16.mxu0 %v2068_v51  ;;  %v2202_v50 = vunpack.c.h.s8.bf16 %v2182_v46  ;;  %v2204_v51 = vunpack.c.h.s8.bf16 %v2184_v47 }
 0x2f4   : > { %2108 = vmatpush1.bf16.msra.mxu1 %v2065_v53  ;;  %2149 = vmatpush1.bf16.msra.mxu0 %v2067_v54  ;;  %v2201_v53 = vunpack.c.h.s8.bf16 %v2181_v52  ;;  %v2203_v54 = vunpack.c.h.s8.bf16 %v2183_v17 }
 0x2f5   : > { %2109 = vmatprep.subr.bf16.mxu1 %v2062_v55  ;;  %2150 = vmatprep.subr.bf16.mxu0 %v2064_v56  ;;  %v2198_v55 = vunpack.c.l.s8.bf16 %v2182_v46  ;;  %v2200_v56 = vunpack.c.l.s8.bf16 %v2184_v47  ;;  %v2320_v46 = vld [vmem:[%s4875_s19 + $0x518] sm:$0xff] }
 0x2f8   : > { %2110 = vmatpush1.bf16.msra.mxu1 %v2061_v59  ;;  %2151 = vmatpush1.bf16.msra.mxu0 %v2063_v60  ;;  %v2197_v59 = vunpack.c.l.s8.bf16 %v2181_v52  ;;  %v2199_v60 = vunpack.c.l.s8.bf16 %v2183_v17  ;;  %v2319_v52 = vld [vmem:[%s4875_s19 + $0x510] sm:$0xff] }
 0x2f9   : > { %2231 = vmatprep.subr.bf16.mxu1 %v2226_v61  ;;  %2272 = vmatprep.subr.bf16.mxu0 %v2228_v62  ;;  %v2362_v61 = vunpack.c.h.s8.bf16 %v2330_v57  ;;  %v2364_v62 = vunpack.c.h.s8.bf16 %v2332_v58 }
 0x2fb   : > { %v1314_v9 = vpop.f32.mrf.mxu1  ;;  %v1355_v10 = vpop.f32.mrf.mxu0  ;;  %2128 = vmatmul.mubr.bf16.vlgmr.msra.gmra.mxu1 %v2093_v4  ;;  %2169 = vmatmul.mubr.bf16.vlgmr.msra.gmra.mxu0 %v2093_v4  ;;  %v2229_v4 = vrot.slane %v5013_v33, 2  ;;  %v2357_v33 = vunpack.c.l.s8.bf16 %v2329_v63 }
 0x2fc   : > { %v5089_v11 = vadd.f32 %v1314_v9, %v5061_v14  ;;  %v5092_v16 = vadd.f32 %v1355_v10, %v5063_v15  ;;  %2232 = vmatpush1.bf16.msra.mxu1 %v2225_v0  ;;  %2273 = vmatpush1.bf16.msra.mxu0 %v2227_v1  ;;  %v2361_v0 = vunpack.c.h.s8.bf16 %v2329_v63  ;;  %v2363_v1 = vunpack.c.h.s8.bf16 %v2331_v13 }
 0x2fd   : > { %v1316_v21 = vpop.f32.mrf.mxu1  ;;  %v1357_v23 = vpop.f32.mrf.mxu0  ;;  %2233 = vmatprep.subr.bf16.mxu1 %v2222_v5  ;;  %2274 = vmatprep.subr.bf16.mxu0 %v2224_v6  ;;  %v2358_v5 = vunpack.c.l.s8.bf16 %v2330_v57  ;;  %v2360_v6 = vunpack.c.l.s8.bf16 %v2332_v58  ;;  %v2465_v57 = vld [vmem:[%s4875_s19 + $0x5e8] sm:$0xff]  ;;  %v2467_v58 = vld [vmem:[%s4875_s19 + $0x5f8] sm:$0xff] }
 0x2fe   : > { %v5097_v28 = vadd.f32 %v1316_v21, %v5065_v19  ;;  %v5100_v14 = vadd.f32 %v1357_v23, %v5067_v20  ;;  %2263 = vmatprep.mubr.bf16.mxu1 %v4464_v3  ;;  %2304 = vmatprep.mubr.bf16.mxu0 %v4464_v3  ;;  %v2214_v19 = vunpack.c.l.s8.bf16 %v2190_v7  ;;  %v2216_v20 = vunpack.c.l.s8.bf16 %v2192_v8  ;;  %v2326_v7 = vld [vmem:[%s4875_s19 + $0x548] sm:$0xff]  ;;  %v2328_v8 = vld [vmem:[%s4875_s19 + $0x558] sm:$0xff] }
 0x2ff   : > { %v1318_v15 = vpop.f32.mrf.mxu1  ;;  %v1359_v29 = vpop.f32.mrf.mxu0  ;;  %v2359_v21 = vunpack.c.l.s8.bf16 %v2331_v13  ;;  %v2356_v26 = vunpack.c.h.s8.bf16 %v2328_v8  ;;  %v2499_v63 = vunpack.c.h.s8.bf16 %v2467_v58  ;;  %v2464_v13 = vld [vmem:[%s4875_s19 + $0x5e0] sm:$0xff] }
 0x300   : > { %2234 = vmatpush1.bf16.msra.mxu1 %v2221_v22  ;;  %2275 = vmatpush1.bf16.msra.mxu0 %v2223_v18  ;;  %v2327_v15 = vld [vmem:[%s4875_s19 + $0x550] sm:$0xff] }
 0x301   : > { %v1319_v32 = vpop.f32.mrf.mxu1  ;;  %v1360_v34 = vpop.f32.mrf.mxu0  ;;  %2235 = vmatprep.subr.bf16.mxu1 %v2218_v24  ;;  %2276 = vmatprep.subr.bf16.mxu0 %v2220_v25  ;;  %v2354_v25 = vunpack.c.h.s8.bf16 %v2326_v7 }
 0x302   : > { %v2355_v32 = vunpack.c.h.s8.bf16 %v2327_v15 }
 0x304   : > { %2236 = vmatpush1.bf16.msra.mxu1 %v2217_v30  ;;  %2277 = vmatpush1.bf16.msra.mxu0 %v2219_v31  ;;  %v2353_v31 = vunpack.c.h.s8.bf16 %v2325_v27 }
 0x305   : > { %2237 = vmatprep.subr.bf16.mxu1 %v2214_v19  ;;  %2278 = vmatprep.subr.bf16.mxu0 %v2216_v20  ;;  %v2322_v20 = vld [vmem:[%s4875_s19 + $0x528] sm:$0xff] }
 0x308   : > { %2238 = vmatpush1.bf16.msra.mxu1 %v2213_v36  ;;  %2279 = vmatpush1.bf16.msra.mxu0 %v2215_v37  ;;  %v2351_v36 = vunpack.c.l.s8.bf16 %v2327_v15  ;;  %v2346_v37 = vunpack.c.h.s8.bf16 %v2322_v20 }
 0x309   : > { %2239 = vmatprep.subr.bf16.mxu1 %v2210_v38  ;;  %2280 = vmatprep.subr.bf16.mxu0 %v2212_v39  ;;  %v2348_v38 = vunpack.c.h.s8.bf16 %v2324_v35  ;;  %v2321_v39 = vld [vmem:[%s4875_s19 + $0x520] sm:$0xff] }
 0x30a   : > { %v2345_v41 = vunpack.c.h.s8.bf16 %v2321_v39  ;;  %v2341_v47 = vunpack.c.l.s8.bf16 %v2321_v39  ;;  %v2456_v39 = vld [vmem:[%s4875_s19 + $0x5a0] sm:$0xff] }
 0x30c   : > { %2240 = vmatpush1.bf16.msra.mxu1 %v2209_v42  ;;  %2281 = vmatpush1.bf16.msra.mxu0 %v2211_v43  ;;  %v2347_v42 = vunpack.c.h.s8.bf16 %v2323_v40  ;;  %v2342_v43 = vunpack.c.l.s8.bf16 %v2322_v20  ;;  %v2457_v20 = vld [vmem:[%s4875_s19 + $0x5a8] sm:$0xff] }
 0x30d   : > { %2241 = vmatprep.subr.bf16.mxu1 %v2206_v44  ;;  %2282 = vmatprep.subr.bf16.mxu0 %v2208_v45  ;;  %v2344_v44 = vunpack.c.l.s8.bf16 %v2324_v35  ;;  %v2318_v45 = vld [vmem:[%s4875_s19 + $0x508] sm:$0xff]  ;;  %v2459_v35 = vld [vmem:[%s4875_s19 + $0x5b8] sm:$0xff] }
 0x310   : > { %2242 = vmatpush1.bf16.msra.mxu1 %v2205_v48  ;;  %2283 = vmatpush1.bf16.msra.mxu0 %v2207_v49  ;;  %v2343_v48 = vunpack.c.l.s8.bf16 %v2323_v40  ;;  %v2338_v49 = vunpack.c.h.s8.bf16 %v2318_v45  ;;  %v2458_v40 = vld [vmem:[%s4875_s19 + $0x5b0] sm:$0xff] }
 0x311   : > { %2243 = vmatprep.subr.bf16.mxu1 %v2202_v50  ;;  %2284 = vmatprep.subr.bf16.mxu0 %v2204_v51  ;;  %v2340_v50 = vunpack.c.h.s8.bf16 %v2320_v46  ;;  %v2317_v51 = vld [vmem:[%s4875_s19 + $0x500] sm:$0xff] }
 0x312   : > { %v2337_v17 = vunpack.c.h.s8.bf16 %v2317_v51 }
 0x314   : > { %2244 = vmatpush1.bf16.msra.mxu1 %v2201_v53  ;;  %2285 = vmatpush1.bf16.msra.mxu0 %v2203_v54  ;;  %v2339_v53 = vunpack.c.h.s8.bf16 %v2319_v52  ;;  %v2334_v54 = vunpack.c.l.s8.bf16 %v2318_v45  ;;  %v2453_v45 = vld [vmem:[%s4875_s19 + $0x588] sm:$0xff] }
 0x315   : > { %2245 = vmatprep.subr.bf16.mxu1 %v2198_v55  ;;  %2286 = vmatprep.subr.bf16.mxu0 %v2200_v56  ;;  %v2336_v55 = vunpack.c.l.s8.bf16 %v2320_v46  ;;  %v3702_v56 = vld [vmem:[#allocation16] ss:$0 sm:$0xff] }
 0x316   : > { %v2455_v46 = vld [vmem:[%s4875_s19 + $0x598] sm:$0xff] }
 0x318   : > { %2246 = vmatpush1.bf16.msra.mxu1 %v2197_v59  ;;  %2287 = vmatpush1.bf16.msra.mxu0 %v2199_v60  ;;  %v2333_v59 = vunpack.c.l.s8.bf16 %v2317_v51  ;;  %v2335_v60 = vunpack.c.l.s8.bf16 %v2319_v52  ;;  %v2452_v51 = vld [vmem:[%s4875_s19 + $0x580] sm:$0xff]  ;;  %v2454_v52 = vld [vmem:[%s4875_s19 + $0x590] sm:$0xff] }
 0x319   : > { %2366 = vmatprep.subr.bf16.mxu1 %v2362_v61  ;;  %2407 = vmatprep.subr.bf16.mxu0 %v2364_v62  ;;  %v1044_v61 = vadd.f32 %v3702_v56, %v4952_v2  ;;  %v2497_v62 = vunpack.c.h.s8.bf16 %v2465_v57  ;;  %v2463_v2 = vld [vmem:[%s4875_s19 + $0x5d8] sm:$0xff]  ;;  %v2603_v56 = vld [vmem:[%s4875_s19 + $0x668] sm:$0xff] }
 0x31a   : > { %v2491_v15 = vunpack.c.h.s8.bf16 %v2463_v2 }
 0x31b   : > { %v1447_v9 = vpop.f32.mrf.mxu1  ;;  %v1488_v10 = vpop.f32.mrf.mxu0  ;;  %2264 = vmatmul.mubr.bf16.vlgmr.msra.gmra.mxu1 %v2229_v4  ;;  %2305 = vmatmul.mubr.bf16.vlgmr.msra.gmra.mxu0 %v2229_v4 }
 0x31c   : > { %v5120_v22 = vadd.f32 %v1447_v9, %v5089_v11  ;;  %v5123_v18 = vadd.f32 %v1488_v10, %v5092_v16  ;;  %2367 = vmatpush1.bf16.msra.mxu1 %v2361_v0  ;;  %2408 = vmatpush1.bf16.msra.mxu0 %v2363_v1  ;;  %v2466_v0 = vld [vmem:[%s4875_s19 + $0x5f0] sm:$0xff]  ;;  %v2496_v1 = vunpack.c.h.s8.bf16 %v2464_v13 }
 0x31d   : > { %v1449_v23 = vpop.f32.mrf.mxu1  ;;  %v1490_v24 = vpop.f32.mrf.mxu0  ;;  %2368 = vmatprep.subr.bf16.mxu1 %v2358_v5  ;;  %2409 = vmatprep.subr.bf16.mxu0 %v2360_v6  ;;  %v2498_v4 = vunpack.c.h.s8.bf16 %v2466_v0  ;;  %v5148_v5 = vpack.c.bf16 %v1044_v61, %v1044_v61  ;;  %v2493_v6 = vunpack.c.l.s8.bf16 %v2465_v57  ;;  %v2605_v57 = vld [vmem:[%s4875_s19 + $0x678] sm:$0xff] }
 0x31e   : > { %v5128_v29 = vadd.f32 %v1449_v23, %v5097_v28  ;;  %v5131_v11 = vadd.f32 %v1490_v24, %v5100_v14  ;;  %2398 = vmatprep.mubr.bf16.mxu1 %v4464_v3  ;;  %2439 = vmatprep.mubr.bf16.mxu0 %v4464_v3  ;;  %v2350_v28 = vunpack.c.l.s8.bf16 %v2326_v7  ;;  %v2352_v14 = vunpack.c.l.s8.bf16 %v2328_v8  ;;  %v2461_v8 = vld [vmem:[%s4875_s19 + $0x5c8] sm:$0xff] }
 0x31f   : > { %v1451_v16 = vpop.f32.mrf.mxu1  ;;  %v1492_v30 = vpop.f32.mrf.mxu0  ;;  %v2495_v7 = vunpack.c.l.s8.bf16 %v2467_v58  ;;  %v2492_v23 = vunpack.c.l.s8.bf16 %v2464_v13  ;;  %v2494_v24 = vunpack.c.l.s8.bf16 %v2466_v0  ;;  %v2489_v27 = vunpack.c.h.s8.bf16 %v2461_v8 }
 0x320   : > { %2369 = vmatpush1.bf16.msra.mxu1 %v2357_v33  ;;  %2410 = vmatpush1.bf16.msra.mxu0 %v2359_v21  ;;  %v2460_v16 = vld [vmem:[%s4875_s19 + $0x5c0] sm:$0xff]  ;;  %v2462_v30 = vld [vmem:[%s4875_s19 + $0x5d0] sm:$0xff]  ;;  %v2468_v58 = vunpack.c.l.s8.bf16 %v2452_v51  ;;  %v2637_v61 = vunpack.c.h.s8.bf16 %v2605_v57 }
 0x321   : > { %v1452_v34 = vpop.f32.mrf.mxu1  ;;  %v1493_v19 = vpop.f32.mrf.mxu0  ;;  %2370 = vmatprep.subr.bf16.mxu1 %v2354_v25  ;;  %2411 = vmatprep.subr.bf16.mxu0 %v2356_v26 }
 0x322   : > { %v2488_v34 = vunpack.c.h.s8.bf16 %v2460_v16  ;;  %v2490_v19 = vunpack.c.h.s8.bf16 %v2462_v30 }
 0x324   : > { %2371 = vmatpush1.bf16.msra.mxu1 %v2353_v31  ;;  %2412 = vmatpush1.bf16.msra.mxu0 %v2355_v32 }
 0x325   : > { %2372 = vmatprep.subr.bf16.mxu1 %v2350_v28  ;;  %2413 = vmatprep.subr.bf16.mxu0 %v2352_v14 }
 0x328   : > { %2373 = vmatpush1.bf16.msra.mxu1 %v2349_v12  ;;  %2414 = vmatpush1.bf16.msra.mxu0 %v2351_v36  ;;  %v2484_v12 = vunpack.c.l.s8.bf16 %v2460_v16  ;;  %v2486_v36 = vunpack.c.l.s8.bf16 %v2462_v30  ;;  %v2598_v30 = vld [vmem:[%s4875_s19 + $0x640] sm:$0xff] }
 0x329   : > { %2374 = vmatprep.subr.bf16.mxu1 %v2346_v37  ;;  %2415 = vmatprep.subr.bf16.mxu0 %v2348_v38  ;;  %v2481_v37 = vunpack.c.h.s8.bf16 %v2457_v20  ;;  %v2483_v38 = vunpack.c.h.s8.bf16 %v2459_v35 }
 0x32c   : > { %2375 = vmatpush1.bf16.msra.mxu1 %v2345_v41  ;;  %2416 = vmatpush1.bf16.msra.mxu0 %v2347_v42  ;;  %v2480_v41 = vunpack.c.h.s8.bf16 %v2456_v39  ;;  %v2482_v42 = vunpack.c.h.s8.bf16 %v2458_v40 }
 0x32d   : > { %2376 = vmatprep.subr.bf16.mxu1 %v2342_v43  ;;  %2417 = vmatprep.subr.bf16.mxu0 %v2344_v44  ;;  %v2477_v43 = vunpack.c.l.s8.bf16 %v2457_v20  ;;  %v2479_v44 = vunpack.c.l.s8.bf16 %v2459_v35  ;;  %v2597_v20 = vld [vmem:[%s4875_s19 + $0x638] sm:$0xff]  ;;  %v2622_v35 = vunpack.c.l.s8.bf16 %v2598_v30 }
 0x330   : > { %2377 = vmatpush1.bf16.msra.mxu1 %v2341_v47  ;;  %2418 = vmatpush1.bf16.msra.mxu0 %v2343_v48  ;;  %v2476_v47 = vunpack.c.l.s8.bf16 %v2456_v39  ;;  %v2478_v48 = vunpack.c.l.s8.bf16 %v2458_v40  ;;  %v2596_v39 = vld [vmem:[%s4875_s19 + $0x630] sm:$0xff] }
 0x331   : > { %2378 = vmatprep.subr.bf16.mxu1 %v2338_v49  ;;  %2419 = vmatprep.subr.bf16.mxu0 %v2340_v50  ;;  %v2473_v49 = vunpack.c.h.s8.bf16 %v2453_v45  ;;  %v2475_v50 = vunpack.c.h.s8.bf16 %v2455_v46 }
 0x334   : > { %2379 = vmatpush1.bf16.msra.mxu1 %v2337_v17  ;;  %2420 = vmatpush1.bf16.msra.mxu0 %v2339_v53  ;;  %v2472_v17 = vunpack.c.h.s8.bf16 %v2452_v51  ;;  %v2474_v53 = vunpack.c.h.s8.bf16 %v2454_v52  ;;  %v2592_v51 = vld [vmem:[%s4875_s19 + $0x610] sm:$0xff] }
 0x335   : > { %2380 = vmatprep.subr.bf16.mxu1 %v2334_v54  ;;  %2421 = vmatprep.subr.bf16.mxu0 %v2336_v55  ;;  %v2469_v54 = vunpack.c.l.s8.bf16 %v2453_v45  ;;  %v2471_v55 = vunpack.c.l.s8.bf16 %v2455_v46  ;;  %v2593_v45 = vld [vmem:[%s4875_s19 + $0x618] sm:$0xff] }
 0x338   : > { %2381 = vmatpush1.bf16.msra.mxu1 %v2333_v59  ;;  %2422 = vmatpush1.bf16.msra.mxu0 %v2335_v60  ;;  %v2470_v59 = vunpack.c.l.s8.bf16 %v2454_v52  ;;  %v2635_v60 = vunpack.c.h.s8.bf16 %v2603_v56 }
 0x339   : > { %2504 = vmatprep.subr.bf16.mxu1 %v2497_v62  ;;  %2545 = vmatprep.subr.bf16.mxu0 %v2499_v63  ;;  %v2602_v62 = vld [vmem:[%s4875_s19 + $0x660] sm:$0xff]  ;;  %v2604_v63 = vld [vmem:[%s4875_s19 + $0x670] sm:$0xff] }
 0x33a   : > { %v2634_v13 = vunpack.c.h.s8.bf16 %v2602_v62  ;;  %v2636_v0 = vunpack.c.h.s8.bf16 %v2604_v63 }
 0x33b   : > { %v1583_v9 = vpop.f32.mrf.mxu1  ;;  %v1624_v10 = vpop.f32.mrf.mxu0  ;;  %2399 = vmatmul.mubr.bf16.vlgmr.msra.gmra.mxu1 %v5148_v5  ;;  %2440 = vmatmul.mubr.bf16.vlgmr.msra.gmra.mxu0 %v5148_v5 }
 0x33c   : > { %v5155_v33 = vadd.f32 %v1583_v9, %v5120_v22  ;;  %v5158_v21 = vadd.f32 %v1624_v10, %v5123_v18  ;;  %2505 = vmatpush1.bf16.msra.mxu1 %v2496_v1  ;;  %2546 = vmatpush1.bf16.msra.mxu0 %v2498_v4  ;;  %v5183_v1 = vshrl.u32 %v5148_v5, 16  ;;  %v2631_v4 = vunpack.c.l.s8.bf16 %v2603_v56  ;;  %v2742_v56 = vld [vmem:[%s4875_s19 + $0x6f8] sm:$0xff] }
 0x33d   : > { %v1585_v25 = vpop.f32.mrf.mxu1  ;;  %v1626_v26 = vpop.f32.mrf.mxu0  ;;  %2506 = vmatprep.subr.bf16.mxu1 %v2493_v6  ;;  %2547 = vmatprep.subr.bf16.mxu0 %v2495_v7  ;;  %v2633_v6 = vunpack.c.l.s8.bf16 %v2605_v57  ;;  %v2599_v7 = vld [vmem:[%s4875_s19 + $0x648] sm:$0xff] }
 0x33e   : > { %v5163_v31 = vadd.f32 %v1585_v25, %v5128_v29  ;;  %v5166_v22 = vadd.f32 %v1626_v26, %v5131_v11  ;;  %2536 = vmatprep.mubr.bf16.mxu1 %v4464_v3  ;;  %2577 = vmatprep.mubr.bf16.mxu0 %v4464_v3  ;;  %v2485_v29 = vunpack.c.l.s8.bf16 %v2461_v8  ;;  %v2487_v11 = vunpack.c.l.s8.bf16 %v2463_v2  ;;  %v2601_v8 = vld [vmem:[%s4875_s19 + $0x658] sm:$0xff] }
 0x33f   : > { %v1587_v18 = vpop.f32.mrf.mxu1  ;;  %v1628_v32 = vpop.f32.mrf.mxu0  ;;  %v2632_v25 = vunpack.c.l.s8.bf16 %v2604_v63  ;;  %v2629_v16 = vunpack.c.h.s8.bf16 %v2601_v8 }
 0x340   : > { %2507 = vmatpush1.bf16.msra.mxu1 %v2492_v23  ;;  %2548 = vmatpush1.bf16.msra.mxu0 %v2494_v24  ;;  %v2630_v24 = vunpack.c.l.s8.bf16 %v2602_v62  ;;  %v2600_v18 = vld [vmem:[%s4875_s19 + $0x650] sm:$0xff] }
 0x341   : > { %v1588_v28 = vpop.f32.mrf.mxu1  ;;  %v1629_v14 = vpop.f32.mrf.mxu0  ;;  %2508 = vmatprep.subr.bf16.mxu1 %v2489_v27  ;;  %2549 = vmatprep.subr.bf16.mxu0 %v2491_v15  ;;  %v2627_v15 = vunpack.c.h.s8.bf16 %v2599_v7  ;;  %v2741_v62 = vld [vmem:[%s4875_s19 + $0x6f0] sm:$0xff] }
 0x342   : > { %v2628_v28 = vunpack.c.h.s8.bf16 %v2600_v18 }
 0x344   : > { %2509 = vmatpush1.bf16.msra.mxu1 %v2488_v34  ;;  %2550 = vmatpush1.bf16.msra.mxu0 %v2490_v19  ;;  %v2626_v19 = vunpack.c.h.s8.bf16 %v2598_v30 }
 0x345   : > { %2510 = vmatprep.subr.bf16.mxu1 %v2485_v29  ;;  %2551 = vmatprep.subr.bf16.mxu0 %v2487_v11  ;;  %v2595_v11 = vld [vmem:[%s4875_s19 + $0x628] sm:$0xff] }
 0x348   : > { %2511 = vmatpush1.bf16.msra.mxu1 %v2484_v12  ;;  %2552 = vmatpush1.bf16.msra.mxu0 %v2486_v36  ;;  %v2624_v12 = vunpack.c.l.s8.bf16 %v2600_v18  ;;  %v2619_v36 = vunpack.c.h.s8.bf16 %v2595_v11 }
 0x349   : > { %2512 = vmatprep.subr.bf16.mxu1 %v2481_v37  ;;  %2553 = vmatprep.subr.bf16.mxu0 %v2483_v38  ;;  %v2621_v37 = vunpack.c.h.s8.bf16 %v2597_v20  ;;  %v2594_v38 = vld [vmem:[%s4875_s19 + $0x620] sm:$0xff] }
 0x34a   : > { %v2618_v40 = vunpack.c.h.s8.bf16 %v2594_v38  ;;  %v2614_v46 = vunpack.c.l.s8.bf16 %v2594_v38  ;;  %v2731_v38 = vld [vmem:[%s4875_s19 + $0x6a0] sm:$0xff] }
 0x34c   : > { %2513 = vmatpush1.bf16.msra.mxu1 %v2480_v41  ;;  %2554 = vmatpush1.bf16.msra.mxu0 %v2482_v42  ;;  %v2620_v41 = vunpack.c.h.s8.bf16 %v2596_v39  ;;  %v2615_v42 = vunpack.c.l.s8.bf16 %v2595_v11  ;;  %v2732_v11 = vld [vmem:[%s4875_s19 + $0x6a8] sm:$0xff] }
 0x34d   : > { %2514 = vmatprep.subr.bf16.mxu1 %v2477_v43  ;;  %2555 = vmatprep.subr.bf16.mxu0 %v2479_v44  ;;  %v2617_v43 = vunpack.c.l.s8.bf16 %v2597_v20  ;;  %v2591_v44 = vld [vmem:[%s4875_s19 + $0x608] sm:$0xff]  ;;  %v2734_v20 = vld [vmem:[%s4875_s19 + $0x6b8] sm:$0xff] }
 0x350   : > { %2515 = vmatpush1.bf16.msra.mxu1 %v2476_v47  ;;  %2556 = vmatpush1.bf16.msra.mxu0 %v2478_v48  ;;  %v2616_v47 = vunpack.c.l.s8.bf16 %v2596_v39  ;;  %v2611_v48 = vunpack.c.h.s8.bf16 %v2591_v44  ;;  %v2733_v39 = vld [vmem:[%s4875_s19 + $0x6b0] sm:$0xff] }
 0x351   : > { %2516 = vmatprep.subr.bf16.mxu1 %v2473_v49  ;;  %2557 = vmatprep.subr.bf16.mxu0 %v2475_v50  ;;  %v2613_v49 = vunpack.c.h.s8.bf16 %v2593_v45  ;;  %v2590_v50 = vld [vmem:[%s4875_s19 + $0x600] sm:$0xff] }
 0x352   : > { %v2610_v52 = vunpack.c.h.s8.bf16 %v2590_v50  ;;  %v2606_v57 = vunpack.c.l.s8.bf16 %v2590_v50  ;;  %v2727_v50 = vld [vmem:[%s4875_s19 + $0x680] sm:$0xff] }
 0x354   : > { %2517 = vmatpush1.bf16.msra.mxu1 %v2472_v17  ;;  %2558 = vmatpush1.bf16.msra.mxu0 %v2474_v53  ;;  %v2612_v17 = vunpack.c.h.s8.bf16 %v2592_v51  ;;  %v2607_v53 = vunpack.c.l.s8.bf16 %v2591_v44  ;;  %v2728_v44 = vld [vmem:[%s4875_s19 + $0x688] sm:$0xff] }
 0x355   : > { %2518 = vmatprep.subr.bf16.mxu1 %v2469_v54  ;;  %2559 = vmatprep.subr.bf16.mxu0 %v2471_v55  ;;  %v2609_v54 = vunpack.c.l.s8.bf16 %v2593_v45  ;;  %v2740_v55 = vld [vmem:[%s4875_s19 + $0x6e8] sm:$0xff]  ;;  %v2730_v45 = vld [vmem:[%s4875_s19 + $0x698] sm:$0xff] }
 0x358   : > { %2519 = vmatpush1.bf16.msra.mxu1 %v2468_v58  ;;  %2560 = vmatpush1.bf16.msra.mxu0 %v2470_v59  ;;  %v2608_v58 = vunpack.c.l.s8.bf16 %v2592_v51  ;;  %v2772_v59 = vunpack.c.h.s8.bf16 %v2740_v55  ;;  %v2729_v51 = vld [vmem:[%s4875_s19 + $0x690] sm:$0xff] }
 0x359   : > { %2641 = vmatprep.subr.bf16.mxu1 %v2635_v60  ;;  %2682 = vmatprep.subr.bf16.mxu0 %v2637_v61  ;;  %v2774_v60 = vunpack.c.h.s8.bf16 %v2742_v56  ;;  %v2739_v61 = vld [vmem:[%s4875_s19 + $0x6e0] sm:$0xff] }
 0x35a   : > { %v2771_v63 = vunpack.c.h.s8.bf16 %v2739_v61 }
 0x35b   : > { %v1718_v2 = vpop.f32.mrf.mxu1  ;;  %v1759_v9 = vpop.f32.mrf.mxu0  ;;  %2537 = vmatmul.mubr.bf16.vlgmr.msra.gmra.mxu1 %v5183_v1  ;;  %2578 = vmatmul.mubr.bf16.vlgmr.msra.gmra.mxu0 %v5183_v1 }
 0x35c   : > { %v5190_v10 = vadd.f32 %v1718_v2, %v5155_v33  ;;  %v5193_v23 = vadd.f32 %v1759_v9, %v5158_v21  ;;  %2642 = vmatpush1.bf16.msra.mxu1 %v2634_v13  ;;  %2683 = vmatpush1.bf16.msra.mxu0 %v2636_v0  ;;  %v2773_v13 = vunpack.c.h.s8.bf16 %v2741_v62  ;;  %v2639_v0 = vrot.slane %v5148_v5, 1 }
 0x35d   : > { %v1720_v26 = vpop.f32.mrf.mxu1  ;;  %v1761_v27 = vpop.f32.mrf.mxu0  ;;  %2643 = vmatprep.subr.bf16.mxu1 %v2631_v4  ;;  %2684 = vmatprep.subr.bf16.mxu0 %v2633_v6  ;;  %v2768_v4 = vunpack.c.l.s8.bf16 %v2740_v55  ;;  %v2770_v6 = vunpack.c.l.s8.bf16 %v2742_v56  ;;  %v2876_v55 = vld [vmem:[%s4875_s19 + $0x768] sm:$0xff]  ;;  %v2878_v56 = vld [vmem:[%s4875_s19 + $0x778] sm:$0xff] }
 0x35e   : > { %v5198_v32 = vadd.f32 %v1720_v26, %v5163_v31  ;;  %v5201_v33 = vadd.f32 %v1761_v27, %v5166_v22  ;;  %2673 = vmatprep.mubr.bf16.mxu1 %v4464_v3  ;;  %2714 = vmatprep.mubr.bf16.mxu0 %v4464_v3  ;;  %v2623_v31 = vunpack.c.l.s8.bf16 %v2599_v7  ;;  %v2625_v22 = vunpack.c.l.s8.bf16 %v2601_v8  ;;  %v2736_v7 = vld [vmem:[%s4875_s19 + $0x6c8] sm:$0xff]  ;;  %v2738_v8 = vld [vmem:[%s4875_s19 + $0x6d8] sm:$0xff] }
 0x35f   : > { %v1722_v21 = vpop.f32.mrf.mxu1  ;;  %v1763_v34 = vpop.f32.mrf.mxu0  ;;  %v2767_v26 = vunpack.c.l.s8.bf16 %v2739_v61  ;;  %v2769_v27 = vunpack.c.l.s8.bf16 %v2741_v62  ;;  %v2764_v30 = vunpack.c.h.s8.bf16 %v2736_v7  ;;  %v2766_v18 = vunpack.c.h.s8.bf16 %v2738_v8  ;;  %v2875_v61 = vld [vmem:[%s4875_s19 + $0x760] sm:$0xff]  ;;  %v2877_v62 = vld [vmem:[%s4875_s19 + $0x770] sm:$0xff] }
 0x360   : > { %2644 = vmatpush1.bf16.msra.mxu1 %v2630_v24  ;;  %2685 = vmatpush1.bf16.msra.mxu0 %v2632_v25  ;;  %v2735_v21 = vld [vmem:[%s4875_s19 + $0x6c0] sm:$0xff]  ;;  %v2737_v34 = vld [vmem:[%s4875_s19 + $0x6d0] sm:$0xff] }
 0x361   : > { %v1723_v14 = vpop.f32.mrf.mxu1  ;;  %v1764_v29 = vpop.f32.mrf.mxu0  ;;  %2645 = vmatprep.subr.bf16.mxu1 %v2627_v15  ;;  %2686 = vmatprep.subr.bf16.mxu0 %v2629_v16 }
 0x362   : > { %v2763_v14 = vunpack.c.h.s8.bf16 %v2735_v21  ;;  %v2765_v29 = vunpack.c.h.s8.bf16 %v2737_v34 }
 0x364   : > { %2646 = vmatpush1.bf16.msra.mxu1 %v2626_v19  ;;  %2687 = vmatpush1.bf16.msra.mxu0 %v2628_v28 }
 0x365   : > { %2647 = vmatprep.subr.bf16.mxu1 %v2623_v31  ;;  %2688 = vmatprep.subr.bf16.mxu0 %v2625_v22 }
 0x368   : > { %2648 = vmatpush1.bf16.msra.mxu1 %v2622_v35  ;;  %2689 = vmatpush1.bf16.msra.mxu0 %v2624_v12  ;;  %v2759_v35 = vunpack.c.l.s8.bf16 %v2735_v21  ;;  %v2761_v12 = vunpack.c.l.s8.bf16 %v2737_v34 }
 0x369   : > { %2649 = vmatprep.subr.bf16.mxu1 %v2619_v36  ;;  %2690 = vmatprep.subr.bf16.mxu0 %v2621_v37  ;;  %v2756_v36 = vunpack.c.h.s8.bf16 %v2732_v11  ;;  %v2758_v37 = vunpack.c.h.s8.bf16 %v2734_v20 }
 0x36c   : > { %2650 = vmatpush1.bf16.msra.mxu1 %v2618_v40  ;;  %2691 = vmatpush1.bf16.msra.mxu0 %v2620_v41  ;;  %v2755_v40 = vunpack.c.h.s8.bf16 %v2731_v38  ;;  %v2757_v41 = vunpack.c.h.s8.bf16 %v2733_v39 }
 0x36d   : > { %2651 = vmatprep.subr.bf16.mxu1 %v2615_v42  ;;  %2692 = vmatprep.subr.bf16.mxu0 %v2617_v43  ;;  %v2752_v42 = vunpack.c.l.s8.bf16 %v2732_v11  ;;  %v2754_v43 = vunpack.c.l.s8.bf16 %v2734_v20  ;;  %v2868_v11 = vld [vmem:[%s4875_s19 + $0x728] sm:$0xff]  ;;  %v2870_v20 = vld [vmem:[%s4875_s19 + $0x738] sm:$0xff] }
 0x370   : > { %2652 = vmatpush1.bf16.msra.mxu1 %v2614_v46  ;;  %2693 = vmatpush1.bf16.msra.mxu0 %v2616_v47  ;;  %v2751_v46 = vunpack.c.l.s8.bf16 %v2731_v38  ;;  %v2753_v47 = vunpack.c.l.s8.bf16 %v2733_v39  ;;  %v2867_v38 = vld [vmem:[%s4875_s19 + $0x720] sm:$0xff]  ;;  %v2869_v39 = vld [vmem:[%s4875_s19 + $0x730] sm:$0xff] }
 0x371   : > { %2653 = vmatprep.subr.bf16.mxu1 %v2611_v48  ;;  %2694 = vmatprep.subr.bf16.mxu0 %v2613_v49  ;;  %v2748_v48 = vunpack.c.h.s8.bf16 %v2728_v44  ;;  %v2750_v49 = vunpack.c.h.s8.bf16 %v2730_v45 }
 0x374   : > { %2654 = vmatpush1.bf16.msra.mxu1 %v2610_v52  ;;  %2695 = vmatpush1.bf16.msra.mxu0 %v2612_v17  ;;  %v2747_v52 = vunpack.c.h.s8.bf16 %v2727_v50  ;;  %v2749_v17 = vunpack.c.h.s8.bf16 %v2729_v51 }
 0x375   : > { %2655 = vmatprep.subr.bf16.mxu1 %v2607_v53  ;;  %2696 = vmatprep.subr.bf16.mxu0 %v2609_v54  ;;  %v2744_v53 = vunpack.c.l.s8.bf16 %v2728_v44  ;;  %v2746_v54 = vunpack.c.l.s8.bf16 %v2730_v45  ;;  %v2864_v44 = vld [vmem:[%s4875_s19 + $0x708] sm:$0xff]  ;;  %v2866_v45 = vld [vmem:[%s4875_s19 + $0x718] sm:$0xff] }
 0x378   : > { %2656 = vmatpush1.bf16.msra.mxu1 %v2606_v57  ;;  %2697 = vmatpush1.bf16.msra.mxu0 %v2608_v58  ;;  %v2743_v57 = vunpack.c.l.s8.bf16 %v2727_v50  ;;  %v2745_v58 = vunpack.c.l.s8.bf16 %v2729_v51  ;;  %v2863_v50 = vld [vmem:[%s4875_s19 + $0x700] sm:$0xff]  ;;  %v2865_v51 = vld [vmem:[%s4875_s19 + $0x710] sm:$0xff] }
 0x379   : > { %2777 = vmatprep.subr.bf16.mxu1 %v2772_v59  ;;  %2818 = vmatprep.subr.bf16.mxu0 %v2774_v60  ;;  %v2908_v59 = vunpack.c.h.s8.bf16 %v2876_v55  ;;  %v2910_v60 = vunpack.c.h.s8.bf16 %v2878_v56 }
 0x37b   : > { %v1856_v2 = vpop.f32.mrf.mxu1  ;;  %v1897_v9 = vpop.f32.mrf.mxu0  ;;  %2674 = vmatmul.mubr.bf16.vlgmr.msra.gmra.mxu1 %v2639_v0  ;;  %2715 = vmatmul.mubr.bf16.vlgmr.msra.gmra.mxu0 %v2639_v0  ;;  %v2775_v0 = vrot.slane %v5183_v1, 1 }
 0x37c   : > { %v5221_v24 = vadd.f32 %v1856_v2, %v5190_v10  ;;  %v5224_v25 = vadd.f32 %v1897_v9, %v5193_v23  ;;  %2778 = vmatpush1.bf16.msra.mxu1 %v2771_v63  ;;  %2819 = vmatpush1.bf16.msra.mxu0 %v2773_v13  ;;  %v2907_v63 = vunpack.c.h.s8.bf16 %v2875_v61  ;;  %v2909_v13 = vunpack.c.h.s8.bf16 %v2877_v62 }
 0x37d   : > { %v1858_v15 = vpop.f32.mrf.mxu1  ;;  %v1899_v16 = vpop.f32.mrf.mxu0  ;;  %2779 = vmatprep.subr.bf16.mxu1 %v2768_v4  ;;  %2820 = vmatprep.subr.bf16.mxu0 %v2770_v6  ;;  %v2904_v4 = vunpack.c.l.s8.bf16 %v2876_v55  ;;  %v2906_v6 = vunpack.c.l.s8.bf16 %v2878_v56  ;;  %v3012_v55 = vld [vmem:[%s4875_s19 + $0x7e8] sm:$0xff]  ;;  %v3014_v56 = vld [vmem:[%s4875_s19 + $0x7f8] sm:$0xff] }
 0x37e   : > { %v5229_v19 = vadd.f32 %v1858_v15, %v5198_v32  ;;  %v5232_v10 = vadd.f32 %v1899_v16, %v5201_v33  ;;  %2809 = vmatprep.mubr.bf16.mxu1 %v4464_v3  ;;  %2850 = vmatprep.mubr.bf16.mxu0 %v4464_v3  ;;  %v2760_v32 = vunpack.c.l.s8.bf16 %v2736_v7  ;;  %v2762_v33 = vunpack.c.l.s8.bf16 %v2738_v8  ;;  %v2872_v7 = vld [vmem:[%s4875_s19 + $0x748] sm:$0xff]  ;;  %v2874_v8 = vld [vmem:[%s4875_s19 + $0x758] sm:$0xff] }
 0x37f   : > { %v1860_v23 = vpop.f32.mrf.mxu1  ;;  %v1901_v28 = vpop.f32.mrf.mxu0  ;;  %v2903_v15 = vunpack.c.l.s8.bf16 %v2875_v61  ;;  %v2905_v16 = vunpack.c.l.s8.bf16 %v2877_v62  ;;  %v2900_v21 = vunpack.c.h.s8.bf16 %v2872_v7  ;;  %v2902_v34 = vunpack.c.h.s8.bf16 %v2874_v8  ;;  %v3011_v61 = vld [vmem:[%s4875_s19 + $0x7e0] sm:$0xff]  ;;  %v3013_v62 = vld [vmem:[%s4875_s19 + $0x7f0] sm:$0xff] }
 0x380   : > { %2780 = vmatpush1.bf16.msra.mxu1 %v2767_v26  ;;  %2821 = vmatpush1.bf16.msra.mxu0 %v2769_v27  ;;  %v2871_v23 = vld [vmem:[%s4875_s19 + $0x740] sm:$0xff]  ;;  %v2873_v28 = vld [vmem:[%s4875_s19 + $0x750] sm:$0xff] }
 0x381   : > { %v1861_v31 = vpop.f32.mrf.mxu1  ;;  %v1902_v22 = vpop.f32.mrf.mxu0  ;;  %2781 = vmatprep.subr.bf16.mxu1 %v2764_v30  ;;  %2822 = vmatprep.subr.bf16.mxu0 %v2766_v18 }
 0x382   : > { %v2899_v31 = vunpack.c.h.s8.bf16 %v2871_v23  ;;  %v2901_v22 = vunpack.c.h.s8.bf16 %v2873_v28 }
 0x384   : > { %2782 = vmatpush1.bf16.msra.mxu1 %v2763_v14  ;;  %2823 = vmatpush1.bf16.msra.mxu0 %v2765_v29 }
 0x385   : > { %2783 = vmatprep.subr.bf16.mxu1 %v2760_v32  ;;  %2824 = vmatprep.subr.bf16.mxu0 %v2762_v33 }
 0x388   : > { %2784 = vmatpush1.bf16.msra.mxu1 %v2759_v35  ;;  %2825 = vmatpush1.bf16.msra.mxu0 %v2761_v12  ;;  %v2895_v35 = vunpack.c.l.s8.bf16 %v2871_v23  ;;  %v2897_v12 = vunpack.c.l.s8.bf16 %v2873_v28  ;;  %v3007_v28 = vld [vmem:[%s4875_s19 + $0x7c0] sm:$0xff] }
 0x389   : > { %2785 = vmatprep.subr.bf16.mxu1 %v2756_v36  ;;  %2826 = vmatprep.subr.bf16.mxu0 %v2758_v37  ;;  %v2892_v36 = vunpack.c.h.s8.bf16 %v2868_v11  ;;  %v2894_v37 = vunpack.c.h.s8.bf16 %v2870_v20 }
 0x38c   : > { %2786 = vmatpush1.bf16.msra.mxu1 %v2755_v40  ;;  %2827 = vmatpush1.bf16.msra.mxu0 %v2757_v41  ;;  %v2891_v40 = vunpack.c.h.s8.bf16 %v2867_v38  ;;  %v2893_v41 = vunpack.c.h.s8.bf16 %v2869_v39 }
 0x38d   : > { %2787 = vmatprep.subr.bf16.mxu1 %v2752_v42  ;;  %2828 = vmatprep.subr.bf16.mxu0 %v2754_v43  ;;  %v2888_v42 = vunpack.c.l.s8.bf16 %v2868_v11  ;;  %v2890_v43 = vunpack.c.l.s8.bf16 %v2870_v20  ;;  %v3006_v11 = vld [vmem:[%s4875_s19 + $0x7b8] sm:$0xff]  ;;  %v3031_v20 = vunpack.c.l.s8.bf16 %v3007_v28 }
 0x390   : > { %2788 = vmatpush1.bf16.msra.mxu1 %v2751_v46  ;;  %2829 = vmatpush1.bf16.msra.mxu0 %v2753_v47  ;;  %v2887_v46 = vunpack.c.l.s8.bf16 %v2867_v38  ;;  %v2889_v47 = vunpack.c.l.s8.bf16 %v2869_v39  ;;  %v3005_v38 = vld [vmem:[%s4875_s19 + $0x7b0] sm:$0xff] }
 0x391   : > { %2789 = vmatprep.subr.bf16.mxu1 %v2748_v48  ;;  %2830 = vmatprep.subr.bf16.mxu0 %v2750_v49  ;;  %v2884_v48 = vunpack.c.h.s8.bf16 %v2864_v44  ;;  %v2886_v49 = vunpack.c.h.s8.bf16 %v2866_v45 }
 0x394   : > { %2790 = vmatpush1.bf16.msra.mxu1 %v2747_v52  ;;  %2831 = vmatpush1.bf16.msra.mxu0 %v2749_v17  ;;  %v2883_v52 = vunpack.c.h.s8.bf16 %v2863_v50  ;;  %v2885_v17 = vunpack.c.h.s8.bf16 %v2865_v51 }
 0x395   : > { %2791 = vmatprep.subr.bf16.mxu1 %v2744_v53  ;;  %2832 = vmatprep.subr.bf16.mxu0 %v2746_v54  ;;  %v2880_v53 = vunpack.c.l.s8.bf16 %v2864_v44  ;;  %v2882_v54 = vunpack.c.l.s8.bf16 %v2866_v45  ;;  %v3002_v44 = vld [vmem:[%s4875_s19 + $0x798] sm:$0xff] }
 0x398   : > { %2792 = vmatpush1.bf16.msra.mxu1 %v2743_v57  ;;  %2833 = vmatpush1.bf16.msra.mxu0 %v2745_v58  ;;  %v2879_v57 = vunpack.c.l.s8.bf16 %v2863_v50  ;;  %v2881_v58 = vunpack.c.l.s8.bf16 %v2865_v51  ;;  %v3001_v50 = vld [vmem:[%s4875_s19 + $0x790] sm:$0xff] }
 0x399   : > { %2913 = vmatprep.subr.bf16.mxu1 %v2908_v59  ;;  %2954 = vmatprep.subr.bf16.mxu0 %v2910_v60  ;;  %v3044_v59 = vunpack.c.h.s8.bf16 %v3012_v55  ;;  %v3046_v60 = vunpack.c.h.s8.bf16 %v3014_v56 }
 0x39b   : > { %v1993_v2 = vpop.f32.mrf.mxu1  ;;  %v2034_v9 = vpop.f32.mrf.mxu0  ;;  %2810 = vmatmul.mubr.bf16.vlgmr.msra.gmra.mxu1 %v2775_v0  ;;  %2851 = vmatmul.mubr.bf16.vlgmr.msra.gmra.mxu0 %v2775_v0  ;;  %v2911_v0 = vrot.slane %v5148_v5, 2  ;;  %v3039_v5 = vunpack.c.l.s8.bf16 %v3011_v61 }
 0x39c   : > { %v5252_v26 = vadd.f32 %v1993_v2, %v5221_v24  ;;  %v5255_v27 = vadd.f32 %v2034_v9, %v5224_v25  ;;  %2914 = vmatpush1.bf16.msra.mxu1 %v2907_v63  ;;  %2955 = vmatpush1.bf16.msra.mxu0 %v2909_v13  ;;  %v3043_v63 = vunpack.c.h.s8.bf16 %v3011_v61  ;;  %v3045_v13 = vunpack.c.h.s8.bf16 %v3013_v62  ;;  %v1061_v61 = vld [vmem:[%s4875_s19 + $0x70] sm:$0xff] }
 0x39d   : > { %v1995_v30 = vpop.f32.mrf.mxu1  ;;  %v2036_v18 = vpop.f32.mrf.mxu0  ;;  %2915 = vmatprep.subr.bf16.mxu1 %v2904_v4  ;;  %2956 = vmatprep.subr.bf16.mxu0 %v2906_v6  ;;  %v3040_v4 = vunpack.c.l.s8.bf16 %v3012_v55  ;;  %v3042_v6 = vunpack.c.l.s8.bf16 %v3014_v56  ;;  %v1062_v55 = vld [vmem:[%s4875_s19 + $0x78] sm:$0xff] }
 0x39e   : > { %v5260_v14 = vadd.f32 %v1995_v30, %v5229_v19  ;;  %v5263_v24 = vadd.f32 %v2036_v18, %v5232_v10  ;;  %2945 = vmatprep.mubr.bf16.mxu1 %v4464_v3  ;;  %2986 = vmatprep.mubr.bf16.mxu0 %v4464_v3  ;;  %v2896_v19 = vunpack.c.l.s8.bf16 %v2872_v7  ;;  %v2898_v10 = vunpack.c.l.s8.bf16 %v2874_v8  ;;  %v3008_v7 = vld [vmem:[%s4875_s19 + $0x7c8] sm:$0xff]  ;;  %v3010_v8 = vld [vmem:[%s4875_s19 + $0x7d8] sm:$0xff] }
 0x39f   : > { %v1997_v25 = vpop.f32.mrf.mxu1  ;;  %v2038_v29 = vpop.f32.mrf.mxu0  ;;  %v3041_v30 = vunpack.c.l.s8.bf16 %v3013_v62  ;;  %v3038_v23 = vunpack.c.h.s8.bf16 %v3010_v8 }
 0x3a0   : > { %2916 = vmatpush1.bf16.msra.mxu1 %v2903_v15  ;;  %2957 = vmatpush1.bf16.msra.mxu0 %v2905_v16  ;;  %v3009_v25 = vld [vmem:[%s4875_s19 + $0x7d0] sm:$0xff] }
 0x3a1   : > { %v1998_v32 = vpop.f32.mrf.mxu1  ;;  %v2039_v33 = vpop.f32.mrf.mxu0  ;;  %2917 = vmatprep.subr.bf16.mxu1 %v2900_v21  ;;  %2958 = vmatprep.subr.bf16.mxu0 %v2902_v34  ;;  %v3036_v34 = vunpack.c.h.s8.bf16 %v3008_v7 }
 0x3a2   : > { %v3037_v32 = vunpack.c.h.s8.bf16 %v3009_v25 }
 0x3a4   : > { %2918 = vmatpush1.bf16.msra.mxu1 %v2899_v31  ;;  %2959 = vmatpush1.bf16.msra.mxu0 %v2901_v22  ;;  %v3035_v22 = vunpack.c.h.s8.bf16 %v3007_v28  ;;  %v1055_v28 = vld [vmem:[%s4875_s19 + $0x40] sm:$0xff] }
 0x3a5   : > { %2919 = vmatprep.subr.bf16.mxu1 %v2896_v19  ;;  %2960 = vmatprep.subr.bf16.mxu0 %v2898_v10  ;;  %v3004_v10 = vld [vmem:[%s4875_s19 + $0x7a8] sm:$0xff] }
 0x3a8   : > { %2920 = vmatpush1.bf16.msra.mxu1 %v2895_v35  ;;  %2961 = vmatpush1.bf16.msra.mxu0 %v2897_v12  ;;  %v3033_v35 = vunpack.c.l.s8.bf16 %v3009_v25  ;;  %v3028_v12 = vunpack.c.h.s8.bf16 %v3004_v10  ;;  %v1057_v25 = vld [vmem:[%s4875_s19 + $0x50] sm:$0xff] }
 0x3a9   : > { %2921 = vmatprep.subr.bf16.mxu1 %v2892_v36  ;;  %2962 = vmatprep.subr.bf16.mxu0 %v2894_v37  ;;  %v3030_v36 = vunpack.c.h.s8.bf16 %v3006_v11  ;;  %v3003_v37 = vld [vmem:[%s4875_s19 + $0x7a0] sm:$0xff] }
 0x3aa   : > { %v3027_v39 = vunpack.c.h.s8.bf16 %v3003_v37  ;;  %v3023_v45 = vunpack.c.l.s8.bf16 %v3003_v37 }
 0x3ac   : > { %2922 = vmatpush1.bf16.msra.mxu1 %v2891_v40  ;;  %2963 = vmatpush1.bf16.msra.mxu0 %v2893_v41  ;;  %v3029_v40 = vunpack.c.h.s8.bf16 %v3005_v38  ;;  %v3024_v41 = vunpack.c.l.s8.bf16 %v3004_v10  ;;  %v1079_v10 = vunpack.c.l.s8.bf16 %v1055_v28 }
 0x3ad   : > { %2923 = vmatprep.subr.bf16.mxu1 %v2888_v42  ;;  %2964 = vmatprep.subr.bf16.mxu0 %v2890_v43  ;;  %v3026_v42 = vunpack.c.l.s8.bf16 %v3006_v11  ;;  %v3000_v43 = vld [vmem:[%s4875_s19 + $0x788] sm:$0xff] }
 0x3b0   : > { %2924 = vmatpush1.bf16.msra.mxu1 %v2887_v46  ;;  %2965 = vmatpush1.bf16.msra.mxu0 %v2889_v47  ;;  %v3025_v46 = vunpack.c.l.s8.bf16 %v3005_v38  ;;  %v3020_v47 = vunpack.c.h.s8.bf16 %v3000_v43 }
 0x3b1   : > { %2925 = vmatprep.subr.bf16.mxu1 %v2884_v48  ;;  %2966 = vmatprep.subr.bf16.mxu0 %v2886_v49  ;;  %v3022_v48 = vunpack.c.h.s8.bf16 %v3002_v44  ;;  %v2999_v49 = vld [vmem:[%s4875_s19 + $0x780] sm:$0xff] }
 0x3b2   : > { %v3019_v51 = vunpack.c.h.s8.bf16 %v2999_v49  ;;  %v3015_v56 = vunpack.c.l.s8.bf16 %v2999_v49 }
 0x3b4   : > { %2926 = vmatpush1.bf16.msra.mxu1 %v2883_v52  ;;  %2967 = vmatpush1.bf16.msra.mxu0 %v2885_v17  ;;  %v3021_v52 = vunpack.c.h.s8.bf16 %v3001_v50  ;;  %v3016_v17 = vunpack.c.l.s8.bf16 %v3000_v43 }
 0x3b5   : > { %2927 = vmatprep.subr.bf16.mxu1 %v2880_v53  ;;  %2968 = vmatprep.subr.bf16.mxu0 %v2882_v54  ;;  %v3018_v53 = vunpack.c.l.s8.bf16 %v3002_v44  ;;  %v1060_v54 = vld [vmem:[%s4875_s19 + $0x68] sm:$0xff] }
 0x3b8   : > { %2928 = vmatpush1.bf16.msra.mxu1 %v2879_v57  ;;  %2969 = vmatpush1.bf16.msra.mxu0 %v2881_v58  ;;  %v3017_v57 = vunpack.c.l.s8.bf16 %v3001_v50  ;;  %v1092_v58 = vunpack.c.h.s8.bf16 %v1060_v54 }
 0x3b9   : > { %3049 = vmatprep.subr.bf16.mxu1 %v3044_v59  ;;  %3090 = vmatprep.subr.bf16.mxu0 %v3046_v60  ;;  %v1094_v59 = vunpack.c.h.s8.bf16 %v1062_v55  ;;  %v1059_v60 = vld [vmem:[%s4875_s19 + $0x60] sm:$0xff] }
 0x3ba   : > { %v1091_v62 = vunpack.c.h.s8.bf16 %v1059_v60 }
 0x3bb   : > { %v2129_v2 = vpop.f32.mrf.mxu1  ;;  %v2170_v9 = vpop.f32.mrf.mxu0  ;;  %2946 = vmatmul.mubr.bf16.vlgmr.msra.gmra.mxu1 %v2911_v0  ;;  %2987 = vmatmul.mubr.bf16.vlgmr.msra.gmra.mxu0 %v2911_v0  ;;  %v1088_v0 = vunpack.c.l.s8.bf16 %v1060_v54 }
 0x3bc   : > { %v5283_v15 = vadd.f32 %v2129_v2, %v5252_v26  ;;  %v5286_v16 = vadd.f32 %v2170_v9, %v5255_v27  ;;  %3050 = vmatpush1.bf16.msra.mxu1 %v3043_v63  ;;  %3091 = vmatpush1.bf16.msra.mxu0 %v3045_v13  ;;  %v1093_v63 = vunpack.c.h.s8.bf16 %v1061_v61  ;;  %v3047_v13 = vrot.slane %v5183_v1, 2 }
 0x3bd   : > { %v2131_v18 = vpop.f32.mrf.mxu1  ;;  %v2172_v21 = vpop.f32.mrf.mxu0  ;;  %3051 = vmatprep.subr.bf16.mxu1 %v3040_v4  ;;  %3092 = vmatprep.subr.bf16.mxu0 %v3042_v6  ;;  %v1090_v4 = vunpack.c.l.s8.bf16 %v1062_v55  ;;  %v1056_v6 = vld [vmem:[%s4875_s19 + $0x48] sm:$0xff]  ;;  %v1087_v1 = vunpack.c.l.s8.bf16 %v1059_v60 }
 0x3be   : > { %v5291_v29 = vadd.f32 %v2131_v18, %v5260_v14  ;;  %v5294_v26 = vadd.f32 %v2172_v21, %v5263_v24  ;;  %3081 = vmatprep.mubr.bf16.mxu1 %v4464_v3  ;;  %3122 = vmatprep.mubr.bf16.mxu0 %v4464_v3  ;;  %v3032_v14 = vunpack.c.l.s8.bf16 %v3008_v7  ;;  %v3034_v24 = vunpack.c.l.s8.bf16 %v3010_v8  ;;  %v1058_v7 = vld [vmem:[%s4875_s19 + $0x58] sm:$0xff] }
 0x3bf   : > { %v2133_v27 = vpop.f32.mrf.mxu1  ;;  %v2174_v31 = vpop.f32.mrf.mxu0 }
 0x3c0   : > { %3052 = vmatpush1.bf16.msra.mxu1 %v3039_v5  ;;  %3093 = vmatpush1.bf16.msra.mxu0 %v3041_v30  ;;  %v1089_v30 = vunpack.c.l.s8.bf16 %v1061_v61 }
 0x3c1   : > { %v2134_v33 = vpop.f32.mrf.mxu1  ;;  %v2175_v19 = vpop.f32.mrf.mxu0  ;;  %3053 = vmatprep.subr.bf16.mxu1 %v3036_v34  ;;  %3094 = vmatprep.subr.bf16.mxu0 %v3038_v23  ;;  %v1084_v34 = vunpack.c.h.s8.bf16 %v1056_v6  ;;  %v1086_v23 = vunpack.c.h.s8.bf16 %v1058_v7 }
 0x3c4   : > { %3054 = vmatpush1.bf16.msra.mxu1 %v3035_v22  ;;  %3095 = vmatpush1.bf16.msra.mxu0 %v3037_v32  ;;  %v1083_v22 = vunpack.c.h.s8.bf16 %v1055_v28  ;;  %v1085_v32 = vunpack.c.h.s8.bf16 %v1057_v25  ;;  %v3296_v28 = vld [vmem:[%s4889_s30 + $0x38] sm:$0xff] }
 0x3c5   : > { %3055 = vmatprep.subr.bf16.mxu1 %v3032_v14  ;;  %3096 = vmatprep.subr.bf16.mxu0 %v3034_v24  ;;  %v1052_v14 = vld [vmem:[%s4875_s19 + $0x28] sm:$0xff]  ;;  %v1054_v24 = vld [vmem:[%s4875_s19 + $0x38] sm:$0xff] }
 0x3c6   : > { %v1076_v11 = vunpack.c.h.s8.bf16 %v1052_v14  ;;  %v1072_v38 = vunpack.c.l.s8.bf16 %v1052_v14 }
 0x3c8   : > { %3056 = vmatpush1.bf16.msra.mxu1 %v3031_v20  ;;  %3097 = vmatpush1.bf16.msra.mxu0 %v3033_v35  ;;  %v1078_v20 = vunpack.c.h.s8.bf16 %v1054_v24  ;;  %v1051_v35 = vld [vmem:[%s4875_s19 + $0x20] sm:$0xff] }
 0x3c9   : > { %3057 = vmatprep.subr.bf16.mxu1 %v3028_v12  ;;  %3098 = vmatprep.subr.bf16.mxu0 %v3030_v36  ;;  %v1053_v12 = vld [vmem:[%s4875_s19 + $0x30] sm:$0xff]  ;;  %v1075_v36 = vunpack.c.h.s8.bf16 %v1051_v35 }
 0x3ca   : > { %v1077_v37 = vunpack.c.h.s8.bf16 %v1053_v12  ;;  %v1073_v43 = vunpack.c.l.s8.bf16 %v1053_v12 }
 0x3cc   : > { %3058 = vmatpush1.bf16.msra.mxu1 %v3027_v39  ;;  %3099 = vmatpush1.bf16.msra.mxu0 %v3029_v40  ;;  %v1074_v39 = vunpack.c.l.s8.bf16 %v1054_v24  ;;  %v1048_v40 = vld [vmem:[%s4875_s19 + $0x8] sm:$0xff] }
 0x3cd   : > { %3059 = vmatprep.subr.bf16.mxu1 %v3024_v41  ;;  %3100 = vmatprep.subr.bf16.mxu0 %v3026_v42  ;;  %v1050_v41 = vld [vmem:[%s4875_s19 + $0x18] sm:$0xff]  ;;  %v1071_v42 = vunpack.c.l.s8.bf16 %v1051_v35  ;;  %v1068_v44 = vunpack.c.h.s8.bf16 %v1048_v40  ;;  %v1064_v50 = vunpack.c.l.s8.bf16 %v1048_v40 }
 0x3d0   : > { %3060 = vmatpush1.bf16.msra.mxu1 %v3023_v45  ;;  %3101 = vmatpush1.bf16.msra.mxu0 %v3025_v46  ;;  %v1070_v45 = vunpack.c.h.s8.bf16 %v1050_v41  ;;  %v1047_v46 = vld [vmem:[%s4875_s19] sm:$0xff] }
 0x3d1   : > { %3061 = vmatprep.subr.bf16.mxu1 %v3020_v47  ;;  %3102 = vmatprep.subr.bf16.mxu0 %v3022_v48  ;;  %v1049_v47 = vld [vmem:[%s4875_s19 + $0x10] sm:$0xff]  ;;  %v1067_v48 = vunpack.c.h.s8.bf16 %v1047_v46 }
 0x3d2   : > { %v1069_v49 = vunpack.c.h.s8.bf16 %v1049_v47 }
 0x3d4   : > { %3062 = vmatpush1.bf16.msra.mxu1 %v3019_v51  ;;  %3103 = vmatpush1.bf16.msra.mxu0 %v3021_v52  ;;  %v1066_v51 = vunpack.c.l.s8.bf16 %v1050_v41  ;;  %v1063_v52 = vunpack.c.l.s8.bf16 %v1047_v46 }
 0x3d5   : > { %3063 = vmatprep.subr.bf16.mxu1 %v3016_v17  ;;  %3104 = vmatprep.subr.bf16.mxu0 %v3018_v53  ;;  %v1065_v17 = vunpack.c.l.s8.bf16 %v1049_v47  ;;  %v1095_v53 = vld [vmem:[%s5486_s22] sm:$0xff] }
 0x3d6   : > { %v1096_v54 = vpack.c.bf16 %v1095_v53, %v1095_v53 }
 0x3d8   : > { %3064 = vmatpush1.bf16.msra.mxu1 %v3015_v56  ;;  %3105 = vmatpush1.bf16.msra.mxu0 %v3017_v57 }
 0x3d9   : > { %3151 = vmatprep.subr.bf16.mxu1 %v1092_v58  ;;  %3192 = vmatprep.subr.bf16.mxu0 %v1094_v59 }
 0x3db   : > { %v2265_v8 = vpop.f32.mrf.mxu1  ;;  %v2306_v2 = vpop.f32.mrf.mxu0  ;;  %3082 = vmatmul.mubr.bf16.vlgmr.msra.gmra.mxu1 %v3047_v13  ;;  %3123 = vmatmul.mubr.bf16.vlgmr.msra.gmra.mxu0 %v3047_v13 }
 0x3dc   : > { %v5314_v9 = vadd.f32 %v2265_v8, %v5283_v15  ;;  %v5317_v5 = vadd.f32 %v2306_v2, %v5286_v16  ;;  %3152 = vmatpush1.bf16.msra.mxu1 %v1091_v62  ;;  %3193 = vmatpush1.bf16.msra.mxu0 %v1093_v63 }
 0x3dd   : > { %v2267_v18 = vpop.f32.mrf.mxu1  ;;  %v2308_v21 = vpop.f32.mrf.mxu0  ;;  %3153 = vmatprep.subr.bf16.mxu1 %v1088_v0  ;;  %3194 = vmatprep.subr.bf16.mxu0 %v1090_v4 }
 0x3de   : > { %v5322_v27 = vadd.f32 %v2267_v18, %v5291_v29  ;;  %v5325_v15 = vadd.f32 %v2308_v21, %v5294_v26  ;;  %3183 = vmatprep.mubr.bf16.mxu1 %v4464_v3  ;;  %3224 = vmatprep.mubr.bf16.mxu0 %v4464_v3  ;;  %v1080_v29 = vunpack.c.l.s8.bf16 %v1056_v6  ;;  %v1082_v26 = vunpack.c.l.s8.bf16 %v1058_v7 }
 0x3df   : > { %v2269_v16 = vpop.f32.mrf.mxu1  ;;  %v2310_v31 = vpop.f32.mrf.mxu0  ;;  %v1081_v3 = vunpack.c.l.s8.bf16 %v1057_v25  ;;  %v3304_v25 = vld [vmem:[%s4889_s30 + $0x78] sm:$0xff] }
 0x3e0   : > { %3154 = vmatpush1.bf16.msra.mxu1 %v1087_v1  ;;  %3195 = vmatpush1.bf16.msra.mxu0 %v1089_v30  ;;  %v3336_v16 = vunpack.c.h.s8.bf16 %v3304_v25 }
 0x3e1   : > { %v2270_v33 = vpop.f32.mrf.mxu1  ;;  %v2311_v19 = vpop.f32.mrf.mxu0  ;;  %3155 = vmatprep.subr.bf16.mxu1 %v1084_v34  ;;  %3196 = vmatprep.subr.bf16.mxu0 %v1086_v23 }
 0x3e2   : > { %v3335_v19 = vunpack.c.l.s8.bf16 %v3304_v25 }
 0x3e4   : > { %3156 = vmatpush1.bf16.msra.mxu1 %v1083_v22  ;;  %3197 = vmatpush1.bf16.msra.mxu0 %v1085_v32  ;;  %v3300_v22 = vld [vmem:[%s4889_s30 + $0x58] sm:$0xff]  ;;  %v3319_v32 = vunpack.c.l.s8.bf16 %v3296_v28 }
 0x3e5   : > { %3157 = vmatprep.subr.bf16.mxu1 %v1080_v29  ;;  %3198 = vmatprep.subr.bf16.mxu0 %v1082_v26  ;;  %v3328_v33 = vunpack.c.h.s8.bf16 %v3300_v22  ;;  %v3295_v29 = vld [vmem:[%s4889_s30 + $0x30] sm:$0xff]  ;;  %v3327_v24 = vunpack.c.l.s8.bf16 %v3300_v22 }
 0x3e6   : > { %v3303_v26 = vld [vmem:[%s4889_s30 + $0x70] sm:$0xff] }
 0x3e8   : > { %3158 = vmatpush1.bf16.msra.mxu1 %v1079_v10  ;;  %3199 = vmatpush1.bf16.msra.mxu0 %v1081_v3  ;;  %v3318_v10 = vunpack.c.h.s8.bf16 %v3295_v29  ;;  %v3334_v3 = vunpack.c.h.s8.bf16 %v3303_v26 }
 0x3e9   : > { %3159 = vmatprep.subr.bf16.mxu1 %v1076_v11  ;;  %3200 = vmatprep.subr.bf16.mxu0 %v1078_v20  ;;  %v3291_v11 = vld [vmem:[%s4889_s30 + $0x10] sm:$0xff] }
 0x3ea   : > { %v3299_v20 = vld [vmem:[%s4889_s30 + $0x50] sm:$0xff]  ;;  %v3310_v35 = vunpack.c.h.s8.bf16 %v3291_v11  ;;  %v3309_v40 = vunpack.c.l.s8.bf16 %v3291_v11 }
 0x3eb   : > { %v3326_v12 = vunpack.c.h.s8.bf16 %v3299_v20  ;;  %v3325_v41 = vunpack.c.l.s8.bf16 %v3299_v20 }
 0x3ec   : > { %3160 = vmatpush1.bf16.msra.mxu1 %v1075_v36  ;;  %3201 = vmatpush1.bf16.msra.mxu0 %v1077_v37  ;;  %v3317_v36 = vunpack.c.l.s8.bf16 %v3295_v29  ;;  %v3333_v37 = vunpack.c.l.s8.bf16 %v3303_v26 }
 0x3ed   : > { %3161 = vmatprep.subr.bf16.mxu1 %v1072_v38  ;;  %3202 = vmatprep.subr.bf16.mxu0 %v1074_v39  ;;  %v3294_v38 = vld [vmem:[%s4889_s30 + $0x28] sm:$0xff] }
 0x3ee   : > { %v3302_v39 = vld [vmem:[%s4889_s30 + $0x68] sm:$0xff] }
 0x3f0   : > { %3162 = vmatpush1.bf16.msra.mxu1 %v1071_v42  ;;  %3203 = vmatpush1.bf16.msra.mxu0 %v1073_v43  ;;  %v3316_v42 = vunpack.c.h.s8.bf16 %v3294_v38  ;;  %v3332_v43 = vunpack.c.h.s8.bf16 %v3302_v39 }
 0x3f1   : > { %3163 = vmatprep.subr.bf16.mxu1 %v1068_v44  ;;  %3204 = vmatprep.subr.bf16.mxu0 %v1070_v45  ;;  %v3290_v44 = vld [vmem:[%s4889_s30 + $0x8] sm:$0xff] }
 0x3f2   : > { %v3298_v45 = vld [vmem:[%s4889_s30 + $0x48] sm:$0xff]  ;;  %v3308_v46 = vunpack.c.h.s8.bf16 %v3290_v44 }
 0x3f3   : > { %v3324_v47 = vunpack.c.h.s8.bf16 %v3298_v45 }
 0x3f4   : > { %3164 = vmatpush1.bf16.msra.mxu1 %v1067_v48  ;;  %3205 = vmatpush1.bf16.msra.mxu0 %v1069_v49 }
 0x3f5   : > { %3165 = vmatprep.subr.bf16.mxu1 %v1064_v50  ;;  %3206 = vmatprep.subr.bf16.mxu0 %v1066_v51  ;;  %v3315_v50 = vunpack.c.l.s8.bf16 %v3294_v38  ;;  %v3331_v51 = vunpack.c.l.s8.bf16 %v3302_v39 }
 0x3f8   : > { %3166 = vmatpush1.bf16.msra.mxu1 %v1063_v52  ;;  %3207 = vmatpush1.bf16.msra.mxu0 %v1065_v17 }
 0x3f9   : > { %3750 = vmatprep.subr.bf16.mxu0 %v3336_v16 }
 0x3fb   : > { %v2400_v55 = vpop.f32.mrf.mxu1  ;;  %v2441_v56 = vpop.f32.mrf.mxu0  ;;  %3184 = vmatmul.mubr.bf16.vlgmr.msra.gmra.mxu1 %v1096_v54  ;;  %3225 = vmatmul.mubr.bf16.vlgmr.msra.gmra.mxu0 %v1096_v54 }
 0x3fc   : > { %v2448_v57 = vadd.f32 %v2400_v55, %v5314_v9  ;;  %v2450_v58 = vadd.f32 %v2441_v56, %v5317_v5  ;;  %3751 = vmatpush3.bf16.msra.mxu0 %v3328_v33  ;;  %v3307_v55 = vunpack.c.l.s8.bf16 %v3290_v44  ;;  %v3323_v56 = vunpack.c.l.s8.bf16 %v3298_v45 }
 0x3fd   : > { %v2402_v59 = vpop.f32.mrf.mxu1  ;;  %v2443_v60 = vpop.f32.mrf.mxu0  ;;  %3752 = vmatprep.subr.bf16.mxu0 %v3335_v19 }
 0x3fe   : > { %v2449_v61 = vadd.f32 %v2402_v59, %v5322_v27  ;;  %v2451_v62 = vadd.f32 %v2443_v60, %v5325_v15  ;;  %v3292_v27 = vld [vmem:[%s4889_s30 + $0x18] sm:$0xff]  ;;  %v3320_v15 = vunpack.c.h.s8.bf16 %v3296_v28  ;;  %v3293_v59 = vld [vmem:[%s4889_s30 + $0x20] sm:$0xff] }
 0x3ff   : > { %v2404_v63 = vpop.f32.mrf.mxu1  ;;  %v2445_v13 = vpop.f32.mrf.mxu0  ;;  %v3312_v31 = vunpack.c.h.s8.bf16 %v3292_v27  ;;  %v3311_v14 = vunpack.c.l.s8.bf16 %v3292_v27  ;;  %v3301_v60 = vld [vmem:[%s4889_s30 + $0x60] sm:$0xff] }
 0x400   : > { %3728 = vmatprep.subr.bf16.mxu1 %v3320_v15  ;;  %3753 = vmatpush3.bf16.msra.mxu0 %v3327_v24  ;;  %v3314_v63 = vunpack.c.h.s8.bf16 %v3293_v59  ;;  %v3330_v13 = vunpack.c.h.s8.bf16 %v3301_v60 }
 0x401   : > { %v2405_v0 = vpop.f32.mrf.mxu1  ;;  %v2446_v4 = vpop.f32.mrf.mxu0  ;;  %3729 = vmatpush3.bf16.msra.mxu1 %v3312_v31  ;;  %3754 = vmatprep.subr.bf16.mxu0 %v3334_v3 }
 0x402   : > { %3730 = vmatprep.subr.bf16.mxu1 %v3319_v32  ;;  %v3289_v0 = vld [vmem:[%s4889_s30] sm:$0xff] }
 0x403   : > { %v3297_v4 = vld [vmem:[%s4889_s30 + $0x40] sm:$0xff] }
 0x404   : > { %3755 = vmatpush3.bf16.msra.mxu0 %v3326_v12 }
 0x405   : > { %3731 = vmatpush3.bf16.msra.mxu1 %v3311_v14  ;;  %3756 = vmatprep.subr.bf16.mxu0 %v3333_v37 }
 0x406   : > { %3732 = vmatprep.subr.bf16.mxu1 %v3318_v10 }
 0x408   : > { %3757 = vmatpush3.bf16.msra.mxu0 %v3325_v41 }
 0x409   : > { %3733 = vmatpush3.bf16.msra.mxu1 %v3310_v35  ;;  %3758 = vmatprep.subr.bf16.mxu0 %v3332_v43 }
 0x40a   : > { %3734 = vmatprep.subr.bf16.mxu1 %v3317_v36 }
 0x40c   : > { %3759 = vmatpush3.bf16.msra.mxu0 %v3324_v47 }
 0x40d   : > { %3735 = vmatpush3.bf16.msra.mxu1 %v3309_v40  ;;  %3760 = vmatprep.subr.bf16.mxu0 %v3331_v51  ;;  %v3135_v40 = vlaneseq }
 0x40e   : > { %3736 = vmatprep.subr.bf16.mxu1 %v3316_v42 }
 0x40f   : > { %v3136_v41 = vshrl.u32 %v3135_v40, 7 }
 0x410   : > { %3761 = vmatpush3.bf16.msra.mxu0 %v3323_v56 }
 0x411   : > { %3737 = vmatpush3.bf16.msra.mxu1 %v3308_v46  ;;  %3762 = vmatprep.subr.bf16.mxu0 %v3330_v13  ;;  %v3137_v44 = vsub.s32 0, %v3136_v41  ;;  %v3245_v45 = vsub.s32 2, %v3136_v41  ;;  %v3241_v51 = vsub.s32 1, %v3136_v41 }
 0x412   : > { %3738 = vmatprep.subr.bf16.mxu1 %v3315_v50  ;;  %v3233_v50 = vld [vmem:[%s4881_s13] sm:$0xf] }
 0x413   : > { %v3238_v56 = vrot.slane %v3233_v50, %v3137_v44 }
 0x415   : > { %3739 = vmatpush3.bf16.msra.mxu1 %v3307_v55 }
 0x416   : > { %3740 = vmatprep.subr.bf16.mxu1 %v3314_v63  ;;  %v3242_v63 = vrot.slane %v3233_v50, %v3241_v51 }
 0x41b   : > { %v2538_v6 = vpop.f32.mrf.mxu1  ;;  %v2579_v7 = vpop.f32.mrf.mxu0 }
 0x41c   : > { %v5344_v8 = vadd.f32 %v2538_v6, %v2448_v57  ;;  %v5346_v2 = vadd.f32 %v2579_v7, %v2450_v58  ;;  %v3306_v6 = vunpack.c.h.s8.bf16 %v3289_v0  ;;  %v3322_v7 = vunpack.c.h.s8.bf16 %v3297_v4 }
 0x41d   : > { %v2540_v9 = vpop.f32.mrf.mxu1  ;;  %v2581_v5 = vpop.f32.mrf.mxu0 }
 0x41e   : > { %v5348_v1 = vadd.f32 %v2540_v9, %v2449_v61  ;;  %v5350_v30 = vadd.f32 %v2581_v5, %v2451_v62  ;;  %3741 = vmatpush3.bf16.msra.mxu1 %v3306_v6  ;;  %3763 = vmatpush3.bf16.msra.mxu0 %v3322_v7  ;;  %v3313_v9 = vunpack.c.l.s8.bf16 %v3293_v59  ;;  %v3329_v5 = vunpack.c.l.s8.bf16 %v3301_v60 }
 0x41f   : > { %v2542_v18 = vpop.f32.mrf.mxu1  ;;  %v2583_v21 = vpop.f32.mrf.mxu0 }
 0x420   : > { %3742 = vmatprep.subr.bf16.mxu1 %v3313_v9  ;;  %3764 = vmatprep.subr.bf16.mxu0 %v3329_v5 }
 0x421   : > { %v2543_v34 = vpop.f32.mrf.mxu1  ;;  %v2584_v23 = vpop.f32.mrf.mxu0 }
 0x43b   : > { %v2675_v48 = vpop.f32.mrf.mxu1  ;;  %v2716_v49 = vpop.f32.mrf.mxu0 }
 0x43c   : > { %v2723_v52 = vadd.f32 %v2675_v48, %v5344_v8  ;;  %v2725_v17 = vadd.f32 %v2716_v49, %v5346_v2 }
 0x43d   : > { %v2677_v53 = vpop.f32.mrf.mxu1  ;;  %v2718_v54 = vpop.f32.mrf.mxu0 }
 0x43e   : > { %v2724_v57 = vadd.f32 %v2677_v53, %v5348_v1  ;;  %v2726_v58 = vadd.f32 %v2718_v54, %v5350_v30  ;;  %v3305_v1 = vunpack.c.l.s8.bf16 %v3289_v0  ;;  %v3321_v30 = vunpack.c.l.s8.bf16 %v3297_v4  ;;  %v3259_v54 = vld [vmem:[%s4883_s4] sm:$0xf] }
 0x43f   : > { %v2679_v61 = vpop.f32.mrf.mxu1  ;;  %v2720_v62 = vpop.f32.mrf.mxu0  ;;  %v3264_v60 = vrot.slane %v3259_v54, %v3137_v44 }
 0x440   : > { %3743 = vmatpush3.bf16.msra.mxu1 %v3305_v1  ;;  %3765 = vmatpush3.bf16.msra.mxu0 %v3321_v30  ;;  %v3272_v62 = vrot.slane %v3259_v54, %v3245_v45 }
 0x441   : > { %v2680_v8 = vpop.f32.mrf.mxu1  ;;  %v2721_v2 = vpop.f32.mrf.mxu0 }
 0x442   : > { %v3268_v2 = vrot.slane %v3259_v54, %v3241_v51 }
 0x45b   : > { %v2811_v18 = vpop.f32.mrf.mxu1  ;;  %v2852_v21 = vpop.f32.mrf.mxu0 }
 0x45c   : > { %v2859_v34 = vadd.f32 %v2811_v18, %v2723_v52  ;;  %v2861_v23 = vadd.f32 %v2852_v21, %v2725_v17  ;;  %v3249_v52 = vsub.s32 3, %v3136_v41 }
 0x45d   : > { %v2813_v28 = vpop.f32.mrf.mxu1  ;;  %v2854_v25 = vpop.f32.mrf.mxu0 }
 0x45e   : > { %v2860_v27 = vadd.f32 %v2813_v28, %v2724_v57  ;;  %v2862_v15 = vadd.f32 %v2854_v25, %v2726_v58  ;;  %v3246_v58 = vrot.slane %v3233_v50, %v3245_v45  ;;  %v3250_v13 = vrot.slane %v3233_v50, %v3249_v52 }
 0x45f   : > { %v2815_v16 = vpop.f32.mrf.mxu1  ;;  %v2856_v31 = vpop.f32.mrf.mxu0  ;;  %v3276_v5 = vrot.slane %v3259_v54, %v3249_v52 }
 0x461   : > { %v2816_v22 = vpop.f32.mrf.mxu1  ;;  %v2857_v32 = vpop.f32.mrf.mxu0 }
 0x47b   : > { %v2947_v33 = vpop.f32.mrf.mxu1  ;;  %v2988_v19 = vpop.f32.mrf.mxu0 }
 0x47c   : > { %v2995_v42 = vadd.f32 %v2947_v33, %v2859_v34  ;;  %v2997_v43 = vadd.f32 %v2988_v19, %v2861_v23 }
 0x47d   : > { %v2949_v29 = vpop.f32.mrf.mxu1  ;;  %v2990_v26 = vpop.f32.mrf.mxu0 }
 0x47e   : > { %v2996_v46 = vadd.f32 %v2949_v29, %v2860_v27  ;;  %v2998_v47 = vadd.f32 %v2990_v26, %v2862_v15 }
 0x47f   : > { %v2951_v14 = vpop.f32.mrf.mxu1  ;;  %v2992_v24 = vpop.f32.mrf.mxu0 }
 0x481   : > { %v2952_v10 = vpop.f32.mrf.mxu1  ;;  %v2993_v3 = vpop.f32.mrf.mxu0 }
 0x49b   : > { %v3083_v11 = vpop.f32.mrf.mxu1  ;;  %v3124_v20 = vpop.f32.mrf.mxu0 }
 0x49c   : > { %v3131_v48 = vadd.f32 %v3083_v11, %v2995_v42  ;;  %v3133_v49 = vadd.f32 %v3124_v20, %v2997_v43 }
 0x49d   : > { %v3085_v35 = vpop.f32.mrf.mxu1  ;;  %v3126_v12 = vpop.f32.mrf.mxu0 }
 0x49e   : > { %v3132_v17 = vadd.f32 %v3085_v35, %v2996_v46  ;;  %v3134_v53 = vadd.f32 %v3126_v12, %v2998_v47  ;;  %v3138_v55 = vrot.slane %v3131_v48, %v3137_v44  ;;  %v3146_v57 = vrot.slane %v3133_v49, %v3137_v44 }
 0x49f   : > { %v3087_v36 = vpop.f32.mrf.mxu1  ;;  %v3128_v37 = vpop.f32.mrf.mxu0 }
 0x4a0   : > { %v3142_v6 = vrot.slane %v3132_v17, %v3137_v44  ;;  %v3150_v7 = vrot.slane %v3134_v53, %v3137_v44 }
 0x4a1   : > { %v3088_v38 = vpop.f32.mrf.mxu1  ;;  %v3129_v39 = vpop.f32.mrf.mxu0 }
 0x4a2   : > { %v3337_v38 = vld [vmem:[#allocation2] sm:$0xff] }
 0x4bb   : > { %v3185_v59 = vpop.f32.mrf.mxu1  ;;  %v3226_v61 = vpop.f32.mrf.mxu0 }
 0x4bc   : > { %v3186_v0 = vadd.f32 %v3185_v59, %v3138_v55  ;;  %v3227_v4 = vadd.f32 %v3226_v61, %v3146_v57 }
 0x4bd   : > { %v3187_v8 = vpop.f32.mrf.mxu1  ;;  %v3228_v9 = vpop.f32.mrf.mxu0 }
 0x4be   : > { %v3255_v1 = vmul.f32 %v3238_v56, %v3186_v0  ;;  %v3257_v30 = vmul.f32 %v3246_v58, %v3227_v4  ;;  %v3188_v18 = vadd.f32 %v3187_v8, %v3142_v6  ;;  %v3229_v21 = vadd.f32 %v3228_v9, %v3150_v7 }
 0x4bf   : > { %v3189_v34 = vpop.f32.mrf.mxu1  ;;  %v3230_v23 = vpop.f32.mrf.mxu0 }
 0x4c0   : > { %v3281_v28 = vadd.f32 %v3264_v60, %v3255_v1  ;;  %v3283_v25 = vadd.f32 %v3272_v62, %v3257_v30  ;;  %v3256_v27 = vmul.f32 %v3242_v63, %v3188_v18  ;;  %v3258_v15 = vmul.f32 %v3250_v13, %v3229_v21 }
 0x4c1   : > { %v3190_v16 = vpop.f32.mrf.mxu1  ;;  %v3231_v31 = vpop.f32.mrf.mxu0 }
 0x4c2   : > { %v3282_v22 = vadd.f32 %v3268_v2, %v3256_v27  ;;  %v3284_v32 = vadd.f32 %v3276_v5, %v3258_v15  ;;  %v3285_v33 = vmax.f32 %v3281_v28, 0.0  ;;  %v3287_v19 = vmax.f32 %v3283_v25, 0.0 }
 0x4c4   : > { %v3286_v29 = vmax.f32 %v3282_v22, 0.0  ;;  %v3288_v26 = vmax.f32 %v3284_v32, 0.0  ;;  %v3338_v10 = vpack.c.bf16 %v3285_v33, %v3285_v33  ;;  %v3340_v3 = vpack.c.bf16 %v3287_v19, %v3287_v19 }
 0x4c6   : > { %v3339_v14 = vpack.c.bf16 %v3286_v29, %v3286_v29  ;;  %v3341_v24 = vpack.c.bf16 %v3288_v26, %v3288_v26 }
 0x4c8   : > { %3374 = vmatprep.mubr.bf16.mxu1 %v3339_v14  ;;  %3414 = vmatprep.mubr.bf16.mxu0 %v3341_v24 }
 0x4c9   : > { %3375 = vmatmul.mubr.bf16.vlgmr.msra.gmra.mxu1 %v3338_v10  ;;  %3415 = vmatmul.mubr.bf16.vlgmr.msra.gmra.mxu0 %v3340_v3 }
 0x589   : > { %v3744_v11 = vpop.f32.mrf.mxu1  ;;  %v3766_v20 = vpop.f32.mrf.mxu0 }
 0x58b   : > { %v3745_v35 = vpop.f32.mrf.mxu1  ;;  %v3767_v12 = vpop.f32.mrf.mxu0 }
 0x58c   : > { %v3746_v36 = vadd.f32 %v3745_v35, %v3744_v11  ;;  %v3768_v37 = vadd.f32 %v3767_v12, %v3766_v20 }
 0x58d   : > { %v3747_v39 = vpop.f32.mrf.mxu1  ;;  %v3769_v40 = vpop.f32.mrf.mxu0 }
 0x58e   : > { %v3417_v41 = vadd.f32 %v3768_v37, %v3746_v36  ;;  %3427 = sbr.rel (%p3704_p5) target bundleno = 1439 (0x59f), region = 152 }
 0x58f   : > { %v3748_v42 = vpop.f32.mrf.mxu1  ;;  %v3770_v43 = vpop.f32.mrf.mxu0 }
 0x590   : > { %v3422_v44 = vadd.f32 %v3417_v41, %v3337_v38 }
 0x592   : > { %3423 = vst [vmem:[#allocation2] sm:$0xff] %v3422_v44 }
 0x593   : > { %v3705_v46 = vld [vmem:[#allocation23] ss:$0 sm:$0xff]  ;;  %v3706_v47 = vld [vmem:[#allocation25] ss:$0 sm:$0xff] }
 0x599   : > { %v3428_v45 = vld [vmem:[#allocation2] sm:$0xff] }
 0x59a   : > { %v3436_v48 = vmul.f32 %v3705_v46, %v3428_v45 }
 0x59c   : > { %v3444_v49 = vadd.f32 %v3706_v47, %v3436_v48 }
 0x59e   : > { %3445 = vst [vmem:[%s5488_s21] sm:$0xff] %v3444_v49 }
 0x59f PF: > { %s5489_s24 = sld [smem:[#allocation38_spill]] }
 0x5a0   : > { %s5490_s21 = sld [smem:[#allocation34_spill]] }
 0x5a1   : > { %s5491_s22 = sld [smem:[#allocation35_spill]] }
 0x5a2   : > { %s5492_s23 = sld [smem:[#allocation39_spill]] }
 0x5a5   : > { %p35_p12 = scmp.ge.s32.totalorder %s5489_s24, 4  }
 0x5a7   :  { %37 = sbr.rel (!%p35_p12) target bundleno = 21 (0x15), region = 208 }
 0x5ac   :  { %3457 = vsyncpa [#allocation4], 1 }
 0x5ad   :  { %3459 = vsyncpa [#allocation4 + $0x1], 1 }
 0x5ae   :  { %3460 = vsyncpa [#allocation6], 1 }
 0x5af   :  { %3461 = vsyncpa [#allocation9], 1 }
 0x5b0   :  { %3462 = vsyncpa [#allocation12], 1 }
 0x5b1   :  { %3463 = vsyncpa [#allocation15], 1 }
 0x5b2   :  { %3464 = vsyncpa [#allocation18], 1 }
 0x5b3   :  { %3466 = vsyncpa [#allocation18 + $0x1], 1 }
 0x5b4   :  { %3467 = vsyncpa [#allocation21], 1 }
 0x5b5   :  { %3469 = vsyncpa [#allocation21 + $0x1], 1 }
 0x5b6   :  { %3470 = vsyncpa [#allocation24], 1 }

</bundles_post_ra>
